<compile_context>
chip_gen: v7x
topology: tpu7x:2x2x1
jax: 0.10.0
libtpu: 0.0.40
codegen_flags: <defaults>
</compile_context>

<pallas_src>
import jax
import jax.numpy as jnp
from jax import lax
from jax.experimental import pallas as pl
from jax.experimental.pallas import tpu as pltpu

_LANE = 128
_CHUNK_ROWS = 256                      # 256x128 f32 = 32 vregs per intermediate
_BR_ALIGN = 256                        # block rows multiple of 256 (covers 8/16/32 packing)
_MAX_BLOCK_BYTES = 4 * 1024 * 1024     # per input per block (Pallas double-buffers)
_VMEM_LIMIT_BYTES = 32 * 1024 * 1024   # explicit scoped-VMEM limit, safe v5e..v7x
_FAST_PATH_BYTES = 2 * 1024 * 1024     # below this, a fused XLA reduce is as fast

_ARBITRARY = getattr(pltpu, "ARBITRARY", "arbitrary")
_CORE_PARALLEL = getattr(pltpu, "CORE_PARALLEL", "parallel")


def _num_tensorcores() -> int:
    """Best-effort TensorCore count (2 on v7x-class chips, else 1)."""
    try:
        info = pltpu.get_tpu_info()
        for attr in ("num_cores", "core_count", "num_tensorcores"):
            n = getattr(info, attr, None)
            if n:
                return max(1, int(n))
    except Exception:
        pass
    return 1


def _sqdiff_sum_kernel(x_ref, t_ref, out_ref):
    """Accumulate sum((x-t)^2) into the resident (1, 8, 128) output block.

    Grid = (num_shards, steps_per_shard):
      axis 0 : CORE_PARALLEL (v7x) / size-1 otherwise
      axis 1 : "arbitrary" reduction; out block index is constant along it,
               so the output stays resident in VMEM across steps.
    """
    step = pl.program_id(1)

    @pl.when(step == 0)
    def _init():
        out_ref[...] = jnp.zeros_like(out_ref)

    br, lane = x_ref.shape
    n_chunks = br // _CHUNK_ROWS  # br is a multiple of _BR_ALIGN == _CHUNK_ROWS

    def body(c, acc):
        r = pl.multiple_of(c * _CHUNK_ROWS, _CHUNK_ROWS)
        xd = x_ref[pl.ds(r, _CHUNK_ROWS), :].astype(jnp.float32)
        td = t_ref[pl.ds(r, _CHUNK_ROWS), :].astype(jnp.float32)
        d = xd - td
        # Fold the chunk onto a vreg-shaped tile: pure VPU adds over the major
        # axis, no per-step cross-lane (XLU) reduction on the hot path.
        return acc + jnp.sum((d * d).reshape(_CHUNK_ROWS // 8, 8, lane),
                             axis=0, keepdims=True)

    acc = lax.fori_loop(0, n_chunks, body,
                        jnp.zeros((1, 8, lane), jnp.float32), unroll=True)
    out_ref[...] += acc


def _sqdiff_sum_main(x2, t2, num_shards, blocks_per_shard, br):
    """Pallas-computed sum of squared differences over the covered rows."""
    rows, lane = x2.shape

    def idx(s, i):
        return (s * blocks_per_shard + i, 0)

    shard_sem = _CORE_PARALLEL if num_shards > 1 else _ARBITRARY

    partials = pl.pallas_call(
        _sqdiff_sum_kernel,
        out_shape=jax.ShapeDtypeStruct((num_shards, 8, lane), jnp.float32),
        grid_spec=pltpu.PrefetchScalarGridSpec(
            num_scalar_prefetch=0,
            grid=(num_shards, blocks_per_shard),
            in_specs=[
                pl.BlockSpec((br, lane), idx),
                pl.BlockSpec((br, lane), idx),
            ],
            # Fully (8,128)-aligned per-shard output block; the accumulator.
            out_specs=pl.BlockSpec((1, 8, lane), lambda s, i: (s, 0, 0)),
        ),
        compiler_params=pltpu.CompilerParams(
            dimension_semantics=(shard_sem, _ARBITRARY),
            vmem_limit_bytes=_VMEM_LIMIT_BYTES,
        ),
    )(x2, t2)
    # Single tiny cross-lane collapse, outside the kernel.
    return jnp.sum(partials)


def _xla_sqdiff_mean(xf, tf, total):
    d = xf.astype(jnp.float32) - tf.astype(jnp.float32)
    return jnp.sum(d * d) * jnp.float32(1.0 / total)


def _mse_forward(x, target):
    assert x.shape == target.shape, "input/target shape mismatch"
    total = x.size
    itemsize = max(x.dtype.itemsize, target.dtype.itemsize)
    xf = jnp.reshape(x, (-1,))
    tf = jnp.reshape(target, (-1,))

    # Fast path: small inputs or non-lane-divisible element counts. A fused XLA
    # subtract-square-reduce is already at the HBM roofline there, and it avoids
    # both per-grid-step overhead and the ~2x HBM traffic a materialized
    # lane-aligned prefix copy would cost.
    # TODO(synk): a 1-D (br*128,) BlockSpec could keep huge non-%128 inputs on
    # the Pallas path without a prefix copy; not needed for conv feature maps.
    if total * itemsize < _FAST_PATH_BYTES or total % _LANE != 0:
        return _xla_sqdiff_mean(xf, tf, total)

    rows = total // _LANE
    max_br = max(_BR_ALIGN,
                 (_MAX_BLOCK_BYTES // (_LANE * itemsize)) // _BR_ALIGN * _BR_ALIGN)

    # Balanced block split: n_blocks is a multiple of num_shards and every block
    # has br rows (multiple of _BR_ALIGN), so no whole block ever drops out of
    # the pipelined kernel into the tail.
    num_shards = _num_tensorcores()
    n_blocks = -(-rows // max_br)                      # ceil
    n_blocks = -(-n_blocks // num_shards) * num_shards
    br = (rows // n_blocks) // _BR_ALIGN * _BR_ALIGN
    if br == 0 and num_shards > 1:
        num_shards = 1
        n_blocks = -(-rows // max_br)
        br = (rows // n_blocks) // _BR_ALIGN * _BR_ALIGN
    if br == 0:
        return _xla_sqdiff_mean(xf, tf, total)         # defensive; tiny input

    blocks_per_shard = n_blocks // num_shards
    rows_main = n_blocks * br
    main_elems = rows_main * _LANE

    # Free lane-dense reshape of the full flat arrays (no extra HBM copies).
    # The grid simply never visits rows beyond rows_main.
    x2 = jnp.reshape(xf, (rows, _LANE))
    t2 = jnp.reshape(tf, (rows, _LANE))
    total_sum = _sqdiff_sum_main(x2, t2, num_shards, blocks_per_shard, br)

    if main_elems < total:
        # Tiny remainder (< n_blocks * 256 rows): fused XLA reduce over the tail.
        dt = xf[main_elems:].astype(jnp.float32) - tf[main_elems:].astype(jnp.float32)
        total_sum = total_sum + jnp.sum(dt * dt)

    return total_sum * jnp.float32(1.0 / total)


@jax.custom_vjp
def mse_loss_pallas(x, target):
    """Mean-squared-error over all elements, computed with a Pallas TPU kernel."""
    return _mse_forward(x, target)


def _mse_fwd(x, target):
    return _mse_forward(x, target), (x, target)


def _mse_bwd(res, g):
    x, target = res
    n = x.size
    d = x.astype(jnp.float32) - target.astype(jnp.float32)
    gx = (g * jnp.float32(2.0 / n)) * d
    return gx.astype(x.dtype), (-gx).astype(target.dtype)


mse_loss_pallas.defvjp(_mse_fwd, _mse_bwd)


def content_loss(x, target):
    """Functional, jit-friendly API: returns (x, loss)."""
    return x, mse_loss_pallas(x, jax.lax.stop_gradient(target))


class ContentLoss:
    """JAX/Pallas port of the PyTorch ContentLoss module.

    __call__(x) returns x unchanged and records the MSE against the (detached)
    target in `self.loss`, matching the PyTorch module. The `self.loss`
    attribute is a Python side effect; under jax.jit prefer `content_loss`.
    """

    def __init__(self, target):
        self.target = jax.lax.stop_gradient(target)
        self.loss = None

    def __call__(self, x):
        x, self.loss = content_loss(x, self.target)
        return x


if __name__ == "__main__":
    key = jax.random.PRNGKey(0)
    k1, k2, k3, k4, k5, k6 = jax.random.split(key, 6)

    # 1) Module-typical small feature map -> fast path (fused XLA reduce).
    x_s = jax.random.normal(k1, (2, 4, 16, 16), dtype=jnp.float32)
    t_s = jax.random.normal(k2, (2, 4, 16, 16), dtype=jnp.float32)
    module = ContentLoss(t_s)
    out = jax.block_until_ready(module(x_s))
    loss = jax.block_until_ready(module.loss)
    assert jnp.array_equal(out, x_s)
    ref_s = jnp.mean((x_s - t_s) ** 2)
    assert jnp.allclose(loss, ref_s, rtol=1e-5, atol=1e-6), (loss, ref_s)

    # 2) VGG-like feature map (5 MiB f32) -> Pallas kernel path, 2 reduction steps.
    x_l = jax.random.normal(k3, (4, 160, 32, 64), dtype=jnp.float32)
    t_l = jax.random.normal(k4, (4, 160, 32, 64), dtype=jnp.float32)
    loss_l = jax.block_until_ready(mse_loss_pallas(x_l, t_l))
    ref_l = jnp.mean((x_l - t_l) ** 2)
    assert jnp.allclose(loss_l, ref_l, rtol=1e-4, atol=1e-6), (loss_l, ref_l)

    # Gradient via the custom VJP: dL/dx = 2 (x - target) / N.
    g = jax.block_until_ready(jax.grad(lambda a: mse_loss_pallas(a, t_l))(x_l))
    g_ref = 2.0 * (x_l - t_l) / x_l.size
    assert jnp.allclose(g, g_ref, rtol=1e-5, atol=1e-9)

    # 3) bf16 inputs -> exercises the 16-row sublane packing on the kernel path.
    x_b = x_l.astype(jnp.bfloat16)
    t_b = t_l.astype(jnp.bfloat16)
    loss_b = jax.block_until_ready(mse_loss_pallas(x_b, t_b))
    ref_b = jnp.mean((x_b.astype(jnp.float32) - t_b.astype(jnp.float32)) ** 2)
    assert jnp.allclose(loss_b, ref_b, rtol=1e-4, atol=1e-6), (loss_b, ref_b)

    # 4) Non-lane-divisible shape -> fused XLA route (intentional, see comments).
    x_o = jax.random.normal(k5, (3, 5, 7, 11), dtype=jnp.float32)
    t_o = jax.random.normal(k6, (3, 5, 7, 11), dtype=jnp.float32)
    l_o = jax.block_until_ready(mse_loss_pallas(x_o, t_o))
    assert jnp.allclose(l_o, jnp.mean((x_o - t_o) ** 2), rtol=1e-5, atol=1e-6), l_o

    print("KERNEL_OK")
</pallas_src>

<mosaic_0001>
module attributes {stable_mosaic.version = 11 : i64} {
  func.func @_sqdiff_sum_kernel(%arg0: i32, %arg1: i32, %arg2: memref<5120x128xf32, #tpu.memory_space<vmem>>, %arg3: memref<5120x128xf32, #tpu.memory_space<vmem>>, %arg4: memref<1x8x128xf32, #tpu.memory_space<vmem>>) attributes {dimension_semantics = [#tpu.dimension_semantics<arbitrary>, #tpu.dimension_semantics<arbitrary>], iteration_bounds = array<i64: 1, 2>, scalar_prefetch = 0 : i64, scratch_operands = 0 : i64, tpu.core_type = #tpu.core_type<tc>, window_params = [{transform_indices = @transform_0, window_bounds = array<i64: 5120, 128>}, {transform_indices = @transform_1, window_bounds = array<i64: 5120, 128>}, {transform_indices = @transform_2, window_bounds = array<i64: 1, 8, 128>}]} {
    %c0_i32 = arith.constant 0 : i32
    %0 = arith.cmpi eq, %arg1, %c0_i32 : i32
    %1 = arith.extui %0 : i1 to i32
    %c0_i32_0 = arith.constant 0 : i32
    %2 = arith.cmpi ne, %1, %c0_i32_0 : i32
    scf.if %2 {
      %cst_86 = arith.constant 0.000000e+00 : f32
      %247 = vector.broadcast %cst_86 : f32 to vector<1x8x128xf32>
      %c0_87 = arith.constant 0 : index
      %c0_88 = arith.constant 0 : index
      %c0_89 = arith.constant 0 : index
      %248 = vector.load %arg4[%c0_87, %c0_88, %c0_89] : memref<1x8x128xf32, #tpu.memory_space<vmem>>, vector<1x8x128xf32>
      tpu.vector_store %arg4[%c0_87, %c0_88, %c0_89], %247 {strides = array<i32>} : memref<1x8x128xf32, #tpu.memory_space<vmem>>, vector<1x8x128xf32>,
    } else {
    }
    %cst = arith.constant 0.000000e+00 : f32
    %3 = vector.broadcast %cst : f32 to vector<1x8x128xf32>
    %c0_i32_1 = arith.constant 0 : i32
    %c256_i32 = arith.constant 256 : i32
    %4 = arith.muli %c0_i32_1, %c256_i32 : i32
    %5 = tpu.assume_multiple %4, 256 : i32
    %6 = arith.index_cast %5 : i32 to index
    %c0 = arith.constant 0 : index
    %7 = vector.load %arg2[%6, %c0] : memref<5120x128xf32, #tpu.memory_space<vmem>>, vector<256x128xf32>
    %8 = arith.index_cast %5 : i32 to index
    %c0_2 = arith.constant 0 : index
    %9 = vector.load %arg3[%8, %c0_2] : memref<5120x128xf32, #tpu.memory_space<vmem>>, vector<256x128xf32>
    %10 = arith.subf %7, %9 : vector<256x128xf32>
    %11 = arith.mulf %10, %10 : vector<256x128xf32>
    %12 = vector.shape_cast %11 : vector<256x128xf32> to vector<32x8x128xf32>
    %cst_3 = arith.constant dense<0.000000e+00> : vector<8x128xf32>
    %13 = vector.multi_reduction <add>, %12, %cst_3 [0] : vector<32x8x128xf32> to vector<8x128xf32>
    %14 = vector.shape_cast %13 : vector<8x128xf32> to vector<1x8x128xf32>
    %15 = arith.addf %3, %14 : vector<1x8x128xf32>
    %c1_i32 = arith.constant 1 : i32
    %c256_i32_4 = arith.constant 256 : i32
    %16 = arith.muli %c1_i32, %c256_i32_4 : i32
    %17 = tpu.assume_multiple %16, 256 : i32
    %18 = arith.index_cast %17 : i32 to index
    %c0_5 = arith.constant 0 : index
    %19 = vector.load %arg2[%18, %c0_5] : memref<5120x128xf32, #tpu.memory_space<vmem>>, vector<256x128xf32>
    %20 = arith.index_cast %17 : i32 to index
    %c0_6 = arith.constant 0 : index
    %21 = vector.load %arg3[%20, %c0_6] : memref<5120x128xf32, #tpu.memory_space<vmem>>, vector<256x128xf32>
    %22 = arith.subf %19, %21 : vector<256x128xf32>
    %23 = arith.mulf %22, %22 : vector<256x128xf32>
    %24 = vector.shape_cast %23 : vector<256x128xf32> to vector<32x8x128xf32>
    %cst_7 = arith.constant dense<0.000000e+00> : vector<8x128xf32>
    %25 = vector.multi_reduction <add>, %24, %cst_7 [0] : vector<32x8x128xf32> to vector<8x128xf32>
    %26 = vector.shape_cast %25 : vector<8x128xf32> to vector<1x8x128xf32>
    %27 = arith.addf %15, %26 : vector<1x8x128xf32>
    %c2_i32 = arith.constant 2 : i32
    %c256_i32_8 = arith.constant 256 : i32
    %28 = arith.muli %c2_i32, %c256_i32_8 : i32
    %29 = tpu.assume_multiple %28, 256 : i32
    %30 = arith.index_cast %29 : i32 to index
    %c0_9 = arith.constant 0 : index
    %31 = vector.load %arg2[%30, %c0_9] : memref<5120x128xf32, #tpu.memory_space<vmem>>, vector<256x128xf32>
    %32 = arith.index_cast %29 : i32 to index
    %c0_10 = arith.constant 0 : index
    %33 = vector.load %arg3[%32, %c0_10] : memref<5120x128xf32, #tpu.memory_space<vmem>>, vector<256x128xf32>
    %34 = arith.subf %31, %33 : vector<256x128xf32>
    %35 = arith.mulf %34, %34 : vector<256x128xf32>
    %36 = vector.shape_cast %35 : vector<256x128xf32> to vector<32x8x128xf32>
    %cst_11 = arith.constant dense<0.000000e+00> : vector<8x128xf32>
    %37 = vector.multi_reduction <add>, %36, %cst_11 [0] : vector<32x8x128xf32> to vector<8x128xf32>
    %38 = vector.shape_cast %37 : vector<8x128xf32> to vector<1x8x128xf32>
    %39 = arith.addf %27, %38 : vector<1x8x128xf32>
    %c3_i32 = arith.constant 3 : i32
    %c256_i32_12 = arith.constant 256 : i32
    %40 = arith.muli %c3_i32, %c256_i32_12 : i32
    %41 = tpu.assume_multiple %40, 256 : i32
    %42 = arith.index_cast %41 : i32 to index
    %c0_13 = arith.constant 0 : index
    %43 = vector.load %arg2[%42, %c0_13] : memref<5120x128xf32, #tpu.memory_space<vmem>>, vector<256x128xf32>
    %44 = arith.index_cast %41 : i32 to index
    %c0_14 = arith.constant 0 : index
    %45 = vector.load %arg3[%44, %c0_14] : memref<5120x128xf32, #tpu.memory_space<vmem>>, vector<256x128xf32>
    %46 = arith.subf %43, %45 : vector<256x128xf32>
    %47 = arith.mulf %46, %46 : vector<256x128xf32>
    %48 = vector.shape_cast %47 : vector<256x128xf32> to vector<32x8x128xf32>
    %cst_15 = arith.constant dense<0.000000e+00> : vector<8x128xf32>
    %49 = vector.multi_reduction <add>, %48, %cst_15 [0] : vector<32x8x128xf32> to vector<8x128xf32>
    %50 = vector.shape_cast %49 : vector<8x128xf32> to vector<1x8x128xf32>
    %51 = arith.addf %39, %50 : vector<1x8x128xf32>
    %c4_i32 = arith.constant 4 : i32
    %c256_i32_16 = arith.constant 256 : i32
    %52 = arith.muli %c4_i32, %c256_i32_16 : i32
    %53 = tpu.assume_multiple %52, 256 : i32
    %54 = arith.index_cast %53 : i32 to index
    %c0_17 = arith.constant 0 : index
    %55 = vector.load %arg2[%54, %c0_17] : memref<5120x128xf32, #tpu.memory_space<vmem>>, vector<256x128xf32>
    %56 = arith.index_cast %53 : i32 to index
    %c0_18 = arith.constant 0 : index
    %57 = vector.load %arg3[%56, %c0_18] : memref<5120x128xf32, #tpu.memory_space<vmem>>, vector<256x128xf32>
    %58 = arith.subf %55, %57 : vector<256x128xf32>
    %59 = arith.mulf %58, %58 : vector<256x128xf32>
    %60 = vector.shape_cast %59 : vector<256x128xf32> to vector<32x8x128xf32>
    %cst_19 = arith.constant dense<0.000000e+00> : vector<8x128xf32>
    %61 = vector.multi_reduction <add>, %60, %cst_19 [0] : vector<32x8x128xf32> to vector<8x128xf32>
    %62 = vector.shape_cast %61 : vector<8x128xf32> to vector<1x8x128xf32>
    %63 = arith.addf %51, %62 : vector<1x8x128xf32>
    %c5_i32 = arith.constant 5 : i32
    %c256_i32_20 = arith.constant 256 : i32
    %64 = arith.muli %c5_i32, %c256_i32_20 : i32
    %65 = tpu.assume_multiple %64, 256 : i32
    %66 = arith.index_cast %65 : i32 to index
    %c0_21 = arith.constant 0 : index
    %67 = vector.load %arg2[%66, %c0_21] : memref<5120x128xf32, #tpu.memory_space<vmem>>, vector<256x128xf32>
    %68 = arith.index_cast %65 : i32 to index
    %c0_22 = arith.constant 0 : index
    %69 = vector.load %arg3[%68, %c0_22] : memref<5120x128xf32, #tpu.memory_space<vmem>>, vector<256x128xf32>
    %70 = arith.subf %67, %69 : vector<256x128xf32>
    %71 = arith.mulf %70, %70 : vector<256x128xf32>
    %72 = vector.shape_cast %71 : vector<256x128xf32> to vector<32x8x128xf32>
    %cst_23 = arith.constant dense<0.000000e+00> : vector<8x128xf32>
    %73 = vector.multi_reduction <add>, %72, %cst_23 [0] : vector<32x8x128xf32> to vector<8x128xf32>
    %74 = vector.shape_cast %73 : vector<8x128xf32> to vector<1x8x128xf32>
    %75 = arith.addf %63, %74 : vector<1x8x128xf32>
    %c6_i32 = arith.constant 6 : i32
    %c256_i32_24 = arith.constant 256 : i32
    %76 = arith.muli %c6_i32, %c256_i32_24 : i32
    %77 = tpu.assume_multiple %76, 256 : i32
    %78 = arith.index_cast %77 : i32 to index
    %c0_25 = arith.constant 0 : index
    %79 = vector.load %arg2[%78, %c0_25] : memref<5120x128xf32, #tpu.memory_space<vmem>>, vector<256x128xf32>
    %80 = arith.index_cast %77 : i32 to index
    %c0_26 = arith.constant 0 : index
    %81 = vector.load %arg3[%80, %c0_26] : memref<5120x128xf32, #tpu.memory_space<vmem>>, vector<256x128xf32>
    %82 = arith.subf %79, %81 : vector<256x128xf32>
    %83 = arith.mulf %82, %82 : vector<256x128xf32>
    %84 = vector.shape_cast %83 : vector<256x128xf32> to vector<32x8x128xf32>
    %cst_27 = arith.constant dense<0.000000e+00> : vector<8x128xf32>
    %85 = vector.multi_reduction <add>, %84, %cst_27 [0] : vector<32x8x128xf32> to vector<8x128xf32>
    %86 = vector.shape_cast %85 : vector<8x128xf32> to vector<1x8x128xf32>
    %87 = arith.addf %75, %86 : vector<1x8x128xf32>
    %c7_i32 = arith.constant 7 : i32
    %c256_i32_28 = arith.constant 256 : i32
    %88 = arith.muli %c7_i32, %c256_i32_28 : i32
    %89 = tpu.assume_multiple %88, 256 : i32
    %90 = arith.index_cast %89 : i32 to index
    %c0_29 = arith.constant 0 : index
    %91 = vector.load %arg2[%90, %c0_29] : memref<5120x128xf32, #tpu.memory_space<vmem>>, vector<256x128xf32>
    %92 = arith.index_cast %89 : i32 to index
    %c0_30 = arith.constant 0 : index
    %93 = vector.load %arg3[%92, %c0_30] : memref<5120x128xf32, #tpu.memory_space<vmem>>, vector<256x128xf32>
    %94 = arith.subf %91, %93 : vector<256x128xf32>
    %95 = arith.mulf %94, %94 : vector<256x128xf32>
    %96 = vector.shape_cast %95 : vector<256x128xf32> to vector<32x8x128xf32>
    %cst_31 = arith.constant dense<0.000000e+00> : vector<8x128xf32>
    %97 = vector.multi_reduction <add>, %96, %cst_31 [0] : vector<32x8x128xf32> to vector<8x128xf32>
    %98 = vector.shape_cast %97 : vector<8x128xf32> to vector<1x8x128xf32>
    %99 = arith.addf %87, %98 : vector<1x8x128xf32>
    %c8_i32 = arith.constant 8 : i32
    %c256_i32_32 = arith.constant 256 : i32
    %100 = arith.muli %c8_i32, %c256_i32_32 : i32
    %101 = tpu.assume_multiple %100, 256 : i32
    %102 = arith.index_cast %101 : i32 to index
    %c0_33 = arith.constant 0 : index
    %103 = vector.load %arg2[%102, %c0_33] : memref<5120x128xf32, #tpu.memory_space<vmem>>, vector<256x128xf32>
    %104 = arith.index_cast %101 : i32 to index
    %c0_34 = arith.constant 0 : index
    %105 = vector.load %arg3[%104, %c0_34] : memref<5120x128xf32, #tpu.memory_space<vmem>>, vector<256x128xf32>
    %106 = arith.subf %103, %105 : vector<256x128xf32>
    %107 = arith.mulf %106, %106 : vector<256x128xf32>
    %108 = vector.shape_cast %107 : vector<256x128xf32> to vector<32x8x128xf32>
    %cst_35 = arith.constant dense<0.000000e+00> : vector<8x128xf32>
    %109 = vector.multi_reduction <add>, %108, %cst_35 [0] : vector<32x8x128xf32> to vector<8x128xf32>
    %110 = vector.shape_cast %109 : vector<8x128xf32> to vector<1x8x128xf32>
    %111 = arith.addf %99, %110 : vector<1x8x128xf32>
    %c9_i32 = arith.constant 9 : i32
    %c256_i32_36 = arith.constant 256 : i32
    %112 = arith.muli %c9_i32, %c256_i32_36 : i32
    %113 = tpu.assume_multiple %112, 256 : i32
    %114 = arith.index_cast %113 : i32 to index
    %c0_37 = arith.constant 0 : index
    %115 = vector.load %arg2[%114, %c0_37] : memref<5120x128xf32, #tpu.memory_space<vmem>>, vector<256x128xf32>
    %116 = arith.index_cast %113 : i32 to index
    %c0_38 = arith.constant 0 : index
    %117 = vector.load %arg3[%116, %c0_38] : memref<5120x128xf32, #tpu.memory_space<vmem>>, vector<256x128xf32>
    %118 = arith.subf %115, %117 : vector<256x128xf32>
    %119 = arith.mulf %118, %118 : vector<256x128xf32>
    %120 = vector.shape_cast %119 : vector<256x128xf32> to vector<32x8x128xf32>
    %cst_39 = arith.constant dense<0.000000e+00> : vector<8x128xf32>
    %121 = vector.multi_reduction <add>, %120, %cst_39 [0] : vector<32x8x128xf32> to vector<8x128xf32>
    %122 = vector.shape_cast %121 : vector<8x128xf32> to vector<1x8x128xf32>
    %123 = arith.addf %111, %122 : vector<1x8x128xf32>
    %c10_i32 = arith.constant 10 : i32
    %c256_i32_40 = arith.constant 256 : i32
    %124 = arith.muli %c10_i32, %c256_i32_40 : i32
    %125 = tpu.assume_multiple %124, 256 : i32
    %126 = arith.index_cast %125 : i32 to index
    %c0_41 = arith.constant 0 : index
    %127 = vector.load %arg2[%126, %c0_41] : memref<5120x128xf32, #tpu.memory_space<vmem>>, vector<256x128xf32>
    %128 = arith.index_cast %125 : i32 to index
    %c0_42 = arith.constant 0 : index
    %129 = vector.load %arg3[%128, %c0_42] : memref<5120x128xf32, #tpu.memory_space<vmem>>, vector<256x128xf32>
    %130 = arith.subf %127, %129 : vector<256x128xf32>
    %131 = arith.mulf %130, %130 : vector<256x128xf32>
    %132 = vector.shape_cast %131 : vector<256x128xf32> to vector<32x8x128xf32>
    %cst_43 = arith.constant dense<0.000000e+00> : vector<8x128xf32>
    %133 = vector.multi_reduction <add>, %132, %cst_43 [0] : vector<32x8x128xf32> to vector<8x128xf32>
    %134 = vector.shape_cast %133 : vector<8x128xf32> to vector<1x8x128xf32>
    %135 = arith.addf %123, %134 : vector<1x8x128xf32>
    %c11_i32 = arith.constant 11 : i32
    %c256_i32_44 = arith.constant 256 : i32
    %136 = arith.muli %c11_i32, %c256_i32_44 : i32
    %137 = tpu.assume_multiple %136, 256 : i32
    %138 = arith.index_cast %137 : i32 to index
    %c0_45 = arith.constant 0 : index
    %139 = vector.load %arg2[%138, %c0_45] : memref<5120x128xf32, #tpu.memory_space<vmem>>, vector<256x128xf32>
    %140 = arith.index_cast %137 : i32 to index
    %c0_46 = arith.constant 0 : index
    %141 = vector.load %arg3[%140, %c0_46] : memref<5120x128xf32, #tpu.memory_space<vmem>>, vector<256x128xf32>
    %142 = arith.subf %139, %141 : vector<256x128xf32>
    %143 = arith.mulf %142, %142 : vector<256x128xf32>
    %144 = vector.shape_cast %143 : vector<256x128xf32> to vector<32x8x128xf32>
    %cst_47 = arith.constant dense<0.000000e+00> : vector<8x128xf32>
    %145 = vector.multi_reduction <add>, %144, %cst_47 [0] : vector<32x8x128xf32> to vector<8x128xf32>
    %146 = vector.shape_cast %145 : vector<8x128xf32> to vector<1x8x128xf32>
    %147 = arith.addf %135, %146 : vector<1x8x128xf32>
    %c12_i32 = arith.constant 12 : i32
    %c256_i32_48 = arith.constant 256 : i32
    %148 = arith.muli %c12_i32, %c256_i32_48 : i32
    %149 = tpu.assume_multiple %148, 256 : i32
    %150 = arith.index_cast %149 : i32 to index
    %c0_49 = arith.constant 0 : index
    %151 = vector.load %arg2[%150, %c0_49] : memref<5120x128xf32, #tpu.memory_space<vmem>>, vector<256x128xf32>
    %152 = arith.index_cast %149 : i32 to index
    %c0_50 = arith.constant 0 : index
    %153 = vector.load %arg3[%152, %c0_50] : memref<5120x128xf32, #tpu.memory_space<vmem>>, vector<256x128xf32>
    %154 = arith.subf %151, %153 : vector<256x128xf32>
    %155 = arith.mulf %154, %154 : vector<256x128xf32>
    %156 = vector.shape_cast %155 : vector<256x128xf32> to vector<32x8x128xf32>
    %cst_51 = arith.constant dense<0.000000e+00> : vector<8x128xf32>
    %157 = vector.multi_reduction <add>, %156, %cst_51 [0] : vector<32x8x128xf32> to vector<8x128xf32>
    %158 = vector.shape_cast %157 : vector<8x128xf32> to vector<1x8x128xf32>
    %159 = arith.addf %147, %158 : vector<1x8x128xf32>
    %c13_i32 = arith.constant 13 : i32
    %c256_i32_52 = arith.constant 256 : i32
    %160 = arith.muli %c13_i32, %c256_i32_52 : i32
    %161 = tpu.assume_multiple %160, 256 : i32
    %162 = arith.index_cast %161 : i32 to index
    %c0_53 = arith.constant 0 : index
    %163 = vector.load %arg2[%162, %c0_53] : memref<5120x128xf32, #tpu.memory_space<vmem>>, vector<256x128xf32>
    %164 = arith.index_cast %161 : i32 to index
    %c0_54 = arith.constant 0 : index
    %165 = vector.load %arg3[%164, %c0_54] : memref<5120x128xf32, #tpu.memory_space<vmem>>, vector<256x128xf32>
    %166 = arith.subf %163, %165 : vector<256x128xf32>
    %167 = arith.mulf %166, %166 : vector<256x128xf32>
    %168 = vector.shape_cast %167 : vector<256x128xf32> to vector<32x8x128xf32>
    %cst_55 = arith.constant dense<0.000000e+00> : vector<8x128xf32>
    %169 = vector.multi_reduction <add>, %168, %cst_55 [0] : vector<32x8x128xf32> to vector<8x128xf32>
    %170 = vector.shape_cast %169 : vector<8x128xf32> to vector<1x8x128xf32>
    %171 = arith.addf %159, %170 : vector<1x8x128xf32>
    %c14_i32 = arith.constant 14 : i32
    %c256_i32_56 = arith.constant 256 : i32
    %172 = arith.muli %c14_i32, %c256_i32_56 : i32
    %173 = tpu.assume_multiple %172, 256 : i32
    %174 = arith.index_cast %173 : i32 to index
    %c0_57 = arith.constant 0 : index
    %175 = vector.load %arg2[%174, %c0_57] : memref<5120x128xf32, #tpu.memory_space<vmem>>, vector<256x128xf32>
    %176 = arith.index_cast %173 : i32 to index
    %c0_58 = arith.constant 0 : index
    %177 = vector.load %arg3[%176, %c0_58] : memref<5120x128xf32, #tpu.memory_space<vmem>>, vector<256x128xf32>
    %178 = arith.subf %175, %177 : vector<256x128xf32>
    %179 = arith.mulf %178, %178 : vector<256x128xf32>
    %180 = vector.shape_cast %179 : vector<256x128xf32> to vector<32x8x128xf32>
    %cst_59 = arith.constant dense<0.000000e+00> : vector<8x128xf32>
    %181 = vector.multi_reduction <add>, %180, %cst_59 [0] : vector<32x8x128xf32> to vector<8x128xf32>
    %182 = vector.shape_cast %181 : vector<8x128xf32> to vector<1x8x128xf32>
    %183 = arith.addf %171, %182 : vector<1x8x128xf32>
    %c15_i32 = arith.constant 15 : i32
    %c256_i32_60 = arith.constant 256 : i32
    %184 = arith.muli %c15_i32, %c256_i32_60 : i32
    %185 = tpu.assume_multiple %184, 256 : i32
    %186 = arith.index_cast %185 : i32 to index
    %c0_61 = arith.constant 0 : index
    %187 = vector.load %arg2[%186, %c0_61] : memref<5120x128xf32, #tpu.memory_space<vmem>>, vector<256x128xf32>
    %188 = arith.index_cast %185 : i32 to index
    %c0_62 = arith.constant 0 : index
    %189 = vector.load %arg3[%188, %c0_62] : memref<5120x128xf32, #tpu.memory_space<vmem>>, vector<256x128xf32>
    %190 = arith.subf %187, %189 : vector<256x128xf32>
    %191 = arith.mulf %190, %190 : vector<256x128xf32>
    %192 = vector.shape_cast %191 : vector<256x128xf32> to vector<32x8x128xf32>
    %cst_63 = arith.constant dense<0.000000e+00> : vector<8x128xf32>
    %193 = vector.multi_reduction <add>, %192, %cst_63 [0] : vector<32x8x128xf32> to vector<8x128xf32>
    %194 = vector.shape_cast %193 : vector<8x128xf32> to vector<1x8x128xf32>
    %195 = arith.addf %183, %194 : vector<1x8x128xf32>
    %c16_i32 = arith.constant 16 : i32
    %c256_i32_64 = arith.constant 256 : i32
    %196 = arith.muli %c16_i32, %c256_i32_64 : i32
    %197 = tpu.assume_multiple %196, 256 : i32
    %198 = arith.index_cast %197 : i32 to index
    %c0_65 = arith.constant 0 : index
    %199 = vector.load %arg2[%198, %c0_65] : memref<5120x128xf32, #tpu.memory_space<vmem>>, vector<256x128xf32>
    %200 = arith.index_cast %197 : i32 to index
    %c0_66 = arith.constant 0 : index
    %201 = vector.load %arg3[%200, %c0_66] : memref<5120x128xf32, #tpu.memory_space<vmem>>, vector<256x128xf32>
    %202 = arith.subf %199, %201 : vector<256x128xf32>
    %203 = arith.mulf %202, %202 : vector<256x128xf32>
    %204 = vector.shape_cast %203 : vector<256x128xf32> to vector<32x8x128xf32>
    %cst_67 = arith.constant dense<0.000000e+00> : vector<8x128xf32>
    %205 = vector.multi_reduction <add>, %204, %cst_67 [0] : vector<32x8x128xf32> to vector<8x128xf32>
    %206 = vector.shape_cast %205 : vector<8x128xf32> to vector<1x8x128xf32>
    %207 = arith.addf %195, %206 : vector<1x8x128xf32>
    %c17_i32 = arith.constant 17 : i32
    %c256_i32_68 = arith.constant 256 : i32
    %208 = arith.muli %c17_i32, %c256_i32_68 : i32
    %209 = tpu.assume_multiple %208, 256 : i32
    %210 = arith.index_cast %209 : i32 to index
    %c0_69 = arith.constant 0 : index
    %211 = vector.load %arg2[%210, %c0_69] : memref<5120x128xf32, #tpu.memory_space<vmem>>, vector<256x128xf32>
    %212 = arith.index_cast %209 : i32 to index
    %c0_70 = arith.constant 0 : index
    %213 = vector.load %arg3[%212, %c0_70] : memref<5120x128xf32, #tpu.memory_space<vmem>>, vector<256x128xf32>
    %214 = arith.subf %211, %213 : vector<256x128xf32>
    %215 = arith.mulf %214, %214 : vector<256x128xf32>
    %216 = vector.shape_cast %215 : vector<256x128xf32> to vector<32x8x128xf32>
    %cst_71 = arith.constant dense<0.000000e+00> : vector<8x128xf32>
    %217 = vector.multi_reduction <add>, %216, %cst_71 [0] : vector<32x8x128xf32> to vector<8x128xf32>
    %218 = vector.shape_cast %217 : vector<8x128xf32> to vector<1x8x128xf32>
    %219 = arith.addf %207, %218 : vector<1x8x128xf32>
    %c18_i32 = arith.constant 18 : i32
    %c256_i32_72 = arith.constant 256 : i32
    %220 = arith.muli %c18_i32, %c256_i32_72 : i32
    %221 = tpu.assume_multiple %220, 256 : i32
    %222 = arith.index_cast %221 : i32 to index
    %c0_73 = arith.constant 0 : index
    %223 = vector.load %arg2[%222, %c0_73] : memref<5120x128xf32, #tpu.memory_space<vmem>>, vector<256x128xf32>
    %224 = arith.index_cast %221 : i32 to index
    %c0_74 = arith.constant 0 : index
    %225 = vector.load %arg3[%224, %c0_74] : memref<5120x128xf32, #tpu.memory_space<vmem>>, vector<256x128xf32>
    %226 = arith.subf %223, %225 : vector<256x128xf32>
    %227 = arith.mulf %226, %226 : vector<256x128xf32>
    %228 = vector.shape_cast %227 : vector<256x128xf32> to vector<32x8x128xf32>
    %cst_75 = arith.constant dense<0.000000e+00> : vector<8x128xf32>
    %229 = vector.multi_reduction <add>, %228, %cst_75 [0] : vector<32x8x128xf32> to vector<8x128xf32>
    %230 = vector.shape_cast %229 : vector<8x128xf32> to vector<1x8x128xf32>
    %231 = arith.addf %219, %230 : vector<1x8x128xf32>
    %c19_i32 = arith.constant 19 : i32
    %c256_i32_76 = arith.constant 256 : i32
    %232 = arith.muli %c19_i32, %c256_i32_76 : i32
    %233 = tpu.assume_multiple %232, 256 : i32
    %234 = arith.index_cast %233 : i32 to index
    %c0_77 = arith.constant 0 : index
    %235 = vector.load %arg2[%234, %c0_77] : memref<5120x128xf32, #tpu.memory_space<vmem>>, vector<256x128xf32>
    %236 = arith.index_cast %233 : i32 to index
    %c0_78 = arith.constant 0 : index
    %237 = vector.load %arg3[%236, %c0_78] : memref<5120x128xf32, #tpu.memory_space<vmem>>, vector<256x128xf32>
    %238 = arith.subf %235, %237 : vector<256x128xf32>
    %239 = arith.mulf %238, %238 : vector<256x128xf32>
    %240 = vector.shape_cast %239 : vector<256x128xf32> to vector<32x8x128xf32>
    %cst_79 = arith.constant dense<0.000000e+00> : vector<8x128xf32>
    %241 = vector.multi_reduction <add>, %240, %cst_79 [0] : vector<32x8x128xf32> to vector<8x128xf32>
    %242 = vector.shape_cast %241 : vector<8x128xf32> to vector<1x8x128xf32>
    %243 = arith.addf %231, %242 : vector<1x8x128xf32>
    %c20_i32 = arith.constant 20 : i32
    %c0_80 = arith.constant 0 : index
    %c0_81 = arith.constant 0 : index
    %c0_82 = arith.constant 0 : index
    %244 = vector.load %arg4[%c0_80, %c0_81, %c0_82] : memref<1x8x128xf32, #tpu.memory_space<vmem>>, vector<1x8x128xf32>
    %245 = arith.addf %244, %243 : vector<1x8x128xf32>
    %c0_83 = arith.constant 0 : index
    %c0_84 = arith.constant 0 : index
    %c0_85 = arith.constant 0 : index
    %246 = vector.load %arg4[%c0_83, %c0_84, %c0_85] : memref<1x8x128xf32, #tpu.memory_space<vmem>>, vector<1x8x128xf32>
    tpu.vector_store %arg4[%c0_83, %c0_84, %c0_85], %245 {strides = array<i32>} : memref<1x8x128xf32, #tpu.memory_space<vmem>>, vector<1x8x128xf32>,
    return
  }
  func.func @transform_0(%arg0: i32, %arg1: i32) -> (i32, i32) {
    %c2_i32 = arith.constant 2 : i32
    %0 = arith.muli %arg0, %c2_i32 : i32
    %1 = arith.addi %0, %arg1 : i32
    %c0_i32 = arith.constant 0 : i32
    %c0_i32_0 = arith.constant 0 : i32
    return %1, %c0_i32 : i32, i32
  }
  func.func @transform_1(%arg0: i32, %arg1: i32) -> (i32, i32) {
    %c2_i32 = arith.constant 2 : i32
    %0 = arith.muli %arg0, %c2_i32 : i32
    %1 = arith.addi %0, %arg1 : i32
    %c0_i32 = arith.constant 0 : i32
    %c0_i32_0 = arith.constant 0 : i32
    return %1, %c0_i32 : i32, i32
  }
  func.func @transform_2(%arg0: i32, %arg1: i32) -> (i32, i32, i32) {
    %c0_i32 = arith.constant 0 : i32
    %c0_i32_0 = arith.constant 0 : i32
    %c0_i32_1 = arith.constant 0 : i32
    return %arg0, %c0_i32, %c0_i32_0 : i32, i32, i32
  }
}

</mosaic_0001>

<bundles_post_ra>
// kernel: tpu_custom_call.1
= control target key start
LH: loop header
LB: loop body
LE: loop exit
PB: predicated region body
PF: predicated region fallthrough
CT: control target
= control target key end

     0   :  { %7 = vsyncpa [#allocation3], 0  ;;  %s8063_s0 = inlined_call_operand.hbm [shape: f32[10240,128], index: 0, kind: input, shape index: {}]   ;;  %s8064_s1 = inlined_call_operand.hbm [shape: f32[10240,128], index: 1, kind: input, shape index: {}]   ;;  %s8065_s2 = inlined_call_operand.hbm [shape: f32[1,8,128], index: 2, kind: output, shape index: {}]  }
   0x1   :  { %9 = vsyncpa [#allocation3 + $0x1], 0 }
   0x2   :  { %10 = vsyncpa [#allocation6], 0 }
   0x3   :  { %12 = vsyncpa [#allocation6 + $0x1], 0 }
   0x4   :  { %13 = vsyncpa [#allocation4], 0  ;;  %s5037_s9 = smov 0   ;;  %s5039_s10 = smov 0  }
   0x5   :  { %s5041_s11 = smov 0   ;;  %s5043_s12 = smov 0  }
   0x6   :  { %s5045_s13 = smov 0   ;;  %s5047_s14 = smov 0  }
   0x7 LB: > { %s3568_s15 = sadd.s32 4294967295, %s5014_s14   ;;  %s28_s16 = sadd.s32 1, %s5010_s13  ;;  %s5014_s14 = sphi %s5047_s14, %s19_s14   ;;  %s5010_s13 = sphi %s5045_s13, %s8234_s13   ;;  %s5006_s12 = sphi %s5043_s12, %s8233_s12   ;;  %s5002_s11 = sphi %s5041_s11, %s8232_s11   ;;  %s4998_s10 = sphi %s5039_s10, %s8231_s10   ;;  %s4994_s9 = sphi %s5037_s9, %s8230_s9  }
   0x8   : > { %p29_p0 = scmp.ge.s32.totalorder %s28_s16, 2  ;;  %s42_s17 = sadd.s32 1, %s5002_s11 }
   0x9   : > { %p49_p1 = scmp.ne.s32.totalorder %s5002_s11, %s4998_s10  ;;  %p50_p2 = scmp.eq.s32.totalorder %s5014_s14, 0 }
   0xa   : > { %s8236_s16 = smov (%p29_p0, %s28_s16), 0  ;;  %p55_p4 = scmp.ne.s32.totalorder %s4998_s10, %s4994_s9 }
   0xb   : > { %p51_p3 = por %p50_p2, %p49_p1  ;;  %s39_s18 = ssub.s32 %s5010_s13, %s8236_s16 }
   0xc   : > { %p56_p5 = scmp.eq.s32.totalorder %s3568_s15, 0  ;;  %p40_p6 = scmp.eq.s32.totalorder %s39_s18, 0 }
   0xd   : > { %p4815_p8 = scmp.lt.s32.totalorder %s5014_s14, 2  ;;  %s5087_s21 = sand.u32 1, %s5002_s11  }
   0xe   : > { %p5078_p7 = por %p56_p5, %p55_p4  ;;  %s4795_s22 = smul.u32 81920, %s5010_s13 }
   0xf   : > { %s5084_s20 = scalar_select %p40_p6, %s5002_s11, %s42_s17  }
  0x10   : > { %s8067_s19 = scalar_select %p5078_p7, 1, 0 }
  0x11   : > { %s4797_s23 = smul.u32 5120, %s5087_s21  ;;  %s5096_s26 = scalar_lea.hbm %s8063_s0, %s4795_s22 }
  0x12   : > { %p5098_p9 = pnand %p4815_p8, %p51_p3  ;;  %s136_s30 = scalar_lea.sflag [#allocation3], %s5087_s21 }
  0x13   : > { %s139_s28 = scalar_lea.vmem [#allocation2], %s4797_s23  ;;  %s4870_s3 = scalar_lea.hbm %s5096_s26, 81920 }
  0x14   : > { %s148_s29 = sshll.u32 %s139_s28, 4  ;;  %p4871_p10 = scmp.ne.s32.totalorder %s5096_s26, %s4870_s3  ;;  %s5104_s29 = int_to_ptr.vmem [resolvable:$true] %s148_s29 }
  0x15   : > { %p4872_p11 = pneg %p5098_p9  ;;  %s4875_s6 = scalar_lea.hbm %s8063_s0, 163840 }
  0x16   : > { %p4876_p0 = scmp.lt.u32.totalorder %s5096_s26, %s8063_s0  ;;  %p4877_p1 = scmp.lt.u32.totalorder %s4875_s6, %s4870_s3 }
  0x17   : > { %p4873_p12 = pnand %p4872_p11, %p4871_p10  ;;  %p4879_p3 = scmp.lt.u32.totalorder %s4870_s3, %s5096_s26 }
  0x18   : > { %p4878_p2 = por %p4877_p1, %p4876_p0 }
  0x19   : > { %p4874_p13 = pneg %p4873_p12 }
  0x1a   : > { %p4880_p4 = por %p4879_p3, %p4878_p2 }
  0x1c   : > { %p4881_p5 = pnand %p4880_p4, %p4874_p13 }
  0x1e   : > { %4884 = shalt.err (!%p4881_p5)
}
  0x1f   : > { %s4885_s9 = scalar_lea.vmem %s5104_s29, 81920  ;;  %s5016_s17 = smov [#allocation2]  }
  0x20   : > { %p4886_p6 = scmp.ne.s32.totalorder %s5104_s29, %s4885_s9  ;;  %s4890_s18 = sshll.u32 %s5016_s17, 4  ;;  %s4891_s18 = int_to_ptr.vmem [resolvable:$false] %s4890_s18 }
  0x21   : > { %s4892_s24 = scalar_lea.vmem %s4891_s18, 163840  ;;  %p4893_p12 = scmp.lt.s32.totalorder %s5104_s29, %s4891_s18 }
  0x22   : > { %p4888_p8 = pnand %p4886_p6, %p4872_p11  ;;  %p4894_p0 = scmp.lt.s32.totalorder %s4892_s24, %s4885_s9 }
  0x24   : > { %p4889_p10 = pneg %p4888_p8  ;;  %p4895_p1 = por %p4894_p0, %p4893_p12 }
  0x26   : > { %p4896_p2 = pnand %p4895_p1, %p4889_p10 }
  0x28   : > { %4899 = shalt.err (!%p4896_p2)
}
  0x29   : > { %s5017_s25 = smov 128   ;;  %s5018_s28 = smov 8  }
  0x2a   : > { %4811 = dma.hbm_to_vmem [thread:$0]  (!%p5098_p9), %s5096_s26, 81920, %s5104_s29, %s136_s30, %s5017_s25, %s5017_s25, %s5018_s28  }
  0x2b   : > { %p3573_p13 = scmp.ge.s32.totalorder %s5014_s14, 1  ;;  %p179_p3 = scmp.lt.s32.totalorder %s5014_s14, 3 }
  0x2c   : > { %s5148_s6 = scalar_lea.hbm %s8064_s1, %s4795_s22  ;;  %s162_s7 = scalar_lea.vmem [#allocation5], %s4797_s23 }
  0x2d   : > { %p5139_p4 = pnand %p3573_p13, %p179_p3  ;;  %s171_s8 = sshll.u32 %s162_s7, 4  ;;  %s5152_s8 = int_to_ptr.vmem [resolvable:$true] %s171_s8 }
  0x2e   : > { %s159_s26 = scalar_lea.sflag [#allocation6], %s5087_s21  ;;  %s4900_s29 = scalar_lea.hbm %s5148_s6, 81920 }
  0x2f   : > { %p4901_p5 = scmp.ne.s32.totalorder %s5148_s6, %s4900_s29  ;;  %s4905_s22 = scalar_lea.hbm %s8064_s1, 163840 }
  0x30   : > { %p4906_p10 = scmp.lt.u32.totalorder %s5148_s6, %s8064_s1  ;;  %p4907_p12 = scmp.lt.u32.totalorder %s4905_s22, %s4900_s29 }
  0x31   : > { %p4903_p6 = pnand %p4901_p5, %p4872_p11  ;;  %p4909_p1 = scmp.lt.u32.totalorder %s4900_s29, %s5148_s6 }
  0x32   : > { %p4908_p0 = por %p4907_p12, %p4906_p10 }
  0x33   : > { %p4904_p8 = pneg %p4903_p6 }
  0x34   : > { %p4910_p2 = por %p4909_p1, %p4908_p0 }
  0x36   : > { %p4911_p13 = pnand %p4910_p2, %p4904_p8 }
  0x38   : > { %4914 = shalt.err (!%p4911_p13)
}
  0x39   : > { %s4915_s23 = scalar_lea.vmem %s5152_s8, 81920  ;;  %s5019_s24 = smov [#allocation5]  }
  0x3a   : > { %p4916_p3 = scmp.ne.s32.totalorder %s5152_s8, %s4915_s23  ;;  %s4920_s4 = sshll.u32 %s5019_s24, 4  ;;  %s4921_s4 = int_to_ptr.vmem [resolvable:$false] %s4920_s4 }
  0x3b   : > { %s4922_s5 = scalar_lea.vmem %s4921_s4, 163840  ;;  %p4923_p7 = scmp.lt.s32.totalorder %s5152_s8, %s4921_s4 }
  0x3c   : > { %p4918_p5 = pnand %p4916_p3, %p4872_p11  ;;  %p4924_p10 = scmp.lt.s32.totalorder %s4922_s5, %s4915_s23 }
  0x3e   : > { %p4919_p6 = pneg %p4918_p5  ;;  %p4925_p12 = por %p4924_p10, %p4923_p7 }
  0x40   : > { %p4926_p0 = pnand %p4925_p12, %p4919_p6 }
  0x42   : > { %4929 = shalt.err (!%p4926_p0)
}
  0x43   : > { %4814 = dma.hbm_to_vmem [thread:$0]  (!%p5098_p9), %s5148_s6, 81920, %s5152_s8, %s159_s26, %s5017_s25, %s5017_s25, %s5018_s28  }
  0x44   : > { %183 = sbr.rel (%p5139_p4) target bundleno = 619 (0x26b), region = 28 }
  0x4b   : > { %s185_s7 = sand.u32 1, %s4998_s10   ;;  %p8070_p7 = scmp.ne.s32.totalorder %s8067_s19, 0 }
  0x4c   : > { %s4799_s29 = smul.u32 5120, %s185_s7  ;;  %s186_s30 = scalar_lea.sflag [#allocation3], %s185_s7 }
  0x4e   : > { %s5186_s9 = scalar_lea.vmem [#allocation2], %s4799_s29 }
  0x4f   : > { %4981 = dma.done.wait (%p8070_p7), %s186_s30, 81920  }
  0x50   : > { %4983 = vsyncadd (%p8070_p7), %s186_s30, 4294885376  ;;  %s195_s21 = scalar_lea.sflag [#allocation6], %s185_s7  ;;  %s5192_s27 = scalar_lea.vmem [#allocation5], %s4799_s29 }
  0x51   : > { %4985 = dma.done.wait (%p8070_p7), %s195_s21, 81920  }
  0x52   : > { %4987 = vsyncadd (%p8070_p7), %s195_s21, 4294885376  ;;  %p3574_p9 = scmp.ne.s32.totalorder %s5006_s12, 0 }
  0x53   : > { %v5020_v0 = vmov (!%p3574_p9), 0.0  }
  0x54   : > { %228 = sbr.rel (%p3574_p9) target bundleno = 91 (0x5b), region = 40  ;;  %229 = vst [vmem:[#allocation7] sm:$0xff] (!%p3574_p9), %v5020_v0 }
  0x5b PF: > { %v230_v1 = vld [vmem:[%s5186_s9] sm:$0xff]  ;;  %v231_v2 = vld [vmem:[%s5186_s9 + $0x8] sm:$0xff]  ;;  %v232_v7 = vld [vmem:[%s5186_s9 + $0x10] sm:$0xff]  ;;  %s5021_s12 = smov [#allocation7]   ;;  %p8019_p11 = scmp.eq.s32.totalorder %s3568_s15, 1 }
  0x5c   : > { %v262_v3 = vld [vmem:[%s5192_s27] sm:$0xff]  ;;  %v263_v4 = vld [vmem:[%s5192_s27 + $0x8] sm:$0xff]  ;;  %v264_v8 = vld [vmem:[%s5192_s27 + $0x10] sm:$0xff]  ;;  %s3480_s19 = sshll.u32 %s5021_s12, 4  ;;  %s3481_s19 = int_to_ptr.vmem [resolvable:$true] %s3480_s19 }
  0x5d   : > { %v294_v5 = vsub.f32 %v230_v1, %v262_v3  ;;  %v295_v6 = vsub.f32 %v231_v2, %v263_v4  ;;  %v296_v9 = vsub.f32 %v232_v7, %v264_v8  ;;  %v233_v12 = vld [vmem:[%s5186_s9 + $0x18] sm:$0xff]  ;;  %v234_v17 = vld [vmem:[%s5186_s9 + $0x20] sm:$0xff]  ;;  %v235_v22 = vld [vmem:[%s5186_s9 + $0x28] sm:$0xff]  ;;  %s4930_s28 = scalar_lea.vmem %s3481_s19, 128  ;;  %p4937_p2 = scmp.lt.s32.totalorder %s3481_s19, %s3481_s19 }
  0x5e   : > { %v265_v13 = vld [vmem:[%s5192_s27 + $0x18] sm:$0xff]  ;;  %v266_v18 = vld [vmem:[%s5192_s27 + $0x20] sm:$0xff]  ;;  %v267_v23 = vld [vmem:[%s5192_s27 + $0x28] sm:$0xff]  ;;  %p4931_p4 = scmp.ne.s32.totalorder %s3481_s19, %s4930_s28  ;;  %p4938_p13 = scmp.lt.s32.totalorder %s4930_s28, %s4930_s28 }
  0x5f   : > { %v326_v10 = vmul.f32 %v294_v5, %v294_v5  ;;  %v327_v11 = vmul.f32 %v295_v6, %v295_v6  ;;  %v297_v14 = vsub.f32 %v233_v12, %v265_v13  ;;  %v328_v15 = vmul.f32 %v296_v9, %v296_v9  ;;  %v236_v27 = vld [vmem:[%s5186_s9 + $0x30] sm:$0xff]  ;;  %v3575_v29 = vld [vmem:[%s5186_s9 + $0x100] sm:$0xff]  ;;  %v3576_v33 = vld [vmem:[%s5186_s9 + $0x108] sm:$0xff] }
  0x60   : > { %v298_v19 = vsub.f32 %v234_v17, %v266_v18  ;;  %v299_v24 = vsub.f32 %v235_v22, %v267_v23  ;;  %v268_v28 = vld [vmem:[%s5192_s27 + $0x30] sm:$0xff]  ;;  %v3607_v34 = vld [vmem:[%s5192_s27 + $0x100] sm:$0xff]  ;;  %v3608_v35 = vld [vmem:[%s5192_s27 + $0x108] sm:$0xff]  ;;  %p4932_p8 = pnand %p4931_p4, %p8019_p11  ;;  %p4939_p3 = por %p4938_p13, %p4937_p2 }
  0x61   : > { %v358_v16 = vadd.f32 %v327_v11, %v326_v10  ;;  %v329_v20 = vmul.f32 %v297_v14, %v297_v14  ;;  %v300_v30 = vsub.f32 %v236_v27, %v268_v28  ;;  %v237_v36 = vld [vmem:[%s5186_s9 + $0x38] sm:$0xff]  ;;  %v456_v38 = vsub.f32 %v3575_v29, %v3607_v34  ;;  %v3577_v43 = vld [vmem:[%s5186_s9 + $0x110] sm:$0xff]  ;;  %v238_v45 = vld [vmem:[%s5186_s9 + $0x40] sm:$0xff] }
  0x62   : > { %v330_v25 = vmul.f32 %v298_v19, %v298_v19  ;;  %v331_v31 = vmul.f32 %v299_v24, %v299_v24  ;;  %v269_v37 = vld [vmem:[%s5192_s27 + $0x38] sm:$0xff]  ;;  %v457_v39 = vsub.f32 %v3576_v33, %v3608_v35  ;;  %v3609_v44 = vld [vmem:[%s5192_s27 + $0x110] sm:$0xff]  ;;  %v270_v46 = vld [vmem:[%s5192_s27 + $0x40] sm:$0xff]  ;;  %p4933_p1 = pneg %p4932_p8 }
  0x63   : > { %v359_v21 = vadd.f32 %v358_v16, %v328_v15  ;;  %v301_v40 = vsub.f32 %v237_v36, %v269_v37  ;;  %v332_v41 = vmul.f32 %v300_v30, %v300_v30  ;;  %v458_v47 = vsub.f32 %v3577_v43, %v3609_v44  ;;  %v3578_v53 = vld [vmem:[%s5186_s9 + $0x118] sm:$0xff]  ;;  %v239_v55 = vld [vmem:[%s5186_s9 + $0x48] sm:$0xff]  ;;  %v3579_v63 = vld [vmem:[%s5186_s9 + $0x120] sm:$0xff] }
  0x64   : > { %v488_v48 = vmul.f32 %v456_v38, %v456_v38  ;;  %v489_v49 = vmul.f32 %v457_v39, %v457_v39  ;;  %v302_v50 = vsub.f32 %v238_v45, %v270_v46  ;;  %v3610_v54 = vld [vmem:[%s5192_s27 + $0x118] sm:$0xff]  ;;  %v271_v56 = vld [vmem:[%s5192_s27 + $0x48] sm:$0xff]  ;;  %v3611_v0 = vld [vmem:[%s5192_s27 + $0x120] sm:$0xff]  ;;  %p4940_p5 = pnand %p4939_p3, %p4933_p1 }
  0x65   : > { %v360_v26 = vadd.f32 %v359_v21, %v329_v20  ;;  %v333_v51 = vmul.f32 %v301_v40, %v301_v40  ;;  %v459_v57 = vsub.f32 %v3578_v53, %v3610_v54  ;;  %v490_v58 = vmul.f32 %v458_v47, %v458_v47  ;;  %v240_v1 = vld [vmem:[%s5186_s9 + $0x50] sm:$0xff]  ;;  %v3580_v9 = vld [vmem:[%s5186_s9 + $0x128] sm:$0xff]  ;;  %v241_v11 = vld [vmem:[%s5186_s9 + $0x58] sm:$0xff] }
  0x66   : > { %v520_v59 = vadd.f32 %v489_v49, %v488_v48  ;;  %v303_v60 = vsub.f32 %v239_v55, %v271_v56  ;;  %v334_v61 = vmul.f32 %v302_v50, %v302_v50  ;;  %v272_v2 = vld [vmem:[%s5192_s27 + $0x50] sm:$0xff]  ;;  %v460_v3 = vsub.f32 %v3579_v63, %v3611_v0  ;;  %v3612_v10 = vld [vmem:[%s5192_s27 + $0x128] sm:$0xff]  ;;  %v273_v12 = vld [vmem:[%s5192_s27 + $0x58] sm:$0xff] }
  0x67   : > { %v361_v32 = vadd.f32 %v360_v26, %v330_v25  ;;  %v491_v4 = vmul.f32 %v459_v57, %v459_v57  ;;  %v304_v6 = vsub.f32 %v240_v1, %v272_v2  ;;  %v461_v13 = vsub.f32 %v3580_v9, %v3612_v10  ;;  %v3581_v19 = vld [vmem:[%s5186_s9 + $0x130] sm:$0xff]  ;;  %v242_v21 = vld [vmem:[%s5186_s9 + $0x60] sm:$0xff]  ;;  %v3582_v23 = vld [vmem:[%s5186_s9 + $0x138] sm:$0xff] }
  0x68   : > { %v521_v5 = vadd.f32 %v520_v59, %v490_v58  ;;  %v335_v7 = vmul.f32 %v303_v60, %v303_v60  ;;  %v492_v14 = vmul.f32 %v460_v3, %v460_v3  ;;  %v305_v16 = vsub.f32 %v241_v11, %v273_v12  ;;  %v3613_v20 = vld [vmem:[%s5192_s27 + $0x130] sm:$0xff]  ;;  %v274_v22 = vld [vmem:[%s5192_s27 + $0x60] sm:$0xff]  ;;  %v3614_v24 = vld [vmem:[%s5192_s27 + $0x138] sm:$0xff] }
  0x69   : > { %v362_v42 = vadd.f32 %v361_v32, %v331_v31  ;;  %v336_v17 = vmul.f32 %v304_v6, %v304_v6  ;;  %v462_v25 = vsub.f32 %v3581_v19, %v3613_v20  ;;  %v493_v26 = vmul.f32 %v461_v13, %v461_v13  ;;  %v3639_v28 = vld [vmem:[%s5186_s9 + $0x200] sm:$0xff]  ;;  %v3640_v32 = vld [vmem:[%s5186_s9 + $0x208] sm:$0xff]  ;;  %v244_v37 = vld [vmem:[%s5186_s9 + $0x70] sm:$0xff] }
  0x6a   : > { %v522_v15 = vadd.f32 %v521_v5, %v491_v4  ;;  %v306_v29 = vsub.f32 %v242_v21, %v274_v22  ;;  %v337_v30 = vmul.f32 %v305_v16, %v305_v16  ;;  %v3671_v33 = vld [vmem:[%s5192_s27 + $0x200] sm:$0xff]  ;;  %v3672_v34 = vld [vmem:[%s5192_s27 + $0x208] sm:$0xff]  ;;  %v463_v38 = vsub.f32 %v3582_v23, %v3614_v24  ;;  %v3641_v39 = vld [vmem:[%s5186_s9 + $0x210] sm:$0xff] }
  0x6b   : > { %v363_v52 = vadd.f32 %v362_v42, %v332_v41  ;;  %v243_v35 = vld [vmem:[%s5186_s9 + $0x68] sm:$0xff]  ;;  %v3673_v40 = vld [vmem:[%s5192_s27 + $0x210] sm:$0xff]  ;;  %v245_v41 = vld [vmem:[%s5186_s9 + $0x78] sm:$0xff]  ;;  %v494_v45 = vmul.f32 %v462_v25, %v462_v25  ;;  %v618_v47 = vsub.f32 %v3639_v28, %v3671_v33  ;;  %v619_v48 = vsub.f32 %v3640_v32, %v3672_v34 }
  0x6c   : > { %v523_v27 = vadd.f32 %v522_v15, %v492_v14  ;;  %v275_v36 = vld [vmem:[%s5192_s27 + $0x68] sm:$0xff]  ;;  %v276_v42 = vld [vmem:[%s5192_s27 + $0x70] sm:$0xff]  ;;  %v3583_v43 = vld [vmem:[%s5186_s9 + $0x140] sm:$0xff]  ;;  %v338_v54 = vmul.f32 %v306_v29, %v306_v29  ;;  %v620_v63 = vsub.f32 %v3641_v39, %v3673_v40 }
  0x6d   : > { %v364_v62 = vadd.f32 %v363_v52, %v333_v51  ;;  %v3615_v44 = vld [vmem:[%s5192_s27 + $0x140] sm:$0xff]  ;;  %v247_v50 = vld [vmem:[%s5186_s9 + $0x88] sm:$0xff]  ;;  %v248_v51 = vld [vmem:[%s5186_s9 + $0x90] sm:$0xff]  ;;  %v307_v53 = vsub.f32 %v243_v35, %v275_v36  ;;  %v308_v3 = vsub.f32 %v244_v37, %v276_v42  ;;  %v650_v10 = vmul.f32 %v618_v47, %v618_v47 }
  0x6e   : > { %v524_v46 = vadd.f32 %v523_v27, %v493_v26  ;;  %v246_v49 = vld [vmem:[%s5186_s9 + $0x80] sm:$0xff]  ;;  %v277_v52 = vld [vmem:[%s5192_s27 + $0x78] sm:$0xff]  ;;  %v251_v58 = vld [vmem:[%s5186_s9 + $0xa8] sm:$0xff]  ;;  %v464_v4 = vsub.f32 %v3583_v43, %v3615_v44  ;;  %v651_v11 = vmul.f32 %v619_v48, %v619_v48 }
  0x6f   : > { %v365_v8 = vadd.f32 %v364_v62, %v334_v61  ;;  %v249_v56 = vld [vmem:[%s5186_s9 + $0x98] sm:$0xff]  ;;  %v250_v57 = vld [vmem:[%s5186_s9 + $0xa0] sm:$0xff]  ;;  %v252_v59 = vld [vmem:[%s5186_s9 + $0xb0] sm:$0xff]  ;;  %v309_v15 = vsub.f32 %v245_v41, %v277_v52  ;;  %v339_v16 = vmul.f32 %v307_v53, %v307_v53 }
  0x70   : > { %v278_v60 = vld [vmem:[%s5192_s27 + $0x80] sm:$0xff]  ;;  %v3642_v61 = vld [vmem:[%s5186_s9 + $0x218] sm:$0xff]  ;;  %v279_v0 = vld [vmem:[%s5192_s27 + $0x88] sm:$0xff]  ;;  %v525_v9 = vadd.f32 %v524_v46, %v494_v45  ;;  %v496_v43 = vmul.f32 %v464_v4, %v464_v4  ;;  %v682_v45 = vadd.f32 %v651_v11, %v650_v10  ;;  %v340_v46 = vmul.f32 %v308_v3, %v308_v3 }
  0x71   : > { %v366_v18 = vadd.f32 %v365_v8, %v335_v7  ;;  %v3674_v62 = vld [vmem:[%s5192_s27 + $0x218] sm:$0xff]  ;;  %v280_v1 = vld [vmem:[%s5192_s27 + $0x90] sm:$0xff]  ;;  %v282_v5 = vld [vmem:[%s5192_s27 + $0xa0] sm:$0xff]  ;;  %v495_v8 = vmul.f32 %v463_v38, %v463_v38  ;;  %v310_v26 = vsub.f32 %v246_v49, %v278_v60  ;;  %v311_v27 = vsub.f32 %v247_v50, %v279_v0 }
  0x72   : > { %v281_v2 = vld [vmem:[%s5192_s27 + $0x98] sm:$0xff]  ;;  %v283_v6 = vld [vmem:[%s5192_s27 + $0xa8] sm:$0xff]  ;;  %v284_v7 = vld [vmem:[%s5192_s27 + $0xb0] sm:$0xff]  ;;  %v621_v20 = vsub.f32 %v3642_v61, %v3674_v62  ;;  %v312_v28 = vsub.f32 %v248_v51, %v280_v1  ;;  %v314_v36 = vsub.f32 %v250_v57, %v282_v5 }
  0x73   : > { %v367_v31 = vadd.f32 %v366_v18, %v336_v17  ;;  %v253_v12 = vld [vmem:[%s5186_s9 + $0xb8] sm:$0xff]  ;;  %v254_v13 = vld [vmem:[%s5186_s9 + $0xc0] sm:$0xff]  ;;  %v255_v14 = vld [vmem:[%s5186_s9 + $0xc8] sm:$0xff]  ;;  %v313_v35 = vsub.f32 %v249_v56, %v281_v2  ;;  %v315_v37 = vsub.f32 %v251_v58, %v283_v6  ;;  %v316_v38 = vsub.f32 %v252_v59, %v284_v7 }
  0x74   : > { %v3584_v18 = vld [vmem:[%s5186_s9 + $0x148] sm:$0xff]  ;;  %v256_v21 = vld [vmem:[%s5186_s9 + $0xd0] sm:$0xff]  ;;  %v257_v22 = vld [vmem:[%s5186_s9 + $0xd8] sm:$0xff]  ;;  %v526_v44 = vadd.f32 %v525_v9, %v495_v8  ;;  %v653_v51 = vmul.f32 %v621_v20, %v621_v20  ;;  %v341_v2 = vmul.f32 %v309_v15, %v309_v15  ;;  %v5307_v20 = vmul.f32 %v314_v36, %v314_v36 }
  0x75   : > { %v368_v55 = vadd.f32 %v367_v31, %v337_v30  ;;  %v3616_v19 = vld [vmem:[%s5192_s27 + $0x148] sm:$0xff]  ;;  %v258_v23 = vld [vmem:[%s5186_s9 + $0xe0] sm:$0xff]  ;;  %v285_v25 = vld [vmem:[%s5192_s27 + $0xb8] sm:$0xff]  ;;  %v652_v31 = vmul.f32 %v620_v63, %v620_v63 }
  0x76   : > { %v259_v24 = vld [vmem:[%s5186_s9 + $0xe8] sm:$0xff]  ;;  %v3643_v29 = vld [vmem:[%s5186_s9 + $0x220] sm:$0xff]  ;;  %v288_v34 = vld [vmem:[%s5192_s27 + $0xd0] sm:$0xff]  ;;  %v465_v42 = vsub.f32 %v3584_v18, %v3616_v19  ;;  %v317_v53 = vsub.f32 %v253_v12, %v285_v25  ;;  %v527_v5 = vadd.f32 %v526_v44, %v496_v43  ;;  %v5303_v18 = vmul.f32 %v312_v28, %v312_v28 }
  0x77   : > { %v369_v17 = vadd.f32 %v368_v55, %v338_v54  ;;  %v3675_v30 = vld [vmem:[%s5192_s27 + $0x220] sm:$0xff]  ;;  %v287_v33 = vld [vmem:[%s5192_s27 + $0xc8] sm:$0xff]  ;;  %v289_v39 = vld [vmem:[%s5192_s27 + $0xd8] sm:$0xff]  ;;  %v683_v58 = vadd.f32 %v682_v45, %v652_v31  ;;  %v320_v62 = vsub.f32 %v256_v21, %v288_v34  ;;  %v5305_v19 = vmul.f32 %v313_v35, %v313_v35 }
  0x78   : > { %v286_v32 = vld [vmem:[%s5192_s27 + $0xc0] sm:$0xff]  ;;  %v291_v41 = vld [vmem:[%s5192_s27 + $0xe8] sm:$0xff]  ;;  %v3585_v48 = vld [vmem:[%s5186_s9 + $0x150] sm:$0xff]  ;;  %v622_v50 = vsub.f32 %v3643_v29, %v3675_v30  ;;  %v319_v55 = vsub.f32 %v255_v14, %v287_v33  ;;  %v321_v63 = vsub.f32 %v257_v22, %v289_v39  ;;  %v497_v4 = vmul.f32 %v465_v42, %v465_v42 }
  0x79   : > { %v290_v40 = vld [vmem:[%s5192_s27 + $0xe0] sm:$0xff]  ;;  %v370_v47 = vadd.f32 %v369_v17, %v339_v16  ;;  %v3617_v49 = vld [vmem:[%s5192_s27 + $0x150] sm:$0xff]  ;;  %v318_v54 = vsub.f32 %v254_v13, %v286_v32  ;;  %v3644_v56 = vld [vmem:[%s5186_s9 + $0x228] sm:$0xff]  ;;  %v323_v1 = vsub.f32 %v259_v24, %v291_v41  ;;  %v684_v11 = vadd.f32 %v683_v58, %v653_v51 }
  0x7a   : > { %v260_v52 = vld [vmem:[%s5186_s9 + $0xf0] sm:$0xff]  ;;  %v3676_v57 = vld [vmem:[%s5192_s27 + $0x228] sm:$0xff]  ;;  %v261_v59 = vld [vmem:[%s5186_s9 + $0xf8] sm:$0xff]  ;;  %v322_v0 = vsub.f32 %v258_v23, %v290_v40  ;;  %v466_v3 = vsub.f32 %v3585_v48, %v3617_v49  ;;  %v654_v10 = vmul.f32 %v622_v50, %v622_v50  ;;  %v342_v14 = vmul.f32 %v310_v26, %v310_v26 }
  0x7b   : > { %v292_v60 = vld [vmem:[%s5192_s27 + $0xf0] sm:$0xff]  ;;  %v293_v61 = vld [vmem:[%s5192_s27 + $0xf8] sm:$0xff]  ;;  %v371_v6 = vadd.f32 %v370_v47, %v340_v46  ;;  %v623_v9 = vsub.f32 %v3644_v56, %v3676_v57  ;;  %v5299_v16 = vmul.f32 %v311_v27, %v311_v27  ;;  %v5309_v21 = vmul.f32 %v315_v37, %v315_v37  ;;  %v3587_v23 = vld [vmem:[%s5186_s9 + $0x160] sm:$0xff] }
  0x7c   : > { %v3586_v7 = vld [vmem:[%s5186_s9 + $0x158] sm:$0xff]  ;;  %v324_v12 = vsub.f32 %v260_v52, %v292_v60  ;;  %v325_v13 = vsub.f32 %v261_v59, %v293_v61  ;;  %v3645_v15 = vld [vmem:[%s5186_s9 + $0x230] sm:$0xff]  ;;  %v5311_v22 = vmul.f32 %v316_v38, %v316_v38  ;;  %v498_v25 = vmul.f32 %v466_v3, %v466_v3  ;;  %v3588_v29 = vld [vmem:[%s5186_s9 + $0x168] sm:$0xff] }
  0x7d   : > { %v3618_v8 = vld [vmem:[%s5192_s27 + $0x158] sm:$0xff]  ;;  %v3677_v17 = vld [vmem:[%s5192_s27 + $0x230] sm:$0xff]  ;;  %v528_v26 = vadd.f32 %v527_v5, %v497_v4  ;;  %v372_v27 = vadd.f32 %v371_v6, %v341_v2  ;;  %v3591_v31 = vld [vmem:[%s5186_s9 + $0x180] sm:$0xff]  ;;  %v655_v36 = vmul.f32 %v623_v9, %v623_v9  ;;  %v685_v37 = vadd.f32 %v684_v11, %v654_v10 }
  0x7e   : > { %v467_v24 = vsub.f32 %v3586_v7, %v3618_v8  ;;  %v3589_v28 = vld [vmem:[%s5186_s9 + $0x170] sm:$0xff]  ;;  %v3590_v30 = vld [vmem:[%s5186_s9 + $0x178] sm:$0xff]  ;;  %v3619_v32 = vld [vmem:[%s5192_s27 + $0x160] sm:$0xff]  ;;  %v624_v35 = vsub.f32 %v3645_v15, %v3677_v17  ;;  %v5321_v38 = vmul.f32 %v317_v53, %v317_v53  ;;  %v5323_v39 = vmul.f32 %v318_v54, %v318_v54 }
  0x7f   : > { %v3620_v33 = vld [vmem:[%s5192_s27 + $0x168] sm:$0xff]  ;;  %v3621_v34 = vld [vmem:[%s5192_s27 + $0x170] sm:$0xff]  ;;  %v5325_v40 = vmul.f32 %v319_v55, %v319_v55  ;;  %v5327_v41 = vmul.f32 %v320_v62, %v320_v62  ;;  %v3594_v44 = vld [vmem:[%s5186_s9 + $0x198] sm:$0xff]  ;;  %v5336_v49 = vmul.f32 %v321_v63, %v321_v63  ;;  %v5338_v50 = vmul.f32 %v322_v0, %v322_v0 }
  0x80   : > { %v3592_v42 = vld [vmem:[%s5186_s9 + $0x188] sm:$0xff]  ;;  %v3593_v43 = vld [vmem:[%s5186_s9 + $0x190] sm:$0xff]  ;;  %v3595_v45 = vld [vmem:[%s5186_s9 + $0x1a0] sm:$0xff]  ;;  %v5340_v51 = vmul.f32 %v323_v1, %v323_v1  ;;  %v5342_v52 = vmul.f32 %v324_v12, %v324_v12  ;;  %v5347_v56 = vmul.f32 %v325_v13, %v325_v13  ;;  %v468_v59 = vsub.f32 %v3587_v23, %v3619_v32 }
  0x81   : > { %v3622_v46 = vld [vmem:[%s5192_s27 + $0x178] sm:$0xff]  ;;  %8071 = vst [vmem:[#allocation11_spill] sm:$0xff] %v5336_v49  ;;  %8072 = vst [vmem:[#allocation12_spill] sm:$0xff] %v5338_v50  ;;  %v3623_v53 = vld [vmem:[%s5192_s27 + $0x180] sm:$0xff]  ;;  %v499_v60 = vmul.f32 %v467_v24, %v467_v24  ;;  %v529_v61 = vadd.f32 %v528_v26, %v498_v25  ;;  %v373_v63 = vadd.f32 %v372_v27, %v342_v14 }
  0x82   : > { %v3646_v47 = vld [vmem:[%s5186_s9 + $0x238] sm:$0xff]  ;;  %8073 = vst [vmem:[#allocation13_spill] sm:$0xff] %v5340_v51  ;;  %8074 = vst [vmem:[#allocation14_spill] sm:$0xff] %v5342_v52  ;;  %v3624_v54 = vld [vmem:[%s5192_s27 + $0x188] sm:$0xff]  ;;  %v656_v5 = vmul.f32 %v624_v35, %v624_v35  ;;  %v686_v6 = vadd.f32 %v685_v37, %v655_v36  ;;  %v469_v14 = vsub.f32 %v3588_v29, %v3620_v33 }
  0x83   : > { %v3678_v48 = vld [vmem:[%s5192_s27 + $0x238] sm:$0xff]  ;;  %v3625_v55 = vld [vmem:[%s5192_s27 + $0x190] sm:$0xff]  ;;  %8075 = vst [vmem:[#allocation15_spill] sm:$0xff] %v5347_v56  ;;  %v3627_v58 = vld [vmem:[%s5192_s27 + $0x1a0] sm:$0xff]  ;;  %v5363_v15 = vsub.f32 %v3589_v28, %v3621_v34  ;;  %v5365_v17 = vsub.f32 %v3590_v30, %v3622_v46  ;;  %v5367_v23 = vsub.f32 %v3591_v31, %v3623_v53  ;;  %v5372_v27 = vsub.f32 %v3592_v42, %v3624_v54 }
  0x84   : > { %v3626_v57 = vld [vmem:[%s5192_s27 + $0x198] sm:$0xff]  ;;  %v3703_v62 = vld [vmem:[%s5186_s9 + $0x300] sm:$0xff]  ;;  %v3596_v0 = vld [vmem:[%s5186_s9 + $0x1a8] sm:$0xff]  ;;  %v625_v4 = vsub.f32 %v3646_v47, %v3678_v48  ;;  %v5374_v32 = vsub.f32 %v3593_v43, %v3625_v55  ;;  %v5378_v36 = vsub.f32 %v3595_v45, %v3627_v58  ;;  %v500_v34 = vmul.f32 %v468_v59, %v468_v59 }
  0x85   : > { %v3597_v1 = vld [vmem:[%s5186_s9 + $0x1b0] sm:$0xff]  ;;  %v3598_v2 = vld [vmem:[%s5186_s9 + $0x1b8] sm:$0xff]  ;;  %v3628_v3 = vld [vmem:[%s5192_s27 + $0x1a8] sm:$0xff]  ;;  %v5376_v35 = vsub.f32 %v3594_v44, %v3626_v57  ;;  %v530_v37 = vadd.f32 %v529_v61, %v499_v60  ;;  %v374_v44 = vadd.f32 %v373_v63, %v5299_v16  ;;  %v687_v53 = vadd.f32 %v686_v6, %v656_v5 }
  0x86   : > { %v3704_v7 = vld [vmem:[%s5186_s9 + $0x308] sm:$0xff]  ;;  %v3735_v8 = vld [vmem:[%s5192_s27 + $0x300] sm:$0xff]  ;;  %v3601_v12 = vld [vmem:[%s5186_s9 + $0x1d0] sm:$0xff]  ;;  %v657_v48 = vmul.f32 %v625_v4, %v625_v4  ;;  %v5394_v61 = vsub.f32 %v3596_v0, %v3628_v3 }
  0x87   : > { %v3736_v9 = vld [vmem:[%s5192_s27 + $0x308] sm:$0xff]  ;;  %v3599_v10 = vld [vmem:[%s5186_s9 + $0x1c0] sm:$0xff]  ;;  %v3629_v13 = vld [vmem:[%s5192_s27 + $0x1b0] sm:$0xff]  ;;  %v780_v42 = vsub.f32 %v3703_v62, %v3735_v8 }
  0x88   : > { %v3600_v11 = vld [vmem:[%s5186_s9 + $0x1c8] sm:$0xff]  ;;  %v3647_v24 = vld [vmem:[%s5186_s9 + $0x240] sm:$0xff]  ;;  %v3630_v26 = vld [vmem:[%s5192_s27 + $0x1b8] sm:$0xff]  ;;  %v781_v43 = vsub.f32 %v3704_v7, %v3736_v9  ;;  %v5396_v16 = vsub.f32 %v3597_v1, %v3629_v13  ;;  %v531_v13 = vadd.f32 %v530_v37, %v500_v34 }
  0x89   : > { %v3679_v25 = vld [vmem:[%s5192_s27 + $0x240] sm:$0xff]  ;;  %v3705_v29 = vld [vmem:[%s5186_s9 + $0x310] sm:$0xff]  ;;  %v3632_v31 = vld [vmem:[%s5192_s27 + $0x1c8] sm:$0xff]  ;;  %v5398_v62 = vsub.f32 %v3598_v2, %v3630_v26 }
  0x8a   : > { %v3737_v28 = vld [vmem:[%s5192_s27 + $0x310] sm:$0xff]  ;;  %v3631_v30 = vld [vmem:[%s5192_s27 + $0x1c0] sm:$0xff]  ;;  %v3602_v45 = vld [vmem:[%s5186_s9 + $0x1d8] sm:$0xff]  ;;  %v626_v47 = vsub.f32 %v3647_v24, %v3679_v25  ;;  %v5405_v8 = vsub.f32 %v3600_v11, %v3632_v31  ;;  %v501_v24 = vmul.f32 %v469_v14, %v469_v14 }
  0x8b   : > { %v3633_v33 = vld [vmem:[%s5192_s27 + $0x1d0] sm:$0xff]  ;;  %v3603_v46 = vld [vmem:[%s5186_s9 + $0x1e0] sm:$0xff]  ;;  %v3706_v54 = vld [vmem:[%s5186_s9 + $0x318] sm:$0xff]  ;;  %v782_v5 = vsub.f32 %v3705_v29, %v3737_v28  ;;  %v5403_v7 = vsub.f32 %v3599_v10, %v3631_v30  ;;  %v812_v29 = vmul.f32 %v780_v42, %v780_v42  ;;  %v813_v28 = vmul.f32 %v781_v43, %v781_v43 }
  0x8c   : > { %v3738_v55 = vld [vmem:[%s5192_s27 + $0x318] sm:$0xff]  ;;  %v3604_v57 = vld [vmem:[%s5186_s9 + $0x1e8] sm:$0xff]  ;;  %v3605_v58 = vld [vmem:[%s5186_s9 + $0x1f0] sm:$0xff]  ;;  %v5407_v9 = vsub.f32 %v3601_v12, %v3633_v33  ;;  %v375_v10 = vadd.f32 %v374_v44, %v5303_v18  ;;  %v658_v12 = vmul.f32 %v626_v47, %v626_v47  ;;  %v688_v30 = vadd.f32 %v687_v53, %v657_v48 }
  0x8d   : > { %v3606_v59 = vld [vmem:[%s5186_s9 + $0x1f8] sm:$0xff]  ;;  %v3648_v63 = vld [vmem:[%s5186_s9 + $0x248] sm:$0xff]  ;;  %v3635_v6 = vld [vmem:[%s5192_s27 + $0x1e0] sm:$0xff]  ;;  %v783_v26 = vsub.f32 %v3706_v54, %v3738_v55  ;;  %v814_v49 = vmul.f32 %v782_v5, %v782_v5  ;;  %v502_v42 = vmul.f32 %v5363_v15, %v5363_v15  ;;  %v844_v48 = vadd.f32 %v813_v28, %v812_v29 }
  0x8e   : > { %v3634_v60 = vld [vmem:[%s5192_s27 + $0x1d8] sm:$0xff]  ;;  %v3680_v4 = vld [vmem:[%s5192_s27 + $0x248] sm:$0xff]  ;;  %v3707_v25 = vld [vmem:[%s5186_s9 + $0x320] sm:$0xff]  ;;  %v5417_v56 = vsub.f32 %v3603_v46, %v3635_v6  ;;  %v376_v53 = vadd.f32 %v375_v10, %v5305_v19  ;;  %v5438_v5 = vmul.f32 %v5367_v23, %v5367_v23  ;;  %v5442_v19 = vmul.f32 %v5372_v27, %v5372_v27 }
  0x8f   : > { %v3739_v0 = vld [vmem:[%s5192_s27 + $0x320] sm:$0xff]  ;;  %v3636_v1 = vld [vmem:[%s5192_s27 + $0x1e8] sm:$0xff]  ;;  %v3637_v2 = vld [vmem:[%s5192_s27 + $0x1f0] sm:$0xff]  ;;  %v627_v11 = vsub.f32 %v3648_v63, %v3680_v4  ;;  %v483_v33 = vsub.f32 %v3602_v45, %v3634_v60  ;;  %v532_v45 = vadd.f32 %v531_v13, %v501_v24  ;;  %v815_v47 = vmul.f32 %v783_v26, %v783_v26 }
  0x90   : > { %v3638_v3 = vld [vmem:[%s5192_s27 + $0x1f8] sm:$0xff]  ;;  %v3708_v31 = vld [vmem:[%s5186_s9 + $0x328] sm:$0xff]  ;;  %v3649_v52 = vld [vmem:[%s5186_s9 + $0x250] sm:$0xff]  ;;  %v784_v50 = vsub.f32 %v3707_v25, %v3739_v0  ;;  %v5421_v34 = vsub.f32 %v3604_v57, %v3636_v1  ;;  %v5423_v37 = vsub.f32 %v3605_v58, %v3637_v2  ;;  %v689_v57 = vadd.f32 %v688_v30, %v658_v12 }
  0x91   : > { %v3740_v14 = vld [vmem:[%s5192_s27 + $0x328] sm:$0xff]  ;;  %v3681_v51 = vld [vmem:[%s5192_s27 + $0x250] sm:$0xff]  ;;  %v5425_v18 = vsub.f32 %v3606_v59, %v3638_v3  ;;  %v659_v55 = vmul.f32 %v627_v11, %v627_v11  ;;  %v503_v58 = vmul.f32 %v5365_v17, %v5365_v17  ;;  %v3650_v59 = vld [vmem:[%s5186_s9 + $0x258] sm:$0xff]  ;;  %v845_v4 = vadd.f32 %v844_v48, %v814_v49 }
  0x92   : > { %v3709_v43 = vld [vmem:[%s5186_s9 + $0x330] sm:$0xff]  ;;  %v785_v46 = vsub.f32 %v3708_v31, %v3740_v14  ;;  %v628_v54 = vsub.f32 %v3649_v52, %v3681_v51  ;;  %v3682_v60 = vld [vmem:[%s5192_s27 + $0x258] sm:$0xff]  ;;  %v816_v15 = vmul.f32 %v784_v50, %v784_v50  ;;  %v5446_v51 = vmul.f32 %v5374_v32, %v5374_v32  ;;  %v3651_v1 = vld [vmem:[%s5186_s9 + $0x260] sm:$0xff] }
  0x93   : > { %v3741_v44 = vld [vmem:[%s5192_s27 + $0x330] sm:$0xff]  ;;  %v5450_v52 = vmul.f32 %v5376_v35, %v5376_v35  ;;  %v3710_v49 = vld [vmem:[%s5186_s9 + $0x338] sm:$0xff]  ;;  %v5456_v17 = vmul.f32 %v5378_v36, %v5378_v36  ;;  %v533_v23 = vadd.f32 %v532_v45, %v502_v42  ;;  %v846_v24 = vadd.f32 %v845_v4, %v815_v47  ;;  %v3652_v36 = vld [vmem:[%s5186_s9 + $0x268] sm:$0xff] }
  0x94   : > { %v786_v63 = vsub.f32 %v3709_v43, %v3741_v44  ;;  %v3742_v50 = vld [vmem:[%s5192_s27 + $0x338] sm:$0xff]  ;;  %v817_v6 = vmul.f32 %v785_v46, %v785_v46  ;;  %v377_v27 = vadd.f32 %v376_v53, %v5307_v20  ;;  %v629_v25 = vsub.f32 %v3650_v59, %v3682_v60  ;;  %v3683_v2 = vld [vmem:[%s5192_s27 + $0x260] sm:$0xff]  ;;  %v3653_v10 = vld [vmem:[%s5186_s9 + $0x270] sm:$0xff] }
  0x95   : > { %v660_v32 = vmul.f32 %v628_v54, %v628_v54  ;;  %v690_v0 = vadd.f32 %v689_v57, %v659_v55  ;;  %v5461_v35 = vmul.f32 %v5394_v61, %v5394_v61  ;;  %v787_v3 = vsub.f32 %v3710_v49, %v3742_v50  ;;  %v3654_v11 = vld [vmem:[%s5186_s9 + $0x278] sm:$0xff]  ;;  %v3711_v12 = vld [vmem:[%s5186_s9 + $0x340] sm:$0xff]  ;;  %v3656_v14 = vld [vmem:[%s5186_s9 + $0x288] sm:$0xff] }
  0x96   : > { %v818_v13 = vmul.f32 %v786_v63, %v786_v63  ;;  %v847_v20 = vadd.f32 %v846_v24, %v816_v15  ;;  %v5468_v26 = vmul.f32 %v5396_v16, %v5396_v16  ;;  %v5472_v29 = vmul.f32 %v5398_v62, %v5398_v62  ;;  %v3655_v16 = vld [vmem:[%s5186_s9 + $0x280] sm:$0xff]  ;;  %v3685_v42 = vld [vmem:[%s5192_s27 + $0x270] sm:$0xff]  ;;  %v3686_v46 = vld [vmem:[%s5192_s27 + $0x278] sm:$0xff] }
  0x97   : > { %v5476_v61 = vmul.f32 %v5403_v7, %v5403_v7  ;;  %v5480_v28 = vmul.f32 %v5405_v8, %v5405_v8  ;;  %v3743_v30 = vld [vmem:[%s5192_s27 + $0x340] sm:$0xff]  ;;  %v5489_v62 = vmul.f32 %v5407_v9, %v5407_v9  ;;  %v5491_v31 = vmul.f32 %v483_v33, %v483_v33  ;;  %v3684_v8 = vld [vmem:[%s5192_s27 + $0x268] sm:$0xff]  ;;  %v3657_v45 = vld [vmem:[%s5186_s9 + $0x290] sm:$0xff] }
  0x98   : > { %v534_v7 = vadd.f32 %v533_v23, %v503_v58  ;;  %v848_v43 = vadd.f32 %v847_v20, %v817_v6  ;;  %v378_v44 = vadd.f32 %v377_v27, %v5309_v21  ;;  %v3687_v9 = vld [vmem:[%s5192_s27 + $0x280] sm:$0xff]  ;;  %v3688_v47 = vld [vmem:[%s5192_s27 + $0x288] sm:$0xff]  ;;  %v630_v48 = vsub.f32 %v3651_v1, %v3683_v2  ;;  %v3658_v55 = vld [vmem:[%s5186_s9 + $0x298] sm:$0xff] }
  0x99   : > { %v661_v33 = vmul.f32 %v629_v25, %v629_v25  ;;  %v691_v53 = vadd.f32 %v690_v0, %v660_v32  ;;  %v5503_v54 = vmul.f32 %v5417_v56, %v5417_v56  ;;  %v3659_v57 = vld [vmem:[%s5186_s9 + $0x2a0] sm:$0xff]  ;;  %v3660_v58 = vld [vmem:[%s5186_s9 + $0x2a8] sm:$0xff]  ;;  %v3661_v59 = vld [vmem:[%s5186_s9 + $0x2b0] sm:$0xff]  ;;  %v788_v15 = vsub.f32 %v3711_v12, %v3743_v30 }
  0x9a   : > { %v3689_v21 = vld [vmem:[%s5192_s27 + $0x290] sm:$0xff]  ;;  %v3690_v60 = vld [vmem:[%s5192_s27 + $0x298] sm:$0xff]  ;;  %v3691_v63 = vld [vmem:[%s5192_s27 + $0x2a0] sm:$0xff]  ;;  %v819_v4 = vmul.f32 %v787_v3, %v787_v3  ;;  %v849_v49 = vadd.f32 %v848_v43, %v818_v13  ;;  %v5514_v56 = vmul.f32 %v5421_v34, %v5421_v34  ;;  %v5518_v50 = vmul.f32 %v5423_v37, %v5423_v37 }
  0x9b   : > { %v5522_v23 = vmul.f32 %v5425_v18, %v5425_v18  ;;  %v3662_v6 = vld [vmem:[%s5186_s9 + $0x2b8] sm:$0xff]  ;;  %v3692_v24 = vld [vmem:[%s5192_s27 + $0x2a8] sm:$0xff]  ;;  %v631_v27 = vsub.f32 %v3652_v36, %v3684_v8  ;;  %v535_v34 = vadd.f32 %v534_v7, %v5438_v5  ;;  %v3663_v0 = vld [vmem:[%s5186_s9 + $0x2c0] sm:$0xff]  ;;  %v5532_v18 = vsub.f32 %v3653_v10, %v3685_v42 }
  0x9c   : > { %8076 = vst [vmem:[#allocation16_spill] sm:$0xff] %v5514_v56  ;;  %8077 = vst [vmem:[#allocation17_spill] sm:$0xff] %v5518_v50  ;;  %v3712_v25 = vld [vmem:[%s5186_s9 + $0x348] sm:$0xff]  ;;  %v3693_v37 = vld [vmem:[%s5192_s27 + $0x2b0] sm:$0xff]  ;;  %v5534_v2 = vsub.f32 %v3654_v11, %v3686_v46  ;;  %v5536_v36 = vsub.f32 %v3655_v16, %v3687_v9  ;;  %v379_v13 = vadd.f32 %v378_v44, %v5311_v22 }
  0x9d   : > { %8078 = vst [vmem:[#allocation18_spill] sm:$0xff] %v5522_v23  ;;  %v3744_v32 = vld [vmem:[%s5192_s27 + $0x348] sm:$0xff]  ;;  %v3694_v1 = vld [vmem:[%s5192_s27 + $0x2b8] sm:$0xff]  ;;  %v3767_v3 = vld [vmem:[%s5186_s9 + $0x400] sm:$0xff]  ;;  %v5540_v20 = vsub.f32 %v3656_v14, %v3688_v47  ;;  %v662_v5 = vmul.f32 %v630_v48, %v630_v48  ;;  %v692_v12 = vadd.f32 %v691_v53, %v661_v33  ;;  %v5551_v22 = vsub.f32 %v3657_v45, %v3689_v21 }
  0x9e   : > { %v3768_v30 = vld [vmem:[%s5186_s9 + $0x408] sm:$0xff]  ;;  %v3799_v7 = vld [vmem:[%s5192_s27 + $0x400] sm:$0xff]  ;;  %v3665_v10 = vld [vmem:[%s5186_s9 + $0x2d0] sm:$0xff]  ;;  %v789_v44 = vsub.f32 %v3712_v25, %v3744_v32  ;;  %v820_v9 = vmul.f32 %v788_v15, %v788_v15  ;;  %v850_v47 = vadd.f32 %v849_v49, %v819_v4  ;;  %v5554_v48 = vsub.f32 %v3658_v55, %v3690_v60 }
  0x9f   : > { %v3800_v8 = vld [vmem:[%s5192_s27 + $0x408] sm:$0xff]  ;;  %v3666_v11 = vld [vmem:[%s5186_s9 + $0x2d8] sm:$0xff]  ;;  %v3667_v42 = vld [vmem:[%s5186_s9 + $0x2e0] sm:$0xff]  ;;  %v5556_v33 = vsub.f32 %v3659_v57, %v3691_v63  ;;  %v5558_v53 = vsub.f32 %v3660_v58, %v3692_v24  ;;  %v5560_v23 = vsub.f32 %v3661_v59, %v3693_v37  ;;  %v536_v21 = vadd.f32 %v535_v34, %v5442_v19 }
  0xa0   : > { %v3664_v43 = vld [vmem:[%s5186_s9 + $0x2c8] sm:$0xff]  ;;  %v3695_v16 = vld [vmem:[%s5192_s27 + $0x2c0] sm:$0xff]  ;;  %v3713_v14 = vld [vmem:[%s5186_s9 + $0x350] sm:$0xff]  ;;  %v5569_v57 = vsub.f32 %v3662_v6, %v3694_v1  ;;  %v942_v58 = vsub.f32 %v3767_v3, %v3799_v7  ;;  %v943_v63 = vsub.f32 %v3768_v30, %v3800_v8  ;;  %v380_v59 = vadd.f32 %v379_v13, %v5321_v38 }
  0xa1   : > { %v3696_v46 = vld [vmem:[%s5192_s27 + $0x2c8] sm:$0xff]  ;;  %v3745_v50 = vld [vmem:[%s5192_s27 + $0x350] sm:$0xff]  ;;  %v3698_v55 = vld [vmem:[%s5192_s27 + $0x2d8] sm:$0xff]  ;;  %v5572_v4 = vsub.f32 %v3663_v0, %v3695_v16  ;;  %v663_v49 = vmul.f32 %v631_v27, %v631_v27  ;;  %v693_v24 = vadd.f32 %v692_v12, %v662_v5  ;;  %v821_v3 = vmul.f32 %v789_v44, %v789_v44 }
  0xa2   : > { %v3769_v56 = vld [vmem:[%s5186_s9 + $0x410] sm:$0xff]  ;;  %v3699_v60 = vld [vmem:[%s5192_s27 + $0x2e0] sm:$0xff]  ;;  %v3770_v25 = vld [vmem:[%s5186_s9 + $0x418] sm:$0xff]  ;;  %v790_v1 = vsub.f32 %v3713_v14, %v3745_v50  ;;  %v851_v30 = vadd.f32 %v850_v47, %v820_v9  ;;  %v5581_v0 = vsub.f32 %v3664_v43, %v3696_v46  ;;  %v5585_v13 = vsub.f32 %v3666_v11, %v3698_v55 }
  0xa3   : > { %v3801_v45 = vld [vmem:[%s5192_s27 + $0x410] sm:$0xff]  ;;  %v3802_v32 = vld [vmem:[%s5192_s27 + $0x418] sm:$0xff]  ;;  %v3668_v19 = vld [vmem:[%s5186_s9 + $0x2e8] sm:$0xff]  ;;  %v5587_v5 = vsub.f32 %v3667_v42, %v3699_v60  ;;  %v537_v50 = vadd.f32 %v536_v21, %v5446_v51  ;;  %v974_v43 = vmul.f32 %v942_v58, %v942_v58  ;;  %v975_v46 = vmul.f32 %v943_v63, %v943_v63 }
  0xa4   : > { %v3697_v15 = vld [vmem:[%s5192_s27 + $0x2d0] sm:$0xff]  ;;  %v3714_v37 = vld [vmem:[%s5186_s9 + $0x358] sm:$0xff]  ;;  %v944_v7 = vsub.f32 %v3769_v56, %v3801_v45  ;;  %v3771_v12 = vld [vmem:[%s5186_s9 + $0x420] sm:$0xff]  ;;  %v945_v44 = vsub.f32 %v3770_v25, %v3802_v32  ;;  %v664_v11 = vmul.f32 %v5532_v18, %v5532_v18  ;;  %v694_v42 = vadd.f32 %v693_v24, %v663_v49 }
  0xa5   : > { %v3669_v34 = vld [vmem:[%s5186_s9 + $0x2f0] sm:$0xff]  ;;  %v3746_v6 = vld [vmem:[%s5192_s27 + $0x358] sm:$0xff]  ;;  %v5583_v27 = vsub.f32 %v3665_v10, %v3697_v15  ;;  %v3803_v8 = vld [vmem:[%s5192_s27 + $0x420] sm:$0xff]  ;;  %v381_v10 = vadd.f32 %v380_v59, %v5323_v39  ;;  %v822_v51 = vmul.f32 %v790_v1, %v790_v1  ;;  %v852_v21 = vadd.f32 %v851_v30, %v821_v3 }
  0xa6   : > { %v3670_v38 = vld [vmem:[%s5186_s9 + $0x2f8] sm:$0xff]  ;;  %v3700_v16 = vld [vmem:[%s5192_s27 + $0x2e8] sm:$0xff]  ;;  %v3701_v14 = vld [vmem:[%s5192_s27 + $0x2f0] sm:$0xff]  ;;  %v791_v9 = vsub.f32 %v3714_v37, %v3746_v6  ;;  %v946_v60 = vsub.f32 %v3771_v12, %v3803_v8  ;;  %v976_v25 = vmul.f32 %v944_v7, %v944_v7  ;;  %v665_v63 = vmul.f32 %v5534_v2, %v5534_v2 }
  0xa7   : > { %v3702_v56 = vld [vmem:[%s5192_s27 + $0x2f8] sm:$0xff]  ;;  %v3772_v47 = vld [vmem:[%s5186_s9 + $0x428] sm:$0xff]  ;;  %v3715_v15 = vld [vmem:[%s5186_s9 + $0x360] sm:$0xff]  ;;  %v5602_v58 = vsub.f32 %v3668_v19, %v3700_v16  ;;  %v5604_v39 = vsub.f32 %v3669_v34, %v3701_v14  ;;  %v538_v24 = vadd.f32 %v537_v50, %v5450_v52  ;;  %v977_v37 = vmul.f32 %v945_v44, %v945_v44 }
  0xa8   : > { %v3804_v45 = vld [vmem:[%s5192_s27 + $0x428] sm:$0xff]  ;;  %v3747_v55 = vld [vmem:[%s5192_s27 + $0x360] sm:$0xff]  ;;  %v5606_v18 = vsub.f32 %v3670_v38, %v3702_v56  ;;  %v3773_v59 = vld [vmem:[%s5186_s9 + $0x430] sm:$0xff]  ;;  %v1006_v6 = vadd.f32 %v975_v46, %v974_v43  ;;  %v382_v1 = vadd.f32 %v381_v10, %v5325_v40  ;;  %v695_v19 = vadd.f32 %v694_v42, %v664_v11 }
  0xa9   : > { %v3805_v49 = vld [vmem:[%s5192_s27 + $0x430] sm:$0xff]  ;;  %v947_v32 = vsub.f32 %v3772_v47, %v3804_v45  ;;  %v792_v3 = vsub.f32 %v3715_v15, %v3747_v55  ;;  %v823_v34 = vmul.f32 %v791_v9, %v791_v9  ;;  %v3774_v30 = vld [vmem:[%s5186_s9 + $0x438] sm:$0xff]  ;;  %v3716_v38 = vld [vmem:[%s5186_s9 + $0x368] sm:$0xff]  ;;  %v853_v8 = vadd.f32 %v852_v21, %v822_v51 }
  0xaa   : > { %v3806_v7 = vld [vmem:[%s5192_s27 + $0x438] sm:$0xff]  ;;  %v3748_v12 = vld [vmem:[%s5192_s27 + $0x368] sm:$0xff]  ;;  %v948_v2 = vsub.f32 %v3773_v59, %v3805_v49  ;;  %v978_v16 = vmul.f32 %v946_v60, %v946_v60  ;;  %v1007_v14 = vadd.f32 %v1006_v6, %v976_v25  ;;  %v666_v52 = vmul.f32 %v5536_v36, %v5536_v36  ;;  %v3775_v43 = vld [vmem:[%s5186_s9 + $0x440] sm:$0xff] }
  0xab   : > { %v667_v50 = vmul.f32 %v5540_v20, %v5540_v20  ;;  %v5624_v40 = vmul.f32 %v5551_v22, %v5551_v22  ;;  %v5628_v56 = vmul.f32 %v5554_v48, %v5554_v48  ;;  %v539_v44 = vadd.f32 %v538_v24, %v5456_v17  ;;  %v3807_v46 = vld [vmem:[%s5192_s27 + $0x440] sm:$0xff]  ;;  %v3717_v55 = vld [vmem:[%s5186_s9 + $0x370] sm:$0xff]  ;;  %v3808_v25 = vld [vmem:[%s5192_s27 + $0x448] sm:$0xff] }
  0xac   : > { %v949_v10 = vsub.f32 %v3774_v30, %v3806_v7  ;;  %v979_v11 = vmul.f32 %v947_v32, %v947_v32  ;;  %v1008_v36 = vadd.f32 %v1007_v14, %v977_v37  ;;  %v383_v42 = vadd.f32 %v382_v1, %v5327_v41  ;;  %v3749_v51 = vld [vmem:[%s5192_s27 + $0x370] sm:$0xff]  ;;  %v8079_v49 = vld [vmem:[#allocation11_spill] sm:$0xff]  ;;  %v3719_v37 = vld [vmem:[%s5186_s9 + $0x380] sm:$0xff] }
  0xad   : > { %v5636_v20 = vmul.f32 %v5556_v33, %v5556_v33  ;;  %v696_v22 = vadd.f32 %v695_v19, %v665_v63  ;;  %v793_v48 = vsub.f32 %v3716_v38, %v3748_v12  ;;  %v824_v9 = vmul.f32 %v792_v3, %v792_v3  ;;  %v3720_v6 = vld [vmem:[%s5186_s9 + $0x388] sm:$0xff]  ;;  %v3721_v1 = vld [vmem:[%s5186_s9 + $0x390] sm:$0xff]  ;;  %v3750_v19 = vld [vmem:[%s5192_s27 + $0x378] sm:$0xff] }
  0xae   : > { %v854_v47 = vadd.f32 %v853_v8, %v823_v34  ;;  %v980_v17 = vmul.f32 %v948_v2, %v948_v2  ;;  %v1009_v45 = vadd.f32 %v1008_v36, %v978_v16  ;;  %v5640_v15 = vmul.f32 %v5558_v53, %v5558_v53  ;;  %v3751_v3 = vld [vmem:[%s5192_s27 + $0x380] sm:$0xff]  ;;  %v3722_v12 = vld [vmem:[%s5186_s9 + $0x398] sm:$0xff]  ;;  %v3752_v8 = vld [vmem:[%s5192_s27 + $0x388] sm:$0xff] }
  0xaf   : > { %v5644_v41 = vmul.f32 %v5560_v23, %v5560_v23  ;;  %v5648_v33 = vmul.f32 %v5569_v57, %v5569_v57  ;;  %v950_v21 = vsub.f32 %v3775_v43, %v3807_v46  ;;  %v540_v53 = vadd.f32 %v539_v44, %v5461_v35  ;;  %v3776_v23 = vld [vmem:[%s5186_s9 + $0x448] sm:$0xff]  ;;  %v3753_v2 = vld [vmem:[%s5192_s27 + $0x390] sm:$0xff]  ;;  %v3754_v16 = vld [vmem:[%s5192_s27 + $0x398] sm:$0xff] }
  0xb0   : > { %v5655_v60 = vmul.f32 %v5572_v4, %v5572_v4  ;;  %v981_v63 = vmul.f32 %v949_v10, %v949_v10  ;;  %v1010_v59 = vadd.f32 %v1009_v45, %v979_v11  ;;  %v384_v57 = vadd.f32 %v383_v42, %v8079_v49  ;;  %v3718_v4 = vld [vmem:[%s5186_s9 + $0x378] sm:$0xff]  ;;  %v3723_v43 = vld [vmem:[%s5186_s9 + $0x3a0] sm:$0xff]  ;;  %v3724_v46 = vld [vmem:[%s5186_s9 + $0x3a8] sm:$0xff] }
  0xb1   : > { %v5662_v24 = vmul.f32 %v5581_v0, %v5581_v0  ;;  %v5666_v32 = vmul.f32 %v5583_v27, %v5583_v27  ;;  %v697_v35 = vadd.f32 %v696_v22, %v666_v52  ;;  %v794_v34 = vsub.f32 %v3717_v55, %v3749_v51  ;;  %v3777_v10 = vld [vmem:[%s5186_s9 + $0x450] sm:$0xff]  ;;  %v3831_v42 = vld [vmem:[%s5186_s9 + $0x500] sm:$0xff]  ;;  %v3864_v45 = vld [vmem:[%s5192_s27 + $0x508] sm:$0xff] }
  0xb2   : > { %v825_v30 = vmul.f32 %v793_v48, %v793_v48  ;;  %v855_v0 = vadd.f32 %v854_v47, %v824_v9  ;;  %v1011_v7 = vadd.f32 %v1010_v59, %v980_v17  ;;  %v5676_v27 = vmul.f32 %v5585_v13, %v5585_v13  ;;  %v3809_v11 = vld [vmem:[%s5192_s27 + $0x450] sm:$0xff]  ;;  %v3863_v17 = vld [vmem:[%s5192_s27 + $0x500] sm:$0xff]  ;;  %v3726_v55 = vld [vmem:[%s5186_s9 + $0x3b8] sm:$0xff] }
  0xb3   : > { %v5680_v38 = vmul.f32 %v5587_v5, %v5587_v5  ;;  %v951_v14 = vsub.f32 %v3776_v23, %v3808_v25  ;;  %v982_v52 = vmul.f32 %v950_v21, %v950_v21  ;;  %v541_v44 = vadd.f32 %v540_v53, %v5468_v26  ;;  %v8080_v22 = vld [vmem:[#allocation12_spill] sm:$0xff]  ;;  %v3755_v51 = vld [vmem:[%s5192_s27 + $0x3a0] sm:$0xff]  ;;  %v3756_v21 = vld [vmem:[%s5192_s27 + $0x3a8] sm:$0xff] }
  0xb4   : > { %v5689_v13 = vmul.f32 %v5602_v58, %v5602_v58  ;;  %v5693_v5 = vmul.f32 %v5604_v39, %v5604_v39  ;;  %v1012_v36 = vadd.f32 %v1011_v7, %v981_v63  ;;  %v385_v26 = vadd.f32 %v384_v57, %v8080_v22  ;;  %v3725_v9 = vld [vmem:[%s5186_s9 + $0x3b0] sm:$0xff]  ;;  %v3832_v39 = vld [vmem:[%s5186_s9 + $0x508] sm:$0xff] }
  0xb5   : > { %v5703_v58 = vmul.f32 %v5606_v18, %v5606_v18  ;;  %v698_v48 = vadd.f32 %v697_v35, %v667_v50  ;;  %v795_v47 = vsub.f32 %v3718_v4, %v3750_v19  ;;  %v796_v53 = vsub.f32 %v3719_v37, %v3751_v3  ;;  %v3757_v63 = vld [vmem:[%s5192_s27 + $0x3b0] sm:$0xff]  ;;  %v3758_v37 = vld [vmem:[%s5192_s27 + $0x3b8] sm:$0xff] }
  0xb6   : > { %v5712_v23 = vsub.f32 %v3720_v6, %v3752_v8  ;;  %v826_v25 = vmul.f32 %v794_v34, %v794_v34  ;;  %v856_v18 = vadd.f32 %v855_v0, %v825_v30  ;;  %v5715_v50 = vsub.f32 %v3721_v1, %v3753_v2  ;;  %v3833_v35 = vld [vmem:[%s5186_s9 + $0x510] sm:$0xff]  ;;  %v3778_v3 = vld [vmem:[%s5186_s9 + $0x458] sm:$0xff]  ;;  %v3727_v2 = vld [vmem:[%s5186_s9 + $0x3c0] sm:$0xff] }
  0xb7   : > { %8081 = vst [vmem:[#allocation11_spill] sm:$0xff] %v5703_v58  ;;  %v952_v59 = vsub.f32 %v3777_v10, %v3809_v11  ;;  %v983_v49 = vmul.f32 %v951_v14, %v951_v14  ;;  %v1013_v57 = vadd.f32 %v1012_v36, %v982_v52  ;;  %v3865_v4 = vld [vmem:[%s5192_s27 + $0x510] sm:$0xff]  ;;  %v542_v19 = vadd.f32 %v541_v44, %v5472_v29  ;;  %v3810_v34 = vld [vmem:[%s5192_s27 + $0x458] sm:$0xff]  ;;  %v3760_v10 = vld [vmem:[%s5192_s27 + $0x3c8] sm:$0xff] }
  0xb8   : > { %v5721_v6 = vsub.f32 %v3722_v12, %v3754_v16  ;;  %v1104_v30 = vsub.f32 %v3831_v42, %v3863_v17  ;;  %v1105_v1 = vsub.f32 %v3832_v39, %v3864_v45  ;;  %v8082_v0 = vld [vmem:[#allocation13_spill] sm:$0xff]  ;;  %v699_v8 = vadd.f32 %v698_v48, %v5624_v40  ;;  %v3728_v12 = vld [vmem:[%s5186_s9 + $0x3c8] sm:$0xff]  ;;  %v3759_v16 = vld [vmem:[%s5192_s27 + $0x3c0] sm:$0xff] }
  0xb9   : > { %v386_v7 = vadd.f32 %v385_v26, %v8082_v0  ;;  %v5728_v14 = vsub.f32 %v3723_v43, %v3755_v51  ;;  %v5730_v52 = vsub.f32 %v3724_v46, %v3756_v21  ;;  %v3834_v29 = vld [vmem:[%s5186_s9 + $0x518] sm:$0xff]  ;;  %v5737_v11 = vsub.f32 %v3725_v9, %v3757_v63  ;;  %v3729_v22 = vld [vmem:[%s5186_s9 + $0x3d0] sm:$0xff]  ;;  %v3835_v39 = vld [vmem:[%s5186_s9 + $0x520] sm:$0xff] }
  0xba   : > { %v3866_v44 = vld [vmem:[%s5192_s27 + $0x518] sm:$0xff]  ;;  %v827_v36 = vmul.f32 %v795_v47, %v795_v47  ;;  %v857_v42 = vadd.f32 %v856_v18, %v826_v25  ;;  %v1106_v40 = vsub.f32 %v3833_v35, %v3865_v4  ;;  %v5740_v43 = vsub.f32 %v3726_v55, %v3758_v37  ;;  %v3867_v17 = vld [vmem:[%s5192_s27 + $0x520] sm:$0xff]  ;;  %v3761_v9 = vld [vmem:[%s5192_s27 + $0x3d0] sm:$0xff] }
  0xbb   : > { %v953_v46 = vsub.f32 %v3778_v3, %v3810_v34  ;;  %v984_v26 = vmul.f32 %v952_v59, %v952_v59  ;;  %v1014_v48 = vadd.f32 %v1013_v57, %v983_v49  ;;  %v543_v45 = vadd.f32 %v542_v19, %v5476_v61  ;;  %v3779_v47 = vld [vmem:[%s5186_s9 + $0x460] sm:$0xff]  ;;  %v3730_v49 = vld [vmem:[%s5186_s9 + $0x3d8] sm:$0xff]  ;;  %v3836_v61 = vld [vmem:[%s5186_s9 + $0x528] sm:$0xff] }
  0xbc   : > { %v3811_v51 = vld [vmem:[%s5192_s27 + $0x460] sm:$0xff]  ;;  %v1107_v21 = vsub.f32 %v3834_v29, %v3866_v44  ;;  %v1136_v25 = vmul.f32 %v1104_v30, %v1104_v30  ;;  %v1137_v55 = vmul.f32 %v1105_v1, %v1105_v1  ;;  %v700_v59 = vadd.f32 %v699_v8, %v5628_v56  ;;  %v3868_v4 = vld [vmem:[%s5192_s27 + $0x528] sm:$0xff]  ;;  %v3762_v37 = vld [vmem:[%s5192_s27 + $0x3d8] sm:$0xff] }
  0xbd   : > { %v8083_v18 = vld [vmem:[#allocation14_spill] sm:$0xff]  ;;  %v5751_v57 = vsub.f32 %v3727_v2, %v3759_v16  ;;  %v5753_v35 = vsub.f32 %v3728_v12, %v3760_v10  ;;  %v828_v34 = vmul.f32 %v796_v53, %v796_v53  ;;  %v858_v30 = vadd.f32 %v857_v42, %v827_v36  ;;  %v3732_v56 = vld [vmem:[%s5186_s9 + $0x3e8] sm:$0xff]  ;;  %v3837_v44 = vld [vmem:[%s5186_s9 + $0x530] sm:$0xff] }
  0xbe   : > { %v387_v63 = vadd.f32 %v386_v7, %v8083_v18  ;;  %v3731_v19 = vld [vmem:[%s5186_s9 + $0x3e0] sm:$0xff]  ;;  %v1108_v1 = vsub.f32 %v3835_v39, %v3867_v17  ;;  %v1138_v0 = vmul.f32 %v1106_v40, %v1106_v40  ;;  %v5761_v7 = vsub.f32 %v3729_v22, %v3761_v9  ;;  %v3869_v12 = vld [vmem:[%s5192_s27 + $0x530] sm:$0xff]  ;;  %v3764_v10 = vld [vmem:[%s5192_s27 + $0x3e8] sm:$0xff] }
  0xbf   : > { %v3763_v3 = vld [vmem:[%s5192_s27 + $0x3e0] sm:$0xff]  ;;  %v954_v8 = vsub.f32 %v3779_v47, %v3811_v51  ;;  %v985_v2 = vmul.f32 %v953_v46, %v953_v46  ;;  %v1015_v29 = vadd.f32 %v1014_v48, %v984_v26  ;;  %v544_v16 = vadd.f32 %v543_v45, %v5480_v28  ;;  %v3780_v53 = vld [vmem:[%s5186_s9 + $0x468] sm:$0xff]  ;;  %v3733_v17 = vld [vmem:[%s5186_s9 + $0x3f0] sm:$0xff] }
  0xc0   : > { %v3812_v36 = vld [vmem:[%s5192_s27 + $0x468] sm:$0xff]  ;;  %v1109_v42 = vsub.f32 %v3836_v61, %v3868_v4  ;;  %v1139_v40 = vmul.f32 %v1107_v21, %v1107_v21  ;;  %v1168_v39 = vadd.f32 %v1137_v55, %v1136_v25  ;;  %v701_v22 = vadd.f32 %v700_v59, %v5636_v20  ;;  %v3734_v9 = vld [vmem:[%s5186_s9 + $0x3f8] sm:$0xff]  ;;  %v3765_v47 = vld [vmem:[%s5192_s27 + $0x3f0] sm:$0xff] }
  0xc1   : > { %v807_v46 = vsub.f32 %v3730_v49, %v3762_v37  ;;  %v808_v26 = vsub.f32 %v3731_v19, %v3763_v3  ;;  %v829_v28 = vmul.f32 %v5712_v23, %v5712_v23  ;;  %v3766_v48 = vld [vmem:[%s5192_s27 + $0x3f8] sm:$0xff]  ;;  %v859_v45 = vadd.f32 %v858_v30, %v828_v34  ;;  %v8084_v49 = vld [vmem:[#allocation15_spill] sm:$0xff]  ;;  %v3781_v23 = vld [vmem:[%s5186_s9 + $0x470] sm:$0xff] }
  0xc2   : > { %v3838_v51 = vld [vmem:[%s5186_s9 + $0x538] sm:$0xff]  ;;  %v1110_v58 = vsub.f32 %v3837_v44, %v3869_v12  ;;  %v1140_v61 = vmul.f32 %v1108_v1, %v1108_v1  ;;  %v1169_v21 = vadd.f32 %v1168_v39, %v1138_v0  ;;  %v5778_v25 = vsub.f32 %v3732_v56, %v3764_v10  ;;  %v3813_v37 = vld [vmem:[%s5192_s27 + $0x470] sm:$0xff] }
  0xc3   : > { %v3870_v18 = vld [vmem:[%s5192_s27 + $0x538] sm:$0xff]  ;;  %v955_v20 = vsub.f32 %v3780_v53, %v3812_v36  ;;  %v986_v55 = vmul.f32 %v954_v8, %v954_v8  ;;  %v1016_v59 = vadd.f32 %v1015_v29, %v985_v2  ;;  %v5781_v4 = vadd.f32 %v387_v63, %v8084_v49  ;;  %v3839_v29 = vld [vmem:[%s5186_s9 + $0x540] sm:$0xff] }
  0xc4   : > { %v545_v19 = vadd.f32 %v544_v16, %v5489_v62  ;;  %v1141_v3 = vmul.f32 %v1109_v42, %v1109_v42  ;;  %v1170_v34 = vadd.f32 %v1169_v21, %v1139_v40  ;;  %v702_v30 = vadd.f32 %v701_v22, %v5640_v15  ;;  %v3871_v63 = vld [vmem:[%s5192_s27 + $0x540] sm:$0xff] }
  0xc5   : > { %v810_v1 = vsub.f32 %v3733_v17, %v3765_v47  ;;  %v811_v0 = vsub.f32 %v3734_v9, %v3766_v48  ;;  %v1111_v56 = vsub.f32 %v3838_v51, %v3870_v18  ;;  %v830_v8 = vmul.f32 %v5715_v50, %v5715_v50  ;;  %v3783_v9 = vld [vmem:[%s5186_s9 + $0x480] sm:$0xff]  ;;  %v3840_v47 = vld [vmem:[%s5186_s9 + $0x548] sm:$0xff]  ;;  %v3785_v48 = vld [vmem:[%s5186_s9 + $0x490] sm:$0xff] }
  0xc6   : > { %v860_v2 = vadd.f32 %v859_v45, %v829_v28  ;;  %v1142_v44 = vmul.f32 %v1110_v58, %v1110_v58  ;;  %v1171_v12 = vadd.f32 %v1170_v34, %v1140_v61  ;;  %v831_v62 = vmul.f32 %v5721_v6, %v5721_v6  ;;  %v3782_v58 = vld [vmem:[%s5186_s9 + $0x478] sm:$0xff]  ;;  %v3815_v45 = vld [vmem:[%s5192_s27 + $0x480] sm:$0xff] }
  0xc7   : > { %v956_v16 = vsub.f32 %v3781_v23, %v3813_v37  ;;  %v987_v10 = vmul.f32 %v955_v20, %v955_v20  ;;  %v1017_v15 = vadd.f32 %v1016_v59, %v986_v55  ;;  %v546_v53 = vadd.f32 %v545_v19, %v5491_v31  ;;  %v3814_v6 = vld [vmem:[%s5192_s27 + $0x478] sm:$0xff]  ;;  %v3816_v55 = vld [vmem:[%s5192_s27 + $0x488] sm:$0xff]  ;;  %v3817_v59 = vld [vmem:[%s5192_s27 + $0x490] sm:$0xff] }
  0xc8   : > { %v5796_v36 = vmul.f32 %v5728_v14, %v5728_v14  ;;  %v5800_v50 = vmul.f32 %v5730_v52, %v5730_v52  ;;  %v1172_v42 = vadd.f32 %v1171_v12, %v1141_v3  ;;  %v703_v40 = vadd.f32 %v702_v30, %v5644_v41  ;;  %v3872_v41 = vld [vmem:[%s5192_s27 + $0x548] sm:$0xff]  ;;  %v3895_v49 = vld [vmem:[%s5186_s9 + $0x600] sm:$0xff]  ;;  %v3786_v23 = vld [vmem:[%s5186_s9 + $0x498] sm:$0xff] }
  0xc9   : > { %v5807_v39 = vmul.f32 %v5737_v11, %v5737_v11  ;;  %v1112_v31 = vsub.f32 %v3839_v29, %v3871_v63  ;;  %v1143_v22 = vmul.f32 %v1111_v56, %v1111_v56  ;;  %v5811_v14 = vmul.f32 %v5740_v43, %v5740_v43  ;;  %v3784_v43 = vld [vmem:[%s5186_s9 + $0x488] sm:$0xff]  ;;  %v3927_v34 = vld [vmem:[%s5192_s27 + $0x600] sm:$0xff]  ;;  %v3789_v29 = vld [vmem:[%s5186_s9 + $0x4b0] sm:$0xff] }
  0xca   : > { %v5815_v52 = vmul.f32 %v5751_v57, %v5751_v57  ;;  %v861_v17 = vadd.f32 %v860_v2, %v830_v8  ;;  %v1173_v28 = vadd.f32 %v1172_v42, %v1142_v44  ;;  %v5822_v11 = vmul.f32 %v5753_v35, %v5753_v35  ;;  %v3788_v2 = vld [vmem:[%s5186_s9 + $0x4a8] sm:$0xff]  ;;  %v3818_v63 = vld [vmem:[%s5192_s27 + $0x498] sm:$0xff]  ;;  %v3841_v44 = vld [vmem:[%s5186_s9 + $0x550] sm:$0xff] }
  0xcb   : > { %v957_v51 = vsub.f32 %v3782_v58, %v3814_v6  ;;  %v988_v57 = vmul.f32 %v956_v16, %v956_v16  ;;  %v1018_v18 = vadd.f32 %v1017_v15, %v987_v10  ;;  %v547_v61 = vadd.f32 %v546_v53, %v5503_v54  ;;  %v3787_v54 = vld [vmem:[%s5186_s9 + $0x4a0] sm:$0xff]  ;;  %v3873_v12 = vld [vmem:[%s5192_s27 + $0x550] sm:$0xff]  ;;  %v3820_v42 = vld [vmem:[%s5192_s27 + $0x4a8] sm:$0xff] }
  0xcc   : > { %v5830_v21 = vmul.f32 %v5761_v7, %v5761_v7  ;;  %v5832_v20 = vmul.f32 %v807_v46, %v807_v46  ;;  %v5834_v35 = vmul.f32 %v808_v26, %v808_v26  ;;  %v704_v19 = vadd.f32 %v703_v40, %v5648_v33  ;;  %v3896_v46 = vld [vmem:[%s5186_s9 + $0x608] sm:$0xff]  ;;  %v3819_v16 = vld [vmem:[%s5192_s27 + $0x4a0] sm:$0xff]  ;;  %v3929_v58 = vld [vmem:[%s5192_s27 + $0x610] sm:$0xff] }
  0xcd   : > { %v1113_v37 = vsub.f32 %v3840_v47, %v3872_v41  ;;  %v1144_v7 = vmul.f32 %v1112_v31, %v1112_v31  ;;  %v1174_v3 = vadd.f32 %v1173_v28, %v1143_v22  ;;  %v3928_v26 = vld [vmem:[%s5192_s27 + $0x608] sm:$0xff]  ;;  %v5847_v30 = vmul.f32 %v5778_v25, %v5778_v25  ;;  %v3821_v40 = vld [vmem:[%s5192_s27 + $0x4b0] sm:$0xff]  ;;  %v3822_v47 = vld [vmem:[%s5192_s27 + $0x4b8] sm:$0xff] }
  0xce   : > { %v5849_v56 = vmul.f32 %v810_v1, %v810_v1  ;;  %v5851_v33 = vmul.f32 %v811_v0, %v811_v0  ;;  %v862_v8 = vadd.f32 %v861_v17, %v831_v62  ;;  %v958_v10 = vsub.f32 %v3783_v9, %v3815_v45  ;;  %v3897_v1 = vld [vmem:[%s5186_s9 + $0x610] sm:$0xff]  ;;  %v3790_v62 = vld [vmem:[%s5186_s9 + $0x4b8] sm:$0xff] }
  0xcf   : > { %v959_v15 = vsub.f32 %v3784_v43, %v3816_v55  ;;  %v989_v53 = vmul.f32 %v957_v51, %v957_v51  ;;  %v1019_v25 = vadd.f32 %v1018_v18, %v988_v57  ;;  %v8087_v0 = vld [vmem:[#allocation16_spill] sm:$0xff]  ;;  %v5865_v31 = vsub.f32 %v3785_v48, %v3817_v59  ;;  %v3898_v45 = vld [vmem:[%s5186_s9 + $0x618] sm:$0xff]  ;;  %v3791_v18 = vld [vmem:[%s5186_s9 + $0x4c0] sm:$0xff] }
  0xd0   : > { %8085 = vst [vmem:[#allocation12_spill] sm:$0xff] %v5849_v56  ;;  %8086 = vst [vmem:[#allocation13_spill] sm:$0xff] %v5851_v33  ;;  %v548_v6 = vadd.f32 %v547_v61, %v8087_v0  ;;  %v1266_v22 = vsub.f32 %v3895_v49, %v3927_v34  ;;  %v1267_v17 = vsub.f32 %v3896_v46, %v3928_v26  ;;  %v3930_v51 = vld [vmem:[%s5192_s27 + $0x618] sm:$0xff]  ;;  %v3792_v49 = vld [vmem:[%s5186_s9 + $0x4c8] sm:$0xff] }
  0xd1   : > { %v705_v9 = vadd.f32 %v704_v19, %v5655_v60  ;;  %v1114_v41 = vsub.f32 %v3841_v44, %v3873_v12  ;;  %v1145_v28 = vmul.f32 %v1113_v37, %v1113_v37  ;;  %v1175_v43 = vadd.f32 %v1174_v3, %v1144_v7  ;;  %v3842_v55 = vld [vmem:[%s5186_s9 + $0x558] sm:$0xff]  ;;  %v3793_v19 = vld [vmem:[%s5186_s9 + $0x4d0] sm:$0xff]  ;;  %v3823_v37 = vld [vmem:[%s5192_s27 + $0x4c0] sm:$0xff] }
  0xd2   : > { %v863_v57 = vadd.f32 %v862_v8, %v5796_v36  ;;  %v5873_v48 = vsub.f32 %v3786_v23, %v3818_v63  ;;  %v5875_v61 = vsub.f32 %v3787_v54, %v3819_v16  ;;  %v3874_v59 = vld [vmem:[%s5192_s27 + $0x558] sm:$0xff]  ;;  %v1268_v60 = vsub.f32 %v3897_v1, %v3929_v58  ;;  %v3824_v34 = vld [vmem:[%s5192_s27 + $0x4c8] sm:$0xff]  ;;  %v3899_v54 = vld [vmem:[%s5186_s9 + $0x620] sm:$0xff] }
  0xd3   : > { %v5882_v7 = vsub.f32 %v3788_v2, %v3820_v42  ;;  %v5884_v3 = vsub.f32 %v3789_v29, %v3821_v40  ;;  %v990_v36 = vmul.f32 %v958_v10, %v958_v10  ;;  %v1020_v46 = vadd.f32 %v1019_v25, %v989_v53  ;;  %v3931_v26 = vld [vmem:[%s5192_s27 + $0x620] sm:$0xff]  ;;  %v3794_v29 = vld [vmem:[%s5186_s9 + $0x4d8] sm:$0xff]  ;;  %v3825_v12 = vld [vmem:[%s5192_s27 + $0x4d0] sm:$0xff] }
  0xd4   : > { %v5887_v23 = vsub.f32 %v3790_v62, %v3822_v47  ;;  %v1269_v8 = vsub.f32 %v3898_v45, %v3930_v51  ;;  %v1298_v63 = vmul.f32 %v1266_v22, %v1266_v22  ;;  %v1299_v44 = vmul.f32 %v1267_v17, %v1267_v17  ;;  %v3826_v16 = vld [vmem:[%s5192_s27 + $0x4d8] sm:$0xff]  ;;  %v3795_v62 = vld [vmem:[%s5186_s9 + $0x4e0] sm:$0xff] }
  0xd5   : > { %v706_v2 = vadd.f32 %v705_v9, %v5662_v24  ;;  %v1115_v10 = vsub.f32 %v3842_v55, %v3874_v59  ;;  %v1146_v53 = vmul.f32 %v1114_v41, %v1114_v41  ;;  %v1176_v25 = vadd.f32 %v1175_v43, %v1145_v28  ;;  %v8088_v1 = vld [vmem:[#allocation17_spill] sm:$0xff]  ;;  %v3843_v40 = vld [vmem:[%s5186_s9 + $0x560] sm:$0xff]  ;;  %v3796_v24 = vld [vmem:[%s5186_s9 + $0x4e8] sm:$0xff] }
  0xd6   : > { %v549_v58 = vadd.f32 %v548_v6, %v8088_v1  ;;  %v864_v0 = vadd.f32 %v863_v57, %v5800_v50  ;;  %v966_v42 = vsub.f32 %v3791_v18, %v3823_v37  ;;  %v3875_v22 = vld [vmem:[%s5192_s27 + $0x560] sm:$0xff]  ;;  %v1300_v17 = vmul.f32 %v1268_v60, %v1268_v60  ;;  %v3797_v9 = vld [vmem:[%s5186_s9 + $0x4f0] sm:$0xff]  ;;  %v3798_v45 = vld [vmem:[%s5186_s9 + $0x4f8] sm:$0xff] }
  0xd7   : > { %v3827_v47 = vld [vmem:[%s5192_s27 + $0x4e0] sm:$0xff]  ;;  %v5903_v41 = vsub.f32 %v3792_v49, %v3824_v34  ;;  %v991_v28 = vmul.f32 %v959_v15, %v959_v15  ;;  %v1021_v43 = vadd.f32 %v1020_v46, %v990_v36  ;;  %v1270_v6 = vsub.f32 %v3899_v54, %v3931_v26  ;;  %v3900_v57 = vld [vmem:[%s5186_s9 + $0x628] sm:$0xff]  ;;  %v3829_v1 = vld [vmem:[%s5192_s27 + $0x4f0] sm:$0xff] }
  0xd8   : > { %v968_v50 = vsub.f32 %v3793_v19, %v3825_v12  ;;  %v969_v51 = vsub.f32 %v3794_v29, %v3826_v16  ;;  %v3932_v18 = vld [vmem:[%s5192_s27 + $0x628] sm:$0xff]  ;;  %v1301_v55 = vmul.f32 %v1269_v8, %v1269_v8  ;;  %v1330_v59 = vadd.f32 %v1299_v44, %v1298_v63  ;;  %v3830_v33 = vld [vmem:[%s5192_s27 + $0x4f8] sm:$0xff]  ;;  %v8089_v36 = vld [vmem:[#allocation18_spill] sm:$0xff] }
  0xd9   : > { %v707_v60 = vadd.f32 %v706_v2, %v5666_v32  ;;  %v3828_v37 = vld [vmem:[%s5192_s27 + $0x4e8] sm:$0xff]  ;;  %v1116_v56 = vsub.f32 %v3843_v40, %v3875_v22  ;;  %v1147_v49 = vmul.f32 %v1115_v10, %v1115_v10  ;;  %v1177_v15 = vadd.f32 %v1176_v25, %v1146_v53  ;;  %v3901_v10 = vld [vmem:[%s5186_s9 + $0x630] sm:$0xff] }
  0xda   : > { %v550_v46 = vadd.f32 %v549_v58, %v8089_v36  ;;  %v865_v19 = vadd.f32 %v864_v0, %v5807_v39  ;;  %v970_v34 = vsub.f32 %v3795_v62, %v3827_v47  ;;  %v3844_v54 = vld [vmem:[%s5186_s9 + $0x568] sm:$0xff]  ;;  %v1331_v29 = vadd.f32 %v1330_v59, %v1300_v17  ;;  %v3933_v53 = vld [vmem:[%s5192_s27 + $0x630] sm:$0xff]  ;;  %v3850_v36 = vld [vmem:[%s5186_s9 + $0x598] sm:$0xff] }
  0xdb   : > { %v3876_v26 = vld [vmem:[%s5192_s27 + $0x568] sm:$0xff]  ;;  %v992_v8 = vmul.f32 %v5865_v31, %v5865_v31  ;;  %v1022_v32 = vadd.f32 %v1021_v43, %v991_v28  ;;  %v1271_v63 = vsub.f32 %v3900_v57, %v3932_v18  ;;  %v1302_v44 = vmul.f32 %v1270_v6, %v1270_v6  ;;  %v3846_v28 = vld [vmem:[%s5186_s9 + $0x578] sm:$0xff]  ;;  %v3849_v57 = vld [vmem:[%s5186_s9 + $0x590] sm:$0xff] }
  0xdc   : > { %v971_v2 = vsub.f32 %v3796_v24, %v3828_v37  ;;  %v972_v12 = vsub.f32 %v3797_v9, %v3829_v1  ;;  %v973_v16 = vsub.f32 %v3798_v45, %v3830_v33  ;;  %v1332_v25 = vadd.f32 %v1331_v29, %v1301_v55  ;;  %v3902_v43 = vld [vmem:[%s5186_s9 + $0x638] sm:$0xff]  ;;  %v3847_v45 = vld [vmem:[%s5186_s9 + $0x580] sm:$0xff] }
  0xdd   : > { %v708_v39 = vadd.f32 %v707_v60, %v5676_v27  ;;  %v1117_v58 = vsub.f32 %v3844_v54, %v3876_v26  ;;  %v1148_v0 = vmul.f32 %v1116_v56, %v1116_v56  ;;  %v1178_v62 = vadd.f32 %v1177_v15, %v1147_v49  ;;  %v3845_v27 = vld [vmem:[%s5186_s9 + $0x570] sm:$0xff]  ;;  %v3934_v6 = vld [vmem:[%s5192_s27 + $0x638] sm:$0xff]  ;;  %v3879_v1 = vld [vmem:[%s5192_s27 + $0x580] sm:$0xff] }
  0xde   : > { %v5922_v31 = vadd.f32 %v550_v46, %v5781_v4  ;;  %v866_v40 = vadd.f32 %v865_v19, %v5811_v14  ;;  %v993_v22 = vmul.f32 %v5873_v48, %v5873_v48  ;;  %v994_v33 = vmul.f32 %v5875_v61, %v5875_v61  ;;  %v3877_v56 = vld [vmem:[%s5192_s27 + $0x570] sm:$0xff]  ;;  %v3880_v49 = vld [vmem:[%s5192_s27 + $0x588] sm:$0xff]  ;;  %v3851_v46 = vld [vmem:[%s5186_s9 + $0x5a0] sm:$0xff] }
  0xdf   : > { %v1023_v17 = vadd.f32 %v1022_v32, %v992_v8  ;;  %v1272_v24 = vsub.f32 %v3901_v10, %v3933_v53  ;;  %v1303_v9 = vmul.f32 %v1271_v63, %v1271_v63  ;;  %v1333_v47 = vadd.f32 %v1332_v25, %v1302_v44  ;;  %v3882_v19 = vld [vmem:[%s5192_s27 + $0x598] sm:$0xff]  ;;  %v3883_v54 = vld [vmem:[%s5192_s27 + $0x5a0] sm:$0xff]  ;;  %v3852_v63 = vld [vmem:[%s5186_s9 + $0x5a8] sm:$0xff] }
  0xe0   : > { %v5933_v4 = vmul.f32 %v5882_v7, %v5882_v7  ;;  %v5937_v14 = vmul.f32 %v5884_v3, %v5884_v3  ;;  %v5941_v48 = vmul.f32 %v5887_v23, %v5887_v23  ;;  %v5943_v61 = vmul.f32 %v966_v42, %v966_v42  ;;  %v3848_v3 = vld [vmem:[%s5186_s9 + $0x588] sm:$0xff]  ;;  %v3903_v44 = vld [vmem:[%s5186_s9 + $0x640] sm:$0xff] }
  0xe1   : > { %v709_v7 = vadd.f32 %v708_v39, %v5680_v38  ;;  %v1118_v23 = vsub.f32 %v3845_v27, %v3877_v56  ;;  %v1149_v18 = vmul.f32 %v1117_v58, %v1117_v58  ;;  %v1179_v55 = vadd.f32 %v1178_v62, %v1148_v0  ;;  %v3878_v38 = vld [vmem:[%s5192_s27 + $0x578] sm:$0xff]  ;;  %v3935_v10 = vld [vmem:[%s5192_s27 + $0x640] sm:$0xff]  ;;  %v3853_v39 = vld [vmem:[%s5186_s9 + $0x5b0] sm:$0xff] }
  0xe2   : > { %v867_v42 = vadd.f32 %v866_v40, %v5815_v52  ;;  %v5955_v59 = vmul.f32 %v5903_v41, %v5903_v41  ;;  %v5957_v60 = vmul.f32 %v968_v50, %v968_v50  ;;  %v5959_v37 = vmul.f32 %v969_v51, %v969_v51  ;;  %v3881_v52 = vld [vmem:[%s5192_s27 + $0x590] sm:$0xff]  ;;  %v3959_v53 = vld [vmem:[%s5186_s9 + $0x700] sm:$0xff]  ;;  %v3992_v62 = vld [vmem:[%s5192_s27 + $0x708] sm:$0xff] }
  0xe3   : > { %v1024_v15 = vadd.f32 %v1023_v17, %v993_v22  ;;  %v1273_v41 = vsub.f32 %v3902_v43, %v3934_v6  ;;  %v1304_v50 = vmul.f32 %v1272_v24, %v1272_v24  ;;  %v1334_v51 = vadd.f32 %v1333_v47, %v1303_v9  ;;  %v3991_v0 = vld [vmem:[%s5192_s27 + $0x700] sm:$0xff]  ;;  %v3854_v40 = vld [vmem:[%s5186_s9 + $0x5b8] sm:$0xff]  ;;  %v3884_v27 = vld [vmem:[%s5192_s27 + $0x5a8] sm:$0xff] }
  0xe4   : > { %v5969_v26 = vmul.f32 %v970_v34, %v970_v34  ;;  %v5971_v29 = vmul.f32 %v971_v2, %v971_v2  ;;  %v5973_v8 = vmul.f32 %v972_v12, %v972_v12  ;;  %v5975_v32 = vmul.f32 %v973_v16, %v973_v16  ;;  %v3960_v12 = vld [vmem:[%s5186_s9 + $0x708] sm:$0xff]  ;;  %v3855_v22 = vld [vmem:[%s5186_s9 + $0x5c0] sm:$0xff]  ;;  %v3885_v47 = vld [vmem:[%s5192_s27 + $0x5b0] sm:$0xff] }
  0xe5   : > { %v710_v25 = vadd.f32 %v709_v7, %v5689_v13  ;;  %v1119_v34 = vsub.f32 %v3846_v28, %v3878_v38  ;;  %v1150_v2 = vmul.f32 %v1118_v23, %v1118_v23  ;;  %v1180_v58 = vadd.f32 %v1179_v55, %v1149_v18  ;;  %v3856_v9 = vld [vmem:[%s5186_s9 + $0x5c8] sm:$0xff]  ;;  %v3886_v28 = vld [vmem:[%s5192_s27 + $0x5b8] sm:$0xff]  ;;  %v3887_v43 = vld [vmem:[%s5192_s27 + $0x5c0] sm:$0xff] }
  0xe6   : > { %v868_v16 = vadd.f32 %v867_v42, %v5822_v11  ;;  %v1120_v13 = vsub.f32 %v3847_v45, %v3879_v1  ;;  %v5990_v56 = vsub.f32 %v3848_v3, %v3880_v49  ;;  %v5992_v17 = vsub.f32 %v3849_v57, %v3881_v52  ;;  %v3857_v23 = vld [vmem:[%s5186_s9 + $0x5d0] sm:$0xff]  ;;  %v3936_v3 = vld [vmem:[%s5192_s27 + $0x648] sm:$0xff]  ;;  %v3858_v38 = vld [vmem:[%s5186_s9 + $0x5d8] sm:$0xff] }
  0xe7   : > { %v1025_v24 = vadd.f32 %v1024_v15, %v994_v33  ;;  %v1274_v6 = vsub.f32 %v3903_v44, %v3935_v10  ;;  %v1305_v11 = vmul.f32 %v1273_v41, %v1273_v41  ;;  %v1335_v7 = vadd.f32 %v1334_v51, %v1304_v50  ;;  %v3904_v33 = vld [vmem:[%s5186_s9 + $0x648] sm:$0xff]  ;;  %v3961_v52 = vld [vmem:[%s5186_s9 + $0x710] sm:$0xff] }
  0xe8   : > { %v5999_v18 = vsub.f32 %v3850_v36, %v3882_v19  ;;  %v6001_v45 = vsub.f32 %v3851_v46, %v3883_v54  ;;  %v1428_v57 = vsub.f32 %v3959_v53, %v3991_v0  ;;  %v1429_v55 = vsub.f32 %v3960_v12, %v3992_v62  ;;  %v3888_v1 = vld [vmem:[%s5192_s27 + $0x5c8] sm:$0xff]  ;;  %v3993_v46 = vld [vmem:[%s5192_s27 + $0x710] sm:$0xff]  ;;  %v3859_v54 = vld [vmem:[%s5186_s9 + $0x5e0] sm:$0xff] }
  0xe9   : > { %v711_v42 = vadd.f32 %v710_v25, %v5693_v5  ;;  %v6008_v49 = vsub.f32 %v3852_v63, %v3884_v27  ;;  %v1151_v15 = vmul.f32 %v1119_v34, %v1119_v34  ;;  %v1181_v36 = vadd.f32 %v1180_v58, %v1150_v2  ;;  %v3860_v41 = vld [vmem:[%s5186_s9 + $0x5e8] sm:$0xff]  ;;  %v3889_v50 = vld [vmem:[%s5192_s27 + $0x5d0] sm:$0xff]  ;;  %v3890_v63 = vld [vmem:[%s5192_s27 + $0x5d8] sm:$0xff] }
  0xea   : > { %v869_v19 = vadd.f32 %v868_v16, %v5830_v21  ;;  %v1126_v5 = vsub.f32 %v3853_v39, %v3885_v47  ;;  %v1127_v51 = vsub.f32 %v3854_v40, %v3886_v28  ;;  %v1128_v44 = vsub.f32 %v3855_v22, %v3887_v43  ;;  %v3891_v53 = vld [vmem:[%s5192_s27 + $0x5e0] sm:$0xff]  ;;  %v3892_v25 = vld [vmem:[%s5192_s27 + $0x5e8] sm:$0xff]  ;;  %v3861_v21 = vld [vmem:[%s5186_s9 + $0x5f0] sm:$0xff] }
  0xeb   : > { %v1026_v10 = vadd.f32 %v1025_v24, %v5933_v4  ;;  %v1275_v34 = vsub.f32 %v3904_v33, %v3936_v3  ;;  %v1306_v2 = vmul.f32 %v1274_v6, %v1274_v6  ;;  %v1336_v58 = vadd.f32 %v1335_v7, %v1305_v11  ;;  %v3905_v0 = vld [vmem:[%s5186_s9 + $0x650] sm:$0xff]  ;;  %v8090_v22 = vld [vmem:[#allocation11_spill] sm:$0xff]  ;;  %v3962_v43 = vld [vmem:[%s5186_s9 + $0x718] sm:$0xff] }
  0xec   : > { %v1129_v12 = vsub.f32 %v3856_v9, %v3888_v1  ;;  %v3937_v62 = vld [vmem:[%s5192_s27 + $0x650] sm:$0xff]  ;;  %v1430_v39 = vsub.f32 %v3961_v52, %v3993_v46  ;;  %v1460_v16 = vmul.f32 %v1428_v57, %v1428_v57  ;;  %v1461_v40 = vmul.f32 %v1429_v55, %v1429_v55  ;;  %v3994_v6 = vld [vmem:[%s5192_s27 + $0x718] sm:$0xff] }
  0xed   : > { %v712_v27 = vadd.f32 %v711_v42, %v8090_v22  ;;  %v3893_v4 = vld [vmem:[%s5192_s27 + $0x5f0] sm:$0xff]  ;;  %v1130_v24 = vsub.f32 %v3857_v23, %v3889_v50  ;;  %v1152_v47 = vmul.f32 %v1120_v13, %v1120_v13  ;;  %v1182_v28 = vadd.f32 %v1181_v36, %v1151_v15  ;;  %v3862_v7 = vld [vmem:[%s5186_s9 + $0x5f8] sm:$0xff] }
  0xee   : > { %v870_v11 = vadd.f32 %v869_v19, %v5832_v20  ;;  %v3894_v33 = vld [vmem:[%s5192_s27 + $0x5f8] sm:$0xff]  ;;  %v1131_v9 = vsub.f32 %v3858_v38, %v3890_v63  ;;  %v1132_v3 = vsub.f32 %v3859_v54, %v3891_v53  ;;  %v1133_v1 = vsub.f32 %v3860_v41, %v3892_v25  ;;  %v3995_v41 = vld [vmem:[%s5192_s27 + $0x720] sm:$0xff] }
  0xef   : > { %v1027_v57 = vadd.f32 %v1026_v10, %v5937_v14  ;;  %v1276_v55 = vsub.f32 %v3905_v0, %v3937_v62  ;;  %v1307_v42 = vmul.f32 %v1275_v34, %v1275_v34  ;;  %v1337_v23 = vadd.f32 %v1336_v58, %v1306_v2  ;;  %v3906_v13 = vld [vmem:[%s5186_s9 + $0x658] sm:$0xff]  ;;  %v3963_v14 = vld [vmem:[%s5186_s9 + $0x720] sm:$0xff] }
  0xf0   : > { %v1134_v52 = vsub.f32 %v3861_v21, %v3893_v4  ;;  %v3938_v46 = vld [vmem:[%s5192_s27 + $0x658] sm:$0xff]  ;;  %v1431_v15 = vsub.f32 %v3962_v43, %v3994_v6  ;;  %v1462_v36 = vmul.f32 %v1430_v39, %v1430_v39  ;;  %v1492_v50 = vadd.f32 %v1461_v40, %v1460_v16  ;;  %v3908_v39 = vld [vmem:[%s5186_s9 + $0x668] sm:$0xff] }
  0xf1   : > { %v6034_v20 = vadd.f32 %v712_v27, %v5922_v31  ;;  %v1135_v38 = vsub.f32 %v3862_v7, %v3894_v33  ;;  %v1153_v19 = vmul.f32 %v5990_v56, %v5990_v56  ;;  %v1183_v54 = vadd.f32 %v1182_v28, %v1152_v47  ;;  %v3964_v16 = vld [vmem:[%s5186_s9 + $0x728] sm:$0xff]  ;;  %v3911_v47 = vld [vmem:[%s5186_s9 + $0x680] sm:$0xff]  ;;  %v3942_v7 = vld [vmem:[%s5192_s27 + $0x678] sm:$0xff] }
  0xf2   : > { %v871_v10 = vadd.f32 %v870_v11, %v5834_v35  ;;  %v1154_v63 = vmul.f32 %v5992_v17, %v5992_v17  ;;  %v6045_v53 = vmul.f32 %v5999_v18, %v5999_v18  ;;  %v6049_v31 = vmul.f32 %v6001_v45, %v6001_v45  ;;  %v3907_v17 = vld [vmem:[%s5186_s9 + $0x660] sm:$0xff]  ;;  %v3996_v40 = vld [vmem:[%s5192_s27 + $0x728] sm:$0xff]  ;;  %v3941_v11 = vld [vmem:[%s5192_s27 + $0x670] sm:$0xff] }
  0xf3   : > { %v1028_v56 = vadd.f32 %v1027_v57, %v5941_v48  ;;  %v1277_v25 = vsub.f32 %v3906_v13, %v3938_v46  ;;  %v1308_v34 = vmul.f32 %v1276_v55, %v1276_v55  ;;  %v1338_v2 = vadd.f32 %v1337_v23, %v1307_v42  ;;  %v3939_v18 = vld [vmem:[%s5192_s27 + $0x660] sm:$0xff]  ;;  %v3912_v43 = vld [vmem:[%s5186_s9 + $0x688] sm:$0xff]  ;;  %v3914_v57 = vld [vmem:[%s5186_s9 + $0x698] sm:$0xff] }
  0xf4   : > { %v6054_v35 = vmul.f32 %v6008_v49, %v6008_v49  ;;  %v1432_v58 = vsub.f32 %v3963_v14, %v3995_v41  ;;  %v1463_v21 = vmul.f32 %v1431_v15, %v1431_v15  ;;  %v1493_v45 = vadd.f32 %v1492_v50, %v1462_v36  ;;  %v3940_v6 = vld [vmem:[%s5192_s27 + $0x668] sm:$0xff]  ;;  %v3915_v55 = vld [vmem:[%s5186_s9 + $0x6a0] sm:$0xff]  ;;  %v3965_v41 = vld [vmem:[%s5186_s9 + $0x730] sm:$0xff] }
  0xf5   : > { %v6058_v0 = vmul.f32 %v1126_v5, %v1126_v5  ;;  %v6060_v48 = vmul.f32 %v1127_v51, %v1127_v51  ;;  %v6062_v62 = vmul.f32 %v1128_v44, %v1128_v44  ;;  %v1184_v49 = vadd.f32 %v1183_v54, %v1153_v19  ;;  %v3909_v51 = vld [vmem:[%s5186_s9 + $0x670] sm:$0xff]  ;;  %v3910_v44 = vld [vmem:[%s5186_s9 + $0x678] sm:$0xff]  ;;  %v3916_v50 = vld [vmem:[%s5186_s9 + $0x6a8] sm:$0xff] }
  0xf6   : > { %v872_v22 = vadd.f32 %v871_v10, %v5847_v30  ;;  %v6068_v27 = vmul.f32 %v1129_v12, %v1129_v12  ;;  %v6070_v4 = vmul.f32 %v1130_v24, %v1130_v24  ;;  %v6072_v5 = vmul.f32 %v1131_v9, %v1131_v9  ;;  %v3913_v9 = vld [vmem:[%s5186_s9 + $0x690] sm:$0xff]  ;;  %v3918_v54 = vld [vmem:[%s5186_s9 + $0x6b8] sm:$0xff]  ;;  %v3944_v14 = vld [vmem:[%s5192_s27 + $0x688] sm:$0xff] }
  0xf7   : > { %v1029_v28 = vadd.f32 %v1028_v56, %v5943_v61  ;;  %v1278_v30 = vsub.f32 %v3907_v17, %v3939_v18  ;;  %v1309_v12 = vmul.f32 %v1277_v25, %v1277_v25  ;;  %v1339_v24 = vadd.f32 %v1338_v2, %v1308_v34  ;;  %v3943_v61 = vld [vmem:[%s5192_s27 + $0x680] sm:$0xff]  ;;  %v3917_v19 = vld [vmem:[%s5186_s9 + $0x6b0] sm:$0xff] }
  0xf8   : > { %8091 = vst [vmem:[#allocation14_spill] sm:$0xff] %v6070_v4  ;;  %8092 = vst [vmem:[#allocation15_spill] sm:$0xff] %v6072_v5  ;;  %v6082_v33 = vmul.f32 %v1132_v3, %v1132_v3  ;;  %v1433_v42 = vsub.f32 %v3964_v16, %v3996_v40  ;;  %v1464_v23 = vmul.f32 %v1432_v58, %v1432_v58  ;;  %v3997_v10 = vld [vmem:[%s5192_s27 + $0x730] sm:$0xff]  ;;  %v3920_v58 = vld [vmem:[%s5186_s9 + $0x6c8] sm:$0xff] }
  0xf9   : > { %v1494_v13 = vadd.f32 %v1493_v45, %v1463_v21  ;;  %v6088_v46 = vmul.f32 %v1133_v1, %v1133_v1  ;;  %v6090_v15 = vmul.f32 %v1134_v52, %v1134_v52  ;;  %v6092_v36 = vmul.f32 %v1135_v38, %v1135_v38  ;;  %v8097_v56 = vld [vmem:[#allocation12_spill] sm:$0xff]  ;;  %v3919_v1 = vld [vmem:[%s5186_s9 + $0x6c0] sm:$0xff]  ;;  %v3946_v38 = vld [vmem:[%s5192_s27 + $0x698] sm:$0xff] }
  0xfa   : > { %8093 = vst [vmem:[#allocation16_spill] sm:$0xff] %v6082_v33  ;;  %v1185_v3 = vadd.f32 %v1184_v49, %v1154_v63  ;;  %v873_v25 = vadd.f32 %v872_v22, %v8097_v56  ;;  %v3945_v52 = vld [vmem:[%s5192_s27 + $0x690] sm:$0xff]  ;;  %v3947_v63 = vld [vmem:[%s5192_s27 + $0x6a0] sm:$0xff]  ;;  %v1279_v34 = vsub.f32 %v3908_v39, %v3940_v6  ;;  %v1280_v2 = vsub.f32 %v3909_v51, %v3941_v11  ;;  %v3948_v21 = vld [vmem:[%s5192_s27 + $0x6a8] sm:$0xff] }
  0xfb   : > { %8094 = vst [vmem:[#allocation17_spill] sm:$0xff] %v6088_v46  ;;  %8095 = vst [vmem:[#allocation18_spill] sm:$0xff] %v6090_v15  ;;  %v1281_v17 = vsub.f32 %v3910_v44, %v3942_v7  ;;  %v1030_v18 = vadd.f32 %v1029_v28, %v5955_v59  ;;  %v3949_v45 = vld [vmem:[%s5192_s27 + $0x6b0] sm:$0xff]  ;;  %v3950_v49 = vld [vmem:[%s5192_s27 + $0x6b8] sm:$0xff]  ;;  %v1282_v16 = vsub.f32 %v3911_v47, %v3943_v61 }
  0xfc   : > { %8096 = vst [vmem:[#allocation11_spill] sm:$0xff] %v6092_v36  ;;  %v1310_v40 = vmul.f32 %v1278_v30, %v1278_v30  ;;  %v1340_v22 = vadd.f32 %v1339_v24, %v1309_v12  ;;  %v3921_v56 = vld [vmem:[%s5186_s9 + $0x6d0] sm:$0xff]  ;;  %v3922_v36 = vld [vmem:[%s5186_s9 + $0x6d8] sm:$0xff]  ;;  %v3923_v39 = vld [vmem:[%s5186_s9 + $0x6e0] sm:$0xff]  ;;  %v1283_v44 = vsub.f32 %v3912_v43, %v3944_v14  ;;  %v1434_v59 = vsub.f32 %v3965_v41, %v3997_v10 }
  0xfd   : > { %v3951_v51 = vld [vmem:[%s5192_s27 + $0x6c0] sm:$0xff]  ;;  %v1465_v28 = vmul.f32 %v1433_v42, %v1433_v42  ;;  %v1495_v6 = vadd.f32 %v1494_v13, %v1464_v23  ;;  %v1186_v11 = vadd.f32 %v1185_v3, %v6045_v53  ;;  %v3924_v7 = vld [vmem:[%s5186_s9 + $0x6e8] sm:$0xff]  ;;  %v3925_v15 = vld [vmem:[%s5186_s9 + $0x6f0] sm:$0xff]  ;;  %v1284_v12 = vsub.f32 %v3913_v9, %v3945_v52 }
  0xfe   : > { %v3926_v47 = vld [vmem:[%s5186_s9 + $0x6f8] sm:$0xff]  ;;  %v3952_v30 = vld [vmem:[%s5192_s27 + $0x6c8] sm:$0xff]  ;;  %v1285_v24 = vsub.f32 %v3914_v57, %v3946_v38  ;;  %v1286_v61 = vsub.f32 %v3915_v55, %v3947_v63  ;;  %v3953_v41 = vld [vmem:[%s5192_s27 + $0x6d0] sm:$0xff]  ;;  %v1287_v23 = vsub.f32 %v3916_v50, %v3948_v21  ;;  %v1288_v13 = vsub.f32 %v3917_v19, %v3949_v45 }
  0xff   : > { %v3966_v46 = vld [vmem:[%s5186_s9 + $0x738] sm:$0xff]  ;;  %v3955_v42 = vld [vmem:[%s5192_s27 + $0x6e0] sm:$0xff]  ;;  %v1289_v53 = vsub.f32 %v3918_v54, %v3950_v49  ;;  %v1031_v3 = vadd.f32 %v1030_v18, %v5957_v60  ;;  %v3956_v5 = vld [vmem:[%s5192_s27 + $0x6e8] sm:$0xff]  ;;  %v1290_v57 = vsub.f32 %v3919_v1, %v3951_v51  ;;  %v1311_v55 = vmul.f32 %v1279_v34, %v1279_v34 }
 0x100   : > { %v3998_v33 = vld [vmem:[%s5192_s27 + $0x738] sm:$0xff]  ;;  %v3957_v4 = vld [vmem:[%s5192_s27 + $0x6f0] sm:$0xff]  ;;  %v1341_v52 = vadd.f32 %v1340_v22, %v1310_v40  ;;  %v1291_v38 = vsub.f32 %v3920_v58, %v3952_v30  ;;  %v1466_v63 = vmul.f32 %v1434_v59, %v1434_v59  ;;  %v1496_v50 = vadd.f32 %v1495_v6, %v1465_v28  ;;  %v3967_v18 = vld [vmem:[%s5186_s9 + $0x740] sm:$0xff] }
 0x101   : > { %v8098_v43 = vld [vmem:[#allocation13_spill] sm:$0xff]  ;;  %v1187_v19 = vadd.f32 %v1186_v11, %v6049_v31  ;;  %v1292_v54 = vsub.f32 %v3921_v56, %v3953_v41  ;;  %v1294_v60 = vsub.f32 %v3923_v39, %v3955_v42  ;;  %v3999_v45 = vld [vmem:[%s5192_s27 + $0x740] sm:$0xff]  ;;  %v1295_v1 = vsub.f32 %v3924_v7, %v3956_v5  ;;  %v4056_v40 = vld [vmem:[%s5192_s27 + $0x808] sm:$0xff] }
 0x102   : > { %v874_v14 = vadd.f32 %v873_v25, %v8098_v43  ;;  %v3954_v10 = vld [vmem:[%s5192_s27 + $0x6d8] sm:$0xff]  ;;  %v1435_v25 = vsub.f32 %v3966_v46, %v3998_v33  ;;  %v4023_v49 = vld [vmem:[%s5186_s9 + $0x800] sm:$0xff]  ;;  %v1296_v34 = vsub.f32 %v3925_v15, %v3957_v4  ;;  %v4024_v33 = vld [vmem:[%s5186_s9 + $0x808] sm:$0xff]  ;;  %v1032_v22 = vadd.f32 %v1031_v3, %v5959_v37 }
 0x103   : > { %v3958_v9 = vld [vmem:[%s5192_s27 + $0x6f8] sm:$0xff]  ;;  %v1293_v21 = vsub.f32 %v3922_v36, %v3954_v10  ;;  %v4055_v46 = vld [vmem:[%s5192_s27 + $0x800] sm:$0xff]  ;;  %v1312_v31 = vmul.f32 %v1280_v2, %v1280_v2  ;;  %v1313_v56 = vmul.f32 %v1281_v17, %v1281_v17  ;;  %v1342_v36 = vadd.f32 %v1341_v52, %v1311_v55  ;;  %v3968_v15 = vld [vmem:[%s5186_s9 + $0x748] sm:$0xff] }
 0x104   : > { %v6134_v43 = vadd.f32 %v874_v14, %v6034_v20  ;;  %v1297_v58 = vsub.f32 %v3926_v47, %v3958_v9  ;;  %v6140_v39 = vmul.f32 %v1282_v16, %v1282_v16  ;;  %v1436_v51 = vsub.f32 %v3967_v18, %v3999_v45  ;;  %v4000_v28 = vld [vmem:[%s5192_s27 + $0x748] sm:$0xff]  ;;  %v3973_v3 = vld [vmem:[%s5186_s9 + $0x770] sm:$0xff]  ;;  %v4002_v18 = vld [vmem:[%s5192_s27 + $0x758] sm:$0xff] }
 0x105   : > { %v1467_v20 = vmul.f32 %v1435_v25, %v1435_v25  ;;  %v1497_v59 = vadd.f32 %v1496_v50, %v1466_v63  ;;  %v1188_v5 = vadd.f32 %v1187_v19, %v6054_v35  ;;  %v6143_v4 = vmul.f32 %v1283_v44, %v1283_v44  ;;  %v4025_v35 = vld [vmem:[%s5186_s9 + $0x810] sm:$0xff]  ;;  %v3974_v50 = vld [vmem:[%s5186_s9 + $0x778] sm:$0xff]  ;;  %v3975_v19 = vld [vmem:[%s5186_s9 + $0x780] sm:$0xff] }
 0x106   : > { %v1590_v6 = vsub.f32 %v4023_v49, %v4055_v46  ;;  %v1591_v11 = vsub.f32 %v4024_v33, %v4056_v40  ;;  %v6147_v37 = vmul.f32 %v1284_v12, %v1284_v12  ;;  %v6149_v2 = vmul.f32 %v1285_v24, %v1285_v24  ;;  %v4057_v44 = vld [vmem:[%s5192_s27 + $0x810] sm:$0xff]  ;;  %v4026_v45 = vld [vmem:[%s5186_s9 + $0x818] sm:$0xff]  ;;  %v4003_v46 = vld [vmem:[%s5192_s27 + $0x760] sm:$0xff] }
 0x107   : > { %v6151_v17 = vmul.f32 %v1286_v61, %v1286_v61  ;;  %v6153_v16 = vmul.f32 %v1287_v23, %v1287_v23  ;;  %v1033_v7 = vadd.f32 %v1032_v22, %v5969_v26  ;;  %v6158_v47 = vmul.f32 %v1288_v13, %v1288_v13  ;;  %v3969_v24 = vld [vmem:[%s5186_s9 + $0x750] sm:$0xff]  ;;  %v3970_v23 = vld [vmem:[%s5186_s9 + $0x758] sm:$0xff]  ;;  %v3971_v26 = vld [vmem:[%s5186_s9 + $0x760] sm:$0xff] }
 0x108   : > { %v6160_v30 = vmul.f32 %v1289_v53, %v1289_v53  ;;  %v1343_v12 = vadd.f32 %v1342_v36, %v1312_v31  ;;  %v6162_v14 = vmul.f32 %v1290_v57, %v1290_v57  ;;  %v1437_v41 = vsub.f32 %v3968_v15, %v4000_v28  ;;  %v3972_v13 = vld [vmem:[%s5186_s9 + $0x768] sm:$0xff]  ;;  %v4001_v53 = vld [vmem:[%s5192_s27 + $0x750] sm:$0xff]  ;;  %v4058_v49 = vld [vmem:[%s5192_s27 + $0x818] sm:$0xff] }
 0x109   : > { %v1468_v61 = vmul.f32 %v1436_v51, %v1436_v51  ;;  %v1498_v10 = vadd.f32 %v1497_v59, %v1467_v20  ;;  %v1189_v42 = vadd.f32 %v1188_v5, %v6058_v0  ;;  %v1592_v9 = vsub.f32 %v4025_v35, %v4057_v44  ;;  %v4004_v40 = vld [vmem:[%s5192_s27 + $0x768] sm:$0xff]  ;;  %v4005_v22 = vld [vmem:[%s5192_s27 + $0x770] sm:$0xff]  ;;  %v3978_v59 = vld [vmem:[%s5186_s9 + $0x798] sm:$0xff] }
 0x10a   : > { %v1622_v57 = vmul.f32 %v1590_v6, %v1590_v6  ;;  %v1623_v55 = vmul.f32 %v1591_v11, %v1591_v11  ;;  %v6171_v52 = vmul.f32 %v1291_v38, %v1291_v38  ;;  %v6173_v25 = vmul.f32 %v1292_v54, %v1292_v54  ;;  %v3977_v36 = vld [vmem:[%s5186_s9 + $0x790] sm:$0xff]  ;;  %v3979_v5 = vld [vmem:[%s5186_s9 + $0x7a0] sm:$0xff]  ;;  %v3980_v15 = vld [vmem:[%s5186_s9 + $0x7a8] sm:$0xff] }
 0x10b   : > { %v6175_v63 = vmul.f32 %v1293_v21, %v1293_v21  ;;  %v6177_v0 = vmul.f32 %v1294_v60, %v1294_v60  ;;  %v1034_v33 = vadd.f32 %v1033_v7, %v5971_v29  ;;  %v6185_v38 = vmul.f32 %v1295_v1, %v1295_v1  ;;  %v3976_v60 = vld [vmem:[%s5186_s9 + $0x788] sm:$0xff]  ;;  %v4006_v29 = vld [vmem:[%s5192_s27 + $0x778] sm:$0xff]  ;;  %v4007_v1 = vld [vmem:[%s5192_s27 + $0x780] sm:$0xff] }
 0x10c   : > { %v6187_v54 = vmul.f32 %v1296_v34, %v1296_v34  ;;  %v1344_v21 = vadd.f32 %v1343_v12, %v1313_v56  ;;  %v6193_v31 = vmul.f32 %v1297_v58, %v1297_v58  ;;  %v1438_v51 = vsub.f32 %v3969_v24, %v4001_v53  ;;  %v3981_v28 = vld [vmem:[%s5186_s9 + $0x7b0] sm:$0xff]  ;;  %v4008_v6 = vld [vmem:[%s5192_s27 + $0x788] sm:$0xff]  ;;  %v3982_v7 = vld [vmem:[%s5186_s9 + $0x7b8] sm:$0xff] }
 0x10d   : > { %8099 = vst [vmem:[#allocation12_spill] sm:$0xff] %v6177_v0  ;;  %8100 = vst [vmem:[#allocation13_spill] sm:$0xff] %v6185_v38  ;;  %v1469_v34 = vmul.f32 %v1437_v41, %v1437_v41  ;;  %v1499_v20 = vadd.f32 %v1498_v10, %v1468_v61  ;;  %v1190_v56 = vadd.f32 %v1189_v42, %v6060_v48  ;;  %v4009_v58 = vld [vmem:[%s5192_s27 + $0x790] sm:$0xff]  ;;  %v3983_v12 = vld [vmem:[%s5186_s9 + $0x7c0] sm:$0xff] }
 0x10e   : > { %8101 = vst [vmem:[#allocation19_spill] sm:$0xff] %v6187_v54  ;;  %8102 = vst [vmem:[#allocation20_spill] sm:$0xff] %v6193_v31  ;;  %v1593_v11 = vsub.f32 %v4026_v45, %v4058_v49  ;;  %v1624_v35 = vmul.f32 %v1592_v9, %v1592_v9  ;;  %v1654_v44 = vadd.f32 %v1623_v55, %v1622_v57  ;;  %v4010_v24 = vld [vmem:[%s5192_s27 + $0x798] sm:$0xff]  ;;  %v4027_v42 = vld [vmem:[%s5186_s9 + $0x820] sm:$0xff] }
 0x10f   : > { %v1439_v48 = vsub.f32 %v3970_v23, %v4002_v18  ;;  %v6208_v41 = vsub.f32 %v3971_v26, %v4003_v46  ;;  %v6210_v61 = vsub.f32 %v3972_v13, %v4004_v40  ;;  %v6212_v10 = vsub.f32 %v3973_v3, %v4005_v22  ;;  %v4059_v53 = vld [vmem:[%s5192_s27 + $0x820] sm:$0xff]  ;;  %v3984_v57 = vld [vmem:[%s5186_s9 + $0x7c8] sm:$0xff]  ;;  %v4013_v26 = vld [vmem:[%s5192_s27 + $0x7b0] sm:$0xff] }
 0x110   : > { %v1035_v45 = vadd.f32 %v1034_v33, %v5973_v8  ;;  %v1345_v9 = vadd.f32 %v1344_v21, %v6140_v39  ;;  %v4011_v55 = vld [vmem:[%s5192_s27 + $0x7a0] sm:$0xff]  ;;  %v4012_v23 = vld [vmem:[%s5192_s27 + $0x7a8] sm:$0xff]  ;;  %v6222_v13 = vsub.f32 %v3974_v50, %v4006_v29  ;;  %v6224_v3 = vsub.f32 %v3975_v19, %v4007_v1  ;;  %v3985_v18 = vld [vmem:[%s5186_s9 + $0x7d0] sm:$0xff] }
 0x111   : > { %v4014_v49 = vld [vmem:[%s5192_s27 + $0x7b8] sm:$0xff]  ;;  %v4015_v8 = vld [vmem:[%s5192_s27 + $0x7c0] sm:$0xff]  ;;  %v6229_v33 = vsub.f32 %v3976_v60, %v4008_v6  ;;  %v6231_v39 = vsub.f32 %v3977_v36, %v4009_v58  ;;  %v1470_v21 = vmul.f32 %v1438_v51, %v1438_v51  ;;  %v1500_v46 = vadd.f32 %v1499_v20, %v1469_v34  ;;  %v3988_v50 = vld [vmem:[%s5186_s9 + $0x7e8] sm:$0xff] }
 0x112   : > { %v1191_v40 = vadd.f32 %v1190_v56, %v6062_v62  ;;  %v3986_v22 = vld [vmem:[%s5186_s9 + $0x7d8] sm:$0xff]  ;;  %v3987_v31 = vld [vmem:[%s5186_s9 + $0x7e0] sm:$0xff]  ;;  %v3989_v19 = vld [vmem:[%s5186_s9 + $0x7f0] sm:$0xff]  ;;  %v1594_v54 = vsub.f32 %v4027_v42, %v4059_v53  ;;  %v1625_v60 = vmul.f32 %v1593_v11, %v1593_v11  ;;  %v1655_v36 = vadd.f32 %v1654_v44, %v1624_v35 }
 0x113   : > { %v4016_v29 = vld [vmem:[%s5192_s27 + $0x7c8] sm:$0xff]  ;;  %v4017_v1 = vld [vmem:[%s5192_s27 + $0x7d0] sm:$0xff]  ;;  %v4018_v51 = vld [vmem:[%s5192_s27 + $0x7d8] sm:$0xff]  ;;  %v1447_v34 = vsub.f32 %v3978_v59, %v4010_v24  ;;  %v6241_v20 = vsub.f32 %v3979_v5, %v4011_v55  ;;  %v6243_v62 = vsub.f32 %v3980_v15, %v4012_v23  ;;  %v6245_v56 = vsub.f32 %v3981_v28, %v4013_v26 }
 0x114   : > { %v4028_v6 = vld [vmem:[%s5186_s9 + $0x828] sm:$0xff]  ;;  %v1036_v38 = vadd.f32 %v1035_v45, %v5975_v32  ;;  %v1346_v0 = vadd.f32 %v1345_v9, %v6143_v4  ;;  %v4019_v42 = vld [vmem:[%s5192_s27 + $0x7e0] sm:$0xff]  ;;  %v4021_v35 = vld [vmem:[%s5192_s27 + $0x7f0] sm:$0xff]  ;;  %v6254_v59 = vsub.f32 %v3982_v7, %v4014_v49  ;;  %v6256_v5 = vsub.f32 %v3983_v12, %v4015_v8 }
 0x115   : > { %v4060_v58 = vld [vmem:[%s5192_s27 + $0x828] sm:$0xff]  ;;  %v3990_v15 = vld [vmem:[%s5186_s9 + $0x7f8] sm:$0xff]  ;;  %v6260_v44 = vsub.f32 %v3984_v57, %v4016_v29  ;;  %v6262_v24 = vsub.f32 %v3985_v18, %v4017_v1  ;;  %v1471_v32 = vmul.f32 %v1439_v48, %v1439_v48  ;;  %v1501_v4 = vadd.f32 %v1500_v46, %v1470_v21  ;;  %v4087_v53 = vld [vmem:[%s5186_s9 + $0x900] sm:$0xff] }
 0x116   : > { %v4020_v11 = vld [vmem:[%s5192_s27 + $0x7e8] sm:$0xff]  ;;  %v4022_v28 = vld [vmem:[%s5192_s27 + $0x7f8] sm:$0xff]  ;;  %v1192_v45 = vadd.f32 %v1191_v40, %v6068_v27  ;;  %v1595_v9 = vsub.f32 %v4028_v6, %v4060_v58  ;;  %v1626_v55 = vmul.f32 %v1594_v54, %v1594_v54  ;;  %v1656_v7 = vadd.f32 %v1655_v36, %v1625_v60  ;;  %v4119_v23 = vld [vmem:[%s5192_s27 + $0x900] sm:$0xff] }
 0x117   : > { %v4088_v12 = vld [vmem:[%s5186_s9 + $0x908] sm:$0xff]  ;;  %v6269_v49 = vsub.f32 %v3986_v22, %v4018_v51  ;;  %v6271_v57 = vsub.f32 %v3987_v31, %v4019_v42  ;;  %v6273_v18 = vsub.f32 %v3988_v50, %v4020_v11  ;;  %v6275_v8 = vsub.f32 %v3989_v19, %v4021_v35  ;;  %v4029_v48 = vld [vmem:[%s5186_s9 + $0x830] sm:$0xff]  ;;  %v8103_v60 = vld [vmem:[#allocation14_spill] sm:$0xff] }
 0x118   : > { %v4120_v26 = vld [vmem:[%s5192_s27 + $0x908] sm:$0xff]  ;;  %v4061_v21 = vld [vmem:[%s5192_s27 + $0x830] sm:$0xff]  ;;  %v6280_v27 = vadd.f32 %v1036_v38, %v6134_v43  ;;  %v1347_v54 = vadd.f32 %v1346_v0, %v6147_v37  ;;  %v6283_v46 = vsub.f32 %v3990_v15, %v4022_v28  ;;  %v1472_v40 = vmul.f32 %v6208_v41, %v6208_v41  ;;  %v4090_v36 = vld [vmem:[%s5186_s9 + $0x918] sm:$0xff] }
 0x119   : > { %v4089_v31 = vld [vmem:[%s5186_s9 + $0x910] sm:$0xff]  ;;  %v1473_v50 = vmul.f32 %v6210_v61, %v6210_v61  ;;  %v1502_v19 = vadd.f32 %v1501_v4, %v1471_v32  ;;  %v1752_v29 = vsub.f32 %v4087_v53, %v4119_v23  ;;  %v1753_v1 = vsub.f32 %v4088_v12, %v4120_v26  ;;  %v4122_v51 = vld [vmem:[%s5192_s27 + $0x918] sm:$0xff]  ;;  %v4123_v32 = vld [vmem:[%s5192_s27 + $0x920] sm:$0xff] }
 0x11a   : > { %v4121_v22 = vld [vmem:[%s5192_s27 + $0x910] sm:$0xff]  ;;  %v1193_v43 = vadd.f32 %v1192_v45, %v8103_v60  ;;  %v1596_v38 = vsub.f32 %v4029_v48, %v4061_v21  ;;  %v1627_v37 = vmul.f32 %v1595_v9, %v1595_v9  ;;  %v1657_v0 = vadd.f32 %v1656_v7, %v1626_v55  ;;  %v4030_v58 = vld [vmem:[%s5186_s9 + $0x838] sm:$0xff]  ;;  %v8104_v9 = vld [vmem:[#allocation15_spill] sm:$0xff] }
 0x11b   : > { %v6296_v41 = vmul.f32 %v6212_v10, %v6212_v10  ;;  %v6300_v6 = vmul.f32 %v6222_v13, %v6222_v13  ;;  %v6304_v61 = vmul.f32 %v6224_v3, %v6224_v3  ;;  %v4062_v42 = vld [vmem:[%s5192_s27 + $0x838] sm:$0xff]  ;;  %v1754_v11 = vsub.f32 %v4089_v31, %v4121_v22  ;;  %v4091_v3 = vld [vmem:[%s5186_s9 + $0x920] sm:$0xff]  ;;  %v4032_v31 = vld [vmem:[%s5186_s9 + $0x848] sm:$0xff] }
 0x11c   : > { %v1348_v35 = vadd.f32 %v1347_v54, %v6149_v2  ;;  %v6311_v15 = vmul.f32 %v6229_v33, %v6229_v33  ;;  %v6315_v10 = vmul.f32 %v6231_v39, %v6231_v39  ;;  %v6317_v13 = vmul.f32 %v1447_v34, %v1447_v34  ;;  %v4031_v23 = vld [vmem:[%s5186_s9 + $0x840] sm:$0xff]  ;;  %v4092_v22 = vld [vmem:[%s5186_s9 + $0x928] sm:$0xff]  ;;  %v4033_v60 = vld [vmem:[%s5186_s9 + $0x850] sm:$0xff] }
 0x11d   : > { %v1503_v28 = vadd.f32 %v1502_v19, %v1472_v40  ;;  %v1755_v4 = vsub.f32 %v4090_v36, %v4122_v51  ;;  %v1784_v53 = vmul.f32 %v1752_v29, %v1752_v29  ;;  %v1785_v45 = vmul.f32 %v1753_v1, %v1753_v1  ;;  %v4063_v26 = vld [vmem:[%s5192_s27 + $0x840] sm:$0xff]  ;;  %v4036_v51 = vld [vmem:[%s5186_s9 + $0x868] sm:$0xff] }
 0x11e   : > { %v1194_v2 = vadd.f32 %v1193_v43, %v8104_v9  ;;  %v1597_v55 = vsub.f32 %v4030_v58, %v4062_v42  ;;  %v1628_v33 = vmul.f32 %v1596_v38, %v1596_v38  ;;  %v1658_v7 = vadd.f32 %v1657_v0, %v1627_v37  ;;  %v4035_v43 = vld [vmem:[%s5186_s9 + $0x860] sm:$0xff]  ;;  %v4064_v58 = vld [vmem:[%s5192_s27 + $0x848] sm:$0xff]  ;;  %v4065_v42 = vld [vmem:[%s5192_s27 + $0x850] sm:$0xff] }
 0x11f   : > { %v6324_v39 = vmul.f32 %v6241_v20, %v6241_v20  ;;  %v6328_v34 = vmul.f32 %v6243_v62, %v6243_v62  ;;  %v6332_v12 = vmul.f32 %v6245_v56, %v6245_v56  ;;  %v1786_v48 = vmul.f32 %v1754_v11, %v1754_v11 }
 0x120   : > { %v1349_v21 = vadd.f32 %v1348_v35, %v6151_v17  ;;  %v6339_v20 = vmul.f32 %v6254_v59, %v6254_v59  ;;  %v6343_v62 = vmul.f32 %v6256_v5, %v6256_v5  ;;  %v1756_v54 = vsub.f32 %v4091_v3, %v4123_v32  ;;  %v4124_v17 = vld [vmem:[%s5192_s27 + $0x928] sm:$0xff]  ;;  %v8109_v59 = vld [vmem:[#allocation16_spill] sm:$0xff]  ;;  %v4034_v5 = vld [vmem:[%s5186_s9 + $0x858] sm:$0xff] }
 0x121   : > { %8105 = vst [vmem:[#allocation14_spill] sm:$0xff] %v6332_v12  ;;  %v6347_v56 = vmul.f32 %v6260_v44, %v6260_v44  ;;  %v1504_v40 = vadd.f32 %v1503_v28, %v1473_v50  ;;  %v1787_v19 = vmul.f32 %v1755_v4, %v1755_v4  ;;  %v1816_v29 = vadd.f32 %v1785_v45, %v1784_v53  ;;  %v4037_v28 = vld [vmem:[%s5186_s9 + $0x870] sm:$0xff]  ;;  %v4039_v3 = vld [vmem:[%s5186_s9 + $0x880] sm:$0xff]  ;;  %v4068_v4 = vld [vmem:[%s5192_s27 + $0x868] sm:$0xff] }
 0x122   : > { %8106 = vst [vmem:[#allocation15_spill] sm:$0xff] %v6339_v20  ;;  %8107 = vst [vmem:[#allocation21_spill] sm:$0xff] %v6343_v62  ;;  %v1195_v1 = vadd.f32 %v1194_v2, %v8109_v59  ;;  %v1598_v44 = vsub.f32 %v4031_v23, %v4063_v26  ;;  %v1629_v50 = vmul.f32 %v1597_v55, %v1597_v55  ;;  %v4067_v32 = vld [vmem:[%s5192_s27 + $0x860] sm:$0xff]  ;;  %v4040_v2 = vld [vmem:[%s5186_s9 + $0x888] sm:$0xff] }
 0x123   : > { %8108 = vst [vmem:[#allocation22_spill] sm:$0xff] %v6347_v56  ;;  %v1659_v38 = vadd.f32 %v1658_v7, %v1628_v33  ;;  %v6358_v37 = vmul.f32 %v6262_v24, %v6262_v24  ;;  %v6362_v0 = vmul.f32 %v6269_v49, %v6269_v49  ;;  %v6366_v36 = vmul.f32 %v6271_v57, %v6271_v57  ;;  %v4038_v49 = vld [vmem:[%s5186_s9 + $0x878] sm:$0xff]  ;;  %v4093_v55 = vld [vmem:[%s5186_s9 + $0x930] sm:$0xff]  ;;  %v4072_v59 = vld [vmem:[%s5192_s27 + $0x888] sm:$0xff] }
 0x124   : > { %v1817_v11 = vadd.f32 %v1816_v29, %v1786_v48  ;;  %v1350_v35 = vadd.f32 %v1349_v21, %v6153_v16  ;;  %v6374_v24 = vmul.f32 %v6273_v18, %v6273_v18  ;;  %v4066_v57 = vld [vmem:[%s5192_s27 + $0x858] sm:$0xff]  ;;  %v1757_v53 = vsub.f32 %v4092_v22, %v4124_v17  ;;  %v4125_v33 = vld [vmem:[%s5192_s27 + $0x930] sm:$0xff]  ;;  %v4071_v22 = vld [vmem:[%s5192_s27 + $0x880] sm:$0xff] }
 0x125   : > { %8110 = vst [vmem:[#allocation16_spill] sm:$0xff] %v6358_v37  ;;  %8111 = vst [vmem:[#allocation23_spill] sm:$0xff] %v6362_v0  ;;  %v1788_v45 = vmul.f32 %v1756_v54, %v1756_v54  ;;  %v6384_v16 = vmul.f32 %v6275_v8, %v6275_v8  ;;  %v6388_v18 = vmul.f32 %v6283_v46, %v6283_v46  ;;  %v8116_v23 = vld [vmem:[#allocation17_spill] sm:$0xff]  ;;  %v4041_v48 = vld [vmem:[%s5186_s9 + $0x890] sm:$0xff] }
 0x126   : > { %8112 = vst [vmem:[#allocation24_spill] sm:$0xff] %v6366_v36  ;;  %8113 = vst [vmem:[#allocation25_spill] sm:$0xff] %v6374_v24  ;;  %v1505_v9 = vadd.f32 %v1504_v40, %v6296_v41  ;;  %v1818_v7 = vadd.f32 %v1817_v11, %v1787_v19  ;;  %v1196_v26 = vadd.f32 %v1195_v1, %v8116_v23  ;;  %v4042_v21 = vld [vmem:[%s5186_s9 + $0x898] sm:$0xff]  ;;  %v4043_v8 = vld [vmem:[%s5186_s9 + $0x8a0] sm:$0xff] }
 0x127   : > { %8114 = vst [vmem:[#allocation26_spill] sm:$0xff] %v6384_v16  ;;  %8115 = vst [vmem:[#allocation27_spill] sm:$0xff] %v6388_v18  ;;  %v4069_v54 = vld [vmem:[%s5192_s27 + $0x870] sm:$0xff]  ;;  %v4070_v46 = vld [vmem:[%s5192_s27 + $0x878] sm:$0xff]  ;;  %v1599_v41 = vsub.f32 %v4032_v31, %v4064_v58  ;;  %v1630_v40 = vmul.f32 %v1598_v44, %v1598_v44  ;;  %v1660_v17 = vadd.f32 %v1659_v38, %v1629_v50 }
 0x128   : > { %v4044_v29 = vld [vmem:[%s5186_s9 + $0x8a8] sm:$0xff]  ;;  %v4073_v19 = vld [vmem:[%s5192_s27 + $0x890] sm:$0xff]  ;;  %v1600_v1 = vsub.f32 %v4033_v60, %v4065_v42  ;;  %v6404_v11 = vsub.f32 %v4034_v5, %v4066_v57  ;;  %v6406_v23 = vsub.f32 %v4035_v43, %v4067_v32  ;;  %v6408_v18 = vsub.f32 %v4036_v51, %v4068_v4  ;;  %v4046_v31 = vld [vmem:[%s5186_s9 + $0x8b8] sm:$0xff] }
 0x129   : > { %v1351_v16 = vadd.f32 %v1350_v35, %v6158_v47  ;;  %v4045_v24 = vld [vmem:[%s5186_s9 + $0x8b0] sm:$0xff]  ;;  %v4047_v44 = vld [vmem:[%s5186_s9 + $0x8c0] sm:$0xff]  ;;  %v4074_v50 = vld [vmem:[%s5192_s27 + $0x898] sm:$0xff]  ;;  %v1758_v5 = vsub.f32 %v4093_v55, %v4125_v33  ;;  %v1789_v43 = vmul.f32 %v1757_v53, %v1757_v53  ;;  %v1819_v51 = vadd.f32 %v1818_v7, %v1788_v45 }
 0x12a   : > { %v4075_v38 = vld [vmem:[%s5192_s27 + $0x8a0] sm:$0xff]  ;;  %v4076_v60 = vld [vmem:[%s5192_s27 + $0x8a8] sm:$0xff]  ;;  %v1506_v58 = vadd.f32 %v1505_v9, %v6300_v6  ;;  %v6419_v42 = vsub.f32 %v4037_v28, %v4069_v54  ;;  %v6421_v35 = vsub.f32 %v4038_v49, %v4070_v46  ;;  %v6423_v57 = vsub.f32 %v4039_v3, %v4071_v22  ;;  %v4094_v32 = vld [vmem:[%s5186_s9 + $0x938] sm:$0xff] }
 0x12b   : > { %v4048_v47 = vld [vmem:[%s5186_s9 + $0x8c8] sm:$0xff]  ;;  %v4126_v4 = vld [vmem:[%s5192_s27 + $0x938] sm:$0xff]  ;;  %v8117_v36 = vld [vmem:[#allocation18_spill] sm:$0xff]  ;;  %v6435_v9 = vsub.f32 %v4040_v2, %v4072_v59  ;;  %v1631_v3 = vmul.f32 %v1599_v41, %v1599_v41  ;;  %v1661_v7 = vadd.f32 %v1660_v17, %v1630_v40  ;;  %v6440_v37 = vsub.f32 %v4041_v48, %v4073_v19 }
 0x12c   : > { %v1197_v55 = vadd.f32 %v1196_v26, %v8117_v36  ;;  %v4049_v33 = vld [vmem:[%s5186_s9 + $0x8d0] sm:$0xff]  ;;  %v4050_v53 = vld [vmem:[%s5186_s9 + $0x8d8] sm:$0xff]  ;;  %v4051_v0 = vld [vmem:[%s5186_s9 + $0x8e0] sm:$0xff]  ;;  %v6442_v36 = vsub.f32 %v4042_v21, %v4074_v50  ;;  %v6444_v26 = vsub.f32 %v4043_v8, %v4075_v38  ;;  %v6446_v56 = vsub.f32 %v4044_v29, %v4076_v60 }
 0x12d   : > { %v4052_v45 = vld [vmem:[%s5186_s9 + $0x8e8] sm:$0xff]  ;;  %v4077_v6 = vld [vmem:[%s5192_s27 + $0x8b0] sm:$0xff]  ;;  %v4078_v28 = vld [vmem:[%s5192_s27 + $0x8b8] sm:$0xff]  ;;  %v1352_v62 = vadd.f32 %v1351_v16, %v6160_v30  ;;  %v1759_v17 = vsub.f32 %v4094_v32, %v4126_v4  ;;  %v1790_v48 = vmul.f32 %v1758_v5, %v1758_v5  ;;  %v1820_v21 = vadd.f32 %v1819_v51, %v1789_v43 }
 0x12e   : > { %v4079_v49 = vld [vmem:[%s5192_s27 + $0x8c0] sm:$0xff]  ;;  %v4080_v54 = vld [vmem:[%s5192_s27 + $0x8c8] sm:$0xff]  ;;  %v4081_v46 = vld [vmem:[%s5192_s27 + $0x8d0] sm:$0xff]  ;;  %v1507_v8 = vadd.f32 %v1506_v58, %v6304_v61  ;;  %v6454_v19 = vsub.f32 %v4045_v24, %v4077_v6  ;;  %v6456_v29 = vsub.f32 %v4046_v31, %v4078_v28  ;;  %v1632_v5 = vmul.f32 %v1600_v1, %v1600_v1 }
 0x12f   : > { %v4082_v22 = vld [vmem:[%s5192_s27 + $0x8d8] sm:$0xff]  ;;  %v4053_v2 = vld [vmem:[%s5186_s9 + $0x8f0] sm:$0xff]  ;;  %v4083_v59 = vld [vmem:[%s5192_s27 + $0x8e0] sm:$0xff]  ;;  %v6458_v50 = vsub.f32 %v4047_v44, %v4079_v49  ;;  %v6464_v12 = vsub.f32 %v4048_v47, %v4080_v54  ;;  %v1662_v43 = vadd.f32 %v1661_v7, %v1631_v3  ;;  %v6471_v44 = vsub.f32 %v4049_v33, %v4081_v46 }
 0x130   : > { %v4084_v41 = vld [vmem:[%s5192_s27 + $0x8e8] sm:$0xff]  ;;  %v4085_v40 = vld [vmem:[%s5192_s27 + $0x8f0] sm:$0xff]  ;;  %v4095_v30 = vld [vmem:[%s5186_s9 + $0x940] sm:$0xff]  ;;  %v6473_v58 = vsub.f32 %v4050_v53, %v4082_v22  ;;  %v6475_v4 = vsub.f32 %v4051_v0, %v4083_v59  ;;  %v1353_v47 = vadd.f32 %v1352_v62, %v6162_v14  ;;  %v1791_v6 = vmul.f32 %v1759_v17, %v1759_v17 }
 0x131   : > { %v4127_v16 = vld [vmem:[%s5192_s27 + $0x940] sm:$0xff]  ;;  %v8118_v60 = vld [vmem:[#allocation11_spill] sm:$0xff]  ;;  %v4054_v24 = vld [vmem:[%s5186_s9 + $0x8f8] sm:$0xff]  ;;  %v1821_v28 = vadd.f32 %v1820_v21, %v1790_v48  ;;  %v1508_v7 = vadd.f32 %v1507_v8, %v6311_v15  ;;  %v6483_v54 = vsub.f32 %v4053_v2, %v4085_v40  ;;  %v1633_v62 = vmul.f32 %v6404_v11, %v6404_v11 }
 0x132   : > { %v4151_v38 = vld [vmem:[%s5186_s9 + $0xa00] sm:$0xff]  ;;  %v1198_v20 = vadd.f32 %v1197_v55, %v8118_v60  ;;  %v4152_v51 = vld [vmem:[%s5186_s9 + $0xa08] sm:$0xff]  ;;  %v4086_v31 = vld [vmem:[%s5192_s27 + $0x8f8] sm:$0xff]  ;;  %v6477_v55 = vsub.f32 %v4052_v45, %v4084_v41  ;;  %v1760_v1 = vsub.f32 %v4095_v30, %v4127_v16  ;;  %v1663_v22 = vadd.f32 %v1662_v43, %v1632_v5 }
 0x133   : > { %v4183_v32 = vld [vmem:[%s5192_s27 + $0xa00] sm:$0xff]  ;;  %v4184_v61 = vld [vmem:[%s5192_s27 + $0xa08] sm:$0xff]  ;;  %v4153_v49 = vld [vmem:[%s5186_s9 + $0xa10] sm:$0xff]  ;;  %v6490_v14 = vsub.f32 %v4054_v24, %v4086_v31  ;;  %v1634_v59 = vmul.f32 %v6406_v23, %v6406_v23  ;;  %v1635_v41 = vmul.f32 %v6408_v18, %v6408_v18  ;;  %v1354_v40 = vadd.f32 %v1353_v47, %v6171_v52 }
 0x134   : > { %v4185_v3 = vld [vmem:[%s5192_s27 + $0xa10] sm:$0xff]  ;;  %v4096_v33 = vld [vmem:[%s5186_s9 + $0x948] sm:$0xff]  ;;  %v1914_v46 = vsub.f32 %v4151_v38, %v4183_v32  ;;  %v1915_v0 = vsub.f32 %v4152_v51, %v4184_v61  ;;  %v6488_v45 = vadd.f32 %v1198_v20, %v6280_v27  ;;  %v4154_v15 = vld [vmem:[%s5186_s9 + $0xa18] sm:$0xff]  ;;  %v6502_v27 = vmul.f32 %v6419_v42, %v6419_v42 }
 0x135   : > { %v4128_v53 = vld [vmem:[%s5192_s27 + $0x948] sm:$0xff]  ;;  %v4186_v2 = vld [vmem:[%s5192_s27 + $0xa18] sm:$0xff]  ;;  %v1916_v20 = vsub.f32 %v4153_v49, %v4185_v3  ;;  %v1792_v11 = vmul.f32 %v1760_v1, %v1760_v1  ;;  %v1822_v48 = vadd.f32 %v1821_v28, %v1791_v6  ;;  %v4155_v21 = vld [vmem:[%s5186_s9 + $0xa20] sm:$0xff]  ;;  %v1509_v30 = vadd.f32 %v1508_v7, %v6315_v10 }
 0x136   : > { %v1761_v17 = vsub.f32 %v4096_v33, %v4128_v53  ;;  %v4187_v8 = vld [vmem:[%s5192_s27 + $0xa20] sm:$0xff]  ;;  %v4097_v23 = vld [vmem:[%s5186_s9 + $0x950] sm:$0xff]  ;;  %v1917_v38 = vsub.f32 %v4154_v15, %v4186_v2  ;;  %v1946_v18 = vmul.f32 %v1914_v46, %v1914_v46  ;;  %v1947_v60 = vmul.f32 %v1915_v0, %v1915_v0  ;;  %v4156_v43 = vld [vmem:[%s5186_s9 + $0xa28] sm:$0xff] }
 0x137   : > { %v4129_v16 = vld [vmem:[%s5192_s27 + $0x950] sm:$0xff]  ;;  %v6512_v42 = vmul.f32 %v6421_v35, %v6421_v35  ;;  %v6516_v52 = vmul.f32 %v6423_v57, %v6423_v57  ;;  %v6520_v5 = vmul.f32 %v6435_v9, %v6435_v9  ;;  %v1664_v10 = vadd.f32 %v1663_v22, %v1633_v62  ;;  %v4188_v51 = vld [vmem:[%s5192_s27 + $0xa28] sm:$0xff]  ;;  %v4098_v49 = vld [vmem:[%s5186_s9 + $0x958] sm:$0xff] }
 0x138   : > { %v6526_v32 = vmul.f32 %v6440_v37, %v6440_v37  ;;  %v6530_v35 = vmul.f32 %v6442_v36, %v6442_v36  ;;  %v1918_v61 = vsub.f32 %v4155_v21, %v4187_v8  ;;  %v1948_v57 = vmul.f32 %v1916_v20, %v1916_v20  ;;  %v4157_v1 = vld [vmem:[%s5186_s9 + $0xa30] sm:$0xff]  ;;  %v4130_v37 = vld [vmem:[%s5192_s27 + $0x958] sm:$0xff] }
 0x139   : > { %v1355_v24 = vadd.f32 %v1354_v40, %v6173_v25  ;;  %v1762_v31 = vsub.f32 %v4097_v23, %v4129_v16  ;;  %v1793_v9 = vmul.f32 %v1761_v17, %v1761_v17  ;;  %v1823_v47 = vadd.f32 %v1822_v48, %v1792_v11  ;;  %v4189_v6 = vld [vmem:[%s5192_s27 + $0xa30] sm:$0xff]  ;;  %v4158_v0 = vld [vmem:[%s5186_s9 + $0xa38] sm:$0xff]  ;;  %v4131_v17 = vld [vmem:[%s5192_s27 + $0x960] sm:$0xff] }
 0x13a   : > { %v1510_v28 = vadd.f32 %v1509_v30, %v6317_v13  ;;  %v1919_v3 = vsub.f32 %v4156_v43, %v4188_v51  ;;  %v1949_v7 = vmul.f32 %v1917_v38, %v1917_v38  ;;  %v1978_v33 = vadd.f32 %v1947_v60, %v1946_v18  ;;  %v4190_v62 = vld [vmem:[%s5192_s27 + $0xa38] sm:$0xff]  ;;  %v4101_v8 = vld [vmem:[%s5186_s9 + $0x970] sm:$0xff]  ;;  %v4103_v38 = vld [vmem:[%s5186_s9 + $0x980] sm:$0xff] }
 0x13b   : > { %v6540_v36 = vmul.f32 %v6444_v26, %v6444_v26  ;;  %v6544_v25 = vmul.f32 %v6446_v56, %v6446_v56  ;;  %v6548_v53 = vmul.f32 %v6454_v19, %v6454_v19  ;;  %v1665_v13 = vadd.f32 %v1664_v10, %v1634_v59  ;;  %v4099_v59 = vld [vmem:[%s5186_s9 + $0x960] sm:$0xff]  ;;  %v4102_v30 = vld [vmem:[%s5186_s9 + $0x978] sm:$0xff]  ;;  %v8120_v10 = vld [vmem:[#allocation12_spill] sm:$0xff] }
 0x13c   : > { %v6552_v46 = vmul.f32 %v6456_v29, %v6456_v29  ;;  %v1920_v22 = vsub.f32 %v4157_v1, %v4189_v6  ;;  %v1950_v26 = vmul.f32 %v1918_v61, %v1918_v61  ;;  %v1979_v15 = vadd.f32 %v1978_v33, %v1948_v57  ;;  %v4159_v18 = vld [vmem:[%s5186_s9 + $0xa40] sm:$0xff]  ;;  %v4104_v51 = vld [vmem:[%s5186_s9 + $0x988] sm:$0xff]  ;;  %v4134_v57 = vld [vmem:[%s5192_s27 + $0x978] sm:$0xff] }
 0x13d   : > { %v1356_v56 = vadd.f32 %v1355_v24, %v6175_v63  ;;  %v1763_v2 = vsub.f32 %v4098_v49, %v4130_v37  ;;  %v1794_v20 = vmul.f32 %v1762_v31, %v1762_v31  ;;  %v1824_v40 = vadd.f32 %v1823_v47, %v1793_v9  ;;  %v4132_v61 = vld [vmem:[%s5192_s27 + $0x968] sm:$0xff]  ;;  %v4105_v6 = vld [vmem:[%s5186_s9 + $0x990] sm:$0xff]  ;;  %v4135_v49 = vld [vmem:[%s5192_s27 + $0x980] sm:$0xff] }
 0x13e   : > { %v1511_v19 = vadd.f32 %v1510_v28, %v6324_v39  ;;  %v6560_v29 = vmul.f32 %v6458_v50, %v6458_v50  ;;  %v1951_v11 = vmul.f32 %v1919_v3, %v1919_v3  ;;  %v1980_v48 = vadd.f32 %v1979_v15, %v1949_v7  ;;  %v4100_v50 = vld [vmem:[%s5186_s9 + $0x968] sm:$0xff]  ;;  %v4106_v28 = vld [vmem:[%s5186_s9 + $0x998] sm:$0xff]  ;;  %v4109_v33 = vld [vmem:[%s5186_s9 + $0x9b0] sm:$0xff] }
 0x13f   : > { %v6566_v63 = vmul.f32 %v6464_v12, %v6464_v12  ;;  %v6570_v21 = vmul.f32 %v6471_v44, %v6471_v44  ;;  %v1666_v39 = vadd.f32 %v1665_v13, %v1635_v41  ;;  %v1921_v23 = vsub.f32 %v4158_v0, %v4190_v62  ;;  %v4191_v44 = vld [vmem:[%s5192_s27 + $0xa40] sm:$0xff]  ;;  %v4108_v7 = vld [vmem:[%s5186_s9 + $0x9a8] sm:$0xff]  ;;  %v4137_v0 = vld [vmem:[%s5192_s27 + $0x990] sm:$0xff] }
 0x140   : > { %v6577_v16 = vmul.f32 %v6473_v58, %v6473_v58  ;;  %v6581_v12 = vmul.f32 %v6475_v4, %v6475_v4  ;;  %v1952_v41 = vmul.f32 %v1920_v22, %v1920_v22  ;;  %v1981_v60 = vadd.f32 %v1980_v48, %v1950_v26  ;;  %v4133_v58 = vld [vmem:[%s5192_s27 + $0x970] sm:$0xff]  ;;  %v4136_v13 = vld [vmem:[%s5192_s27 + $0x988] sm:$0xff]  ;;  %v4138_v62 = vld [vmem:[%s5192_s27 + $0x998] sm:$0xff] }
 0x141   : > { %v1357_v43 = vadd.f32 %v1356_v56, %v8120_v10  ;;  %v1764_v4 = vsub.f32 %v4099_v59, %v4131_v17  ;;  %v1795_v24 = vmul.f32 %v1763_v2, %v1763_v2  ;;  %v1825_v31 = vadd.f32 %v1824_v40, %v1794_v20  ;;  %v4111_v15 = vld [vmem:[%s5186_s9 + $0x9c0] sm:$0xff]  ;;  %v4160_v20 = vld [vmem:[%s5186_s9 + $0xa48] sm:$0xff]  ;;  %v8124_v59 = vld [vmem:[#allocation13_spill] sm:$0xff] }
 0x142   : > { %8119 = vst [vmem:[#allocation17_spill] sm:$0xff] %v6581_v12  ;;  %v1512_v9 = vadd.f32 %v1511_v19, %v6328_v34  ;;  %v6594_v47 = vmul.f32 %v6477_v55, %v6477_v55  ;;  %v6598_v1 = vmul.f32 %v6483_v54, %v6483_v54  ;;  %v1982_v37 = vadd.f32 %v1981_v60, %v1951_v11  ;;  %v4107_v55 = vld [vmem:[%s5186_s9 + $0x9a0] sm:$0xff]  ;;  %v4110_v54 = vld [vmem:[%s5186_s9 + $0x9b8] sm:$0xff]  ;;  %v4192_v40 = vld [vmem:[%s5192_s27 + $0xa48] sm:$0xff] }
 0x143   : > { %v6605_v3 = vmul.f32 %v6490_v14, %v6490_v14  ;;  %v1667_v34 = vadd.f32 %v1666_v39, %v6502_v27  ;;  %v1922_v22 = vsub.f32 %v4159_v18, %v4191_v44  ;;  %v1953_v26 = vmul.f32 %v1921_v23, %v1921_v23  ;;  %v4139_v14 = vld [vmem:[%s5192_s27 + $0x9a0] sm:$0xff]  ;;  %v4112_v11 = vld [vmem:[%s5186_s9 + $0x9c8] sm:$0xff]  ;;  %v4141_v39 = vld [vmem:[%s5192_s27 + $0x9b0] sm:$0xff] }
 0x144   : > { %8121 = vst [vmem:[#allocation18_spill] sm:$0xff] %v6594_v47  ;;  %8122 = vst [vmem:[#allocation11_spill] sm:$0xff] %v6598_v1  ;;  %v1765_v56 = vsub.f32 %v4100_v50, %v4132_v61  ;;  %v6617_v27 = vsub.f32 %v4101_v8, %v4133_v58  ;;  %v6619_v2 = vsub.f32 %v4102_v30, %v4134_v57  ;;  %v4140_v48 = vld [vmem:[%s5192_s27 + $0x9a8] sm:$0xff]  ;;  %v4142_v23 = vld [vmem:[%s5192_s27 + $0x9b8] sm:$0xff] }
 0x145   : > { %8123 = vst [vmem:[#allocation12_spill] sm:$0xff] %v6605_v3  ;;  %v1983_v19 = vadd.f32 %v1982_v37, %v1952_v41  ;;  %v1358_v17 = vadd.f32 %v1357_v43, %v8124_v59  ;;  %v6628_v50 = vsub.f32 %v4103_v38, %v4135_v49  ;;  %v1796_v8 = vmul.f32 %v1764_v4, %v1764_v4  ;;  %v8125_v30 = vld [vmem:[#allocation14_spill] sm:$0xff]  ;;  %v4144_v41 = vld [vmem:[%s5192_s27 + $0x9c8] sm:$0xff]  ;;  %v4113_v57 = vld [vmem:[%s5186_s9 + $0x9d0] sm:$0xff] }
 0x146   : > { %v1826_v18 = vadd.f32 %v1825_v31, %v1795_v24  ;;  %v1513_v44 = vadd.f32 %v1512_v9, %v8125_v30  ;;  %v4143_v60 = vld [vmem:[%s5192_s27 + $0x9c0] sm:$0xff]  ;;  %v6633_v10 = vsub.f32 %v4104_v51, %v4136_v13  ;;  %v6635_v43 = vsub.f32 %v4105_v6, %v4137_v0  ;;  %v4114_v4 = vld [vmem:[%s5186_s9 + $0x9d8] sm:$0xff]  ;;  %v4145_v31 = vld [vmem:[%s5192_s27 + $0x9d0] sm:$0xff] }
 0x147   : > { %v6637_v61 = vsub.f32 %v4106_v28, %v4138_v62  ;;  %v4215_v58 = vld [vmem:[%s5186_s9 + $0xb00] sm:$0xff]  ;;  %v1668_v38 = vadd.f32 %v1667_v34, %v6512_v42  ;;  %v1923_v9 = vsub.f32 %v4160_v20, %v4192_v40  ;;  %v1954_v49 = vmul.f32 %v1922_v22, %v1922_v22  ;;  %v4216_v51 = vld [vmem:[%s5186_s9 + $0xb08] sm:$0xff]  ;;  %v4146_v28 = vld [vmem:[%s5192_s27 + $0x9d8] sm:$0xff] }
 0x148   : > { %v4115_v24 = vld [vmem:[%s5186_s9 + $0x9e0] sm:$0xff]  ;;  %v1984_v37 = vadd.f32 %v1983_v19, %v1953_v26  ;;  %v4248_v13 = vld [vmem:[%s5192_s27 + $0xb08] sm:$0xff]  ;;  %v6649_v0 = vsub.f32 %v4107_v55, %v4139_v14  ;;  %v6651_v42 = vsub.f32 %v4108_v7, %v4140_v48  ;;  %v6653_v34 = vsub.f32 %v4109_v33, %v4141_v39  ;;  %v4161_v59 = vld [vmem:[%s5186_s9 + $0xa50] sm:$0xff] }
 0x149   : > { %v4247_v6 = vld [vmem:[%s5192_s27 + $0xb00] sm:$0xff]  ;;  %v6655_v62 = vsub.f32 %v4110_v54, %v4142_v23  ;;  %v4193_v22 = vld [vmem:[%s5192_s27 + $0xa50] sm:$0xff]  ;;  %v8126_v26 = vld [vmem:[#allocation19_spill] sm:$0xff]  ;;  %v6661_v19 = vsub.f32 %v4111_v15, %v4143_v60  ;;  %v1797_v30 = vmul.f32 %v1765_v56, %v1765_v56  ;;  %v1827_v3 = vadd.f32 %v1826_v18, %v1796_v8 }
 0x14a   : > { %v1359_v20 = vadd.f32 %v1358_v17, %v8126_v26  ;;  %v4147_v40 = vld [vmem:[%s5192_s27 + $0x9e0] sm:$0xff]  ;;  %v4217_v55 = vld [vmem:[%s5186_s9 + $0xb10] sm:$0xff]  ;;  %v8127_v33 = vld [vmem:[#allocation15_spill] sm:$0xff]  ;;  %v6668_v39 = vsub.f32 %v4112_v11, %v4144_v41  ;;  %v2076_v23 = vsub.f32 %v4215_v58, %v4247_v6  ;;  %v2077_v17 = vsub.f32 %v4216_v51, %v4248_v13 }
 0x14b   : > { %v4249_v7 = vld [vmem:[%s5192_s27 + $0xb10] sm:$0xff]  ;;  %v1514_v14 = vadd.f32 %v1513_v44, %v8127_v33  ;;  %v4116_v54 = vld [vmem:[%s5186_s9 + $0x9e8] sm:$0xff]  ;;  %v1669_v15 = vadd.f32 %v1668_v38, %v6516_v52  ;;  %v4118_v60 = vld [vmem:[%s5186_s9 + $0x9f8] sm:$0xff]  ;;  %v1924_v8 = vsub.f32 %v4161_v59, %v4193_v22  ;;  %v1955_v18 = vmul.f32 %v1923_v9, %v1923_v9 }
 0x14c   : > { %v4148_v48 = vld [vmem:[%s5192_s27 + $0x9e8] sm:$0xff]  ;;  %v4117_v56 = vld [vmem:[%s5186_s9 + $0x9f0] sm:$0xff]  ;;  %v1985_v26 = vadd.f32 %v1984_v37, %v1954_v49  ;;  %v4218_v1 = vld [vmem:[%s5186_s9 + $0xb18] sm:$0xff]  ;;  %v6676_v47 = vsub.f32 %v4113_v57, %v4145_v31  ;;  %v6678_v11 = vsub.f32 %v4114_v4, %v4146_v28  ;;  %v6680_v41 = vsub.f32 %v4115_v24, %v4147_v40 }
 0x14d   : > { %v4250_v44 = vld [vmem:[%s5192_s27 + $0xb18] sm:$0xff]  ;;  %v4149_v33 = vld [vmem:[%s5192_s27 + $0x9f0] sm:$0xff]  ;;  %v2078_v52 = vsub.f32 %v4217_v55, %v4249_v7  ;;  %v6686_v13 = vsub.f32 %v4116_v54, %v4148_v48  ;;  %v1798_v49 = vmul.f32 %v6617_v27, %v6617_v27  ;;  %v1828_v57 = vadd.f32 %v1827_v3, %v1797_v30  ;;  %v4219_v4 = vld [vmem:[%s5186_s9 + $0xb20] sm:$0xff] }
 0x14e   : > { %v4162_v58 = vld [vmem:[%s5186_s9 + $0xa58] sm:$0xff]  ;;  %v8128_v38 = vld [vmem:[#allocation20_spill] sm:$0xff]  ;;  %v4251_v31 = vld [vmem:[%s5192_s27 + $0xb20] sm:$0xff]  ;;  %v2079_v28 = vsub.f32 %v4218_v1, %v4250_v44  ;;  %v2108_v59 = vmul.f32 %v2076_v23, %v2076_v23  ;;  %v2109_v22 = vmul.f32 %v2077_v17, %v2077_v17  ;;  %v1670_v40 = vadd.f32 %v1669_v15, %v6520_v5 }
 0x14f   : > { %v4194_v51 = vld [vmem:[%s5192_s27 + $0xa58] sm:$0xff]  ;;  %v1360_v6 = vadd.f32 %v1359_v20, %v8128_v38  ;;  %v1956_v55 = vmul.f32 %v1924_v8, %v1924_v8  ;;  %v1986_v7 = vadd.f32 %v1985_v26, %v1955_v18  ;;  %v4220_v54 = vld [vmem:[%s5186_s9 + $0xb28] sm:$0xff]  ;;  %v6696_v27 = vsub.f32 %v4117_v56, %v4149_v33  ;;  %v4163_v30 = vld [vmem:[%s5186_s9 + $0xa60] sm:$0xff] }
 0x150   : > { %v4150_v9 = vld [vmem:[%s5192_s27 + $0x9f8] sm:$0xff]  ;;  %v1925_v20 = vsub.f32 %v4162_v58, %v4194_v51  ;;  %v4252_v48 = vld [vmem:[%s5192_s27 + $0xb28] sm:$0xff]  ;;  %v4195_v38 = vld [vmem:[%s5192_s27 + $0xa60] sm:$0xff]  ;;  %v2080_v12 = vsub.f32 %v4219_v4, %v4251_v31  ;;  %v2110_v1 = vmul.f32 %v2078_v52, %v2078_v52  ;;  %v1799_v5 = vmul.f32 %v6619_v2, %v6619_v2 }
 0x151   : > { %v8129_v24 = vld [vmem:[#allocation21_spill] sm:$0xff]  ;;  %v6698_v3 = vsub.f32 %v4118_v60, %v4150_v9  ;;  %v1800_v23 = vmul.f32 %v6628_v50, %v6628_v50  ;;  %v1829_v17 = vadd.f32 %v1828_v57, %v1798_v49  ;;  %v4221_v15 = vld [vmem:[%s5186_s9 + $0xb30] sm:$0xff]  ;;  %v8130_v60 = vld [vmem:[#allocation22_spill] sm:$0xff]  ;;  %v2081_v18 = vsub.f32 %v4220_v54, %v4252_v48 }
 0x152   : > { %v1515_v37 = vadd.f32 %v1514_v14, %v8129_v24  ;;  %v6703_v14 = vadd.f32 %v1360_v6, %v6488_v45  ;;  %v4253_v56 = vld [vmem:[%s5192_s27 + $0xb30] sm:$0xff]  ;;  %v2111_v26 = vmul.f32 %v2079_v28, %v2079_v28  ;;  %v2140_v44 = vadd.f32 %v2109_v22, %v2108_v59  ;;  %v4222_v51 = vld [vmem:[%s5186_s9 + $0xb38] sm:$0xff]  ;;  %v4164_v6 = vld [vmem:[%s5186_s9 + $0xa68] sm:$0xff] }
 0x153   : > { %v1671_v33 = vadd.f32 %v1670_v40, %v6526_v32  ;;  %v1926_v45 = vsub.f32 %v4163_v30, %v4195_v38  ;;  %v1957_v58 = vmul.f32 %v1925_v20, %v1925_v20  ;;  %v1987_v2 = vadd.f32 %v1986_v7, %v1956_v55  ;;  %v4254_v52 = vld [vmem:[%s5192_s27 + $0xb38] sm:$0xff]  ;;  %v4196_v9 = vld [vmem:[%s5192_s27 + $0xa68] sm:$0xff]  ;;  %v8131_v28 = vld [vmem:[#allocation16_spill] sm:$0xff] }
 0x154   : > { %v1516_v8 = vadd.f32 %v1515_v37, %v8130_v60  ;;  %v1801_v50 = vmul.f32 %v6633_v10, %v6633_v10  ;;  %v2082_v49 = vsub.f32 %v4221_v15, %v4253_v56  ;;  %v2112_v57 = vmul.f32 %v2080_v12, %v2080_v12  ;;  %v4223_v37 = vld [vmem:[%s5186_s9 + $0xb40] sm:$0xff]  ;;  %v4224_v54 = vld [vmem:[%s5186_s9 + $0xb48] sm:$0xff]  ;;  %v4165_v30 = vld [vmem:[%s5186_s9 + $0xa70] sm:$0xff] }
 0x155   : > { %v2141_v4 = vadd.f32 %v2140_v44, %v2110_v1  ;;  %v6721_v32 = vmul.f32 %v6635_v43, %v6635_v43  ;;  %v6725_v31 = vmul.f32 %v6637_v61, %v6637_v61  ;;  %v6729_v24 = vmul.f32 %v6649_v0, %v6649_v0  ;;  %v4255_v12 = vld [vmem:[%s5192_s27 + $0xb40] sm:$0xff]  ;;  %v4256_v48 = vld [vmem:[%s5192_s27 + $0xb48] sm:$0xff]  ;;  %v4197_v38 = vld [vmem:[%s5192_s27 + $0xa70] sm:$0xff] }
 0x156   : > { %v1830_v10 = vadd.f32 %v1829_v17, %v1799_v5  ;;  %v1517_v59 = vadd.f32 %v1516_v8, %v8131_v28  ;;  %v2083_v22 = vsub.f32 %v4222_v51, %v4254_v52  ;;  %v2113_v40 = vmul.f32 %v2081_v18, %v2081_v18  ;;  %v4225_v60 = vld [vmem:[%s5186_s9 + $0xb50] sm:$0xff]  ;;  %v8132_v18 = vld [vmem:[#allocation23_spill] sm:$0xff]  ;;  %v4167_v51 = vld [vmem:[%s5186_s9 + $0xa80] sm:$0xff] }
 0x157   : > { %v2142_v20 = vadd.f32 %v2141_v4, %v2111_v26  ;;  %v1672_v43 = vadd.f32 %v1671_v33, %v6530_v35  ;;  %v1927_v55 = vsub.f32 %v4164_v6, %v4196_v9  ;;  %v1958_v61 = vmul.f32 %v1926_v45, %v1926_v45  ;;  %v4257_v8 = vld [vmem:[%s5192_s27 + $0xb50] sm:$0xff]  ;;  %v4168_v52 = vld [vmem:[%s5186_s9 + $0xa88] sm:$0xff]  ;;  %v4198_v6 = vld [vmem:[%s5192_s27 + $0xa78] sm:$0xff] }
 0x158   : > { %v1988_v7 = vadd.f32 %v1987_v2, %v1957_v58  ;;  %v6739_v0 = vmul.f32 %v6651_v42, %v6651_v42  ;;  %v2084_v1 = vsub.f32 %v4223_v37, %v4255_v12  ;;  %v2114_v5 = vmul.f32 %v2082_v49, %v2082_v49  ;;  %v4166_v58 = vld [vmem:[%s5186_s9 + $0xa78] sm:$0xff]  ;;  %v4169_v37 = vld [vmem:[%s5186_s9 + $0xa90] sm:$0xff]  ;;  %v4199_v12 = vld [vmem:[%s5192_s27 + $0xa80] sm:$0xff] }
 0x159   : > { %v2143_v17 = vadd.f32 %v2142_v20, %v2112_v57  ;;  %v6745_v35 = vmul.f32 %v6653_v34, %v6653_v34  ;;  %v6749_v15 = vmul.f32 %v6655_v62, %v6655_v62  ;;  %v6753_v42 = vmul.f32 %v6661_v19, %v6661_v19  ;;  %v4226_v28 = vld [vmem:[%s5186_s9 + $0xb58] sm:$0xff] }
 0x15a   : > { %v1831_v56 = vadd.f32 %v1830_v10, %v1800_v23  ;;  %v1518_v26 = vadd.f32 %v1517_v59, %v8132_v18  ;;  %v2085_v44 = vsub.f32 %v4224_v54, %v4256_v48  ;;  %v2115_v33 = vmul.f32 %v2083_v22, %v2083_v22  ;;  %v4258_v59 = vld [vmem:[%s5192_s27 + $0xb58] sm:$0xff]  ;;  %v8133_v22 = vld [vmem:[#allocation24_spill] sm:$0xff]  ;;  %v4280_v48 = vld [vmem:[%s5186_s9 + $0xc08] sm:$0xff] }
 0x15b   : > { %v2144_v34 = vadd.f32 %v2143_v17, %v2113_v40  ;;  %v1673_v45 = vadd.f32 %v1672_v43, %v6540_v36  ;;  %v1928_v62 = vsub.f32 %v4165_v30, %v4197_v38  ;;  %v1959_v2 = vmul.f32 %v1927_v55, %v1927_v55  ;;  %v4200_v40 = vld [vmem:[%s5192_s27 + $0xa88] sm:$0xff]  ;;  %v4279_v43 = vld [vmem:[%s5186_s9 + $0xc00] sm:$0xff] }
 0x15c   : > { %v1989_v19 = vadd.f32 %v1988_v7, %v1958_v61  ;;  %v6762_v23 = vmul.f32 %v6668_v39, %v6668_v39  ;;  %v2086_v9 = vsub.f32 %v4225_v60, %v4257_v8  ;;  %v2116_v49 = vmul.f32 %v2084_v1, %v2084_v1  ;;  %v4311_v30 = vld [vmem:[%s5192_s27 + $0xc00] sm:$0xff]  ;;  %v4312_v38 = vld [vmem:[%s5192_s27 + $0xc08] sm:$0xff]  ;;  %v4170_v1 = vld [vmem:[%s5186_s9 + $0xa98] sm:$0xff] }
 0x15d   : > { %v2145_v36 = vadd.f32 %v2144_v34, %v2114_v5  ;;  %v6769_v57 = vmul.f32 %v6676_v47, %v6676_v47  ;;  %v6773_v4 = vmul.f32 %v6678_v11, %v6678_v11  ;;  %v6777_v39 = vmul.f32 %v6680_v41, %v6680_v41  ;;  %v4201_v41 = vld [vmem:[%s5192_s27 + $0xa90] sm:$0xff]  ;;  %v4171_v5 = vld [vmem:[%s5186_s9 + $0xaa0] sm:$0xff] }
 0x15e   : > { %v1832_v10 = vadd.f32 %v1831_v56, %v1801_v50  ;;  %v1519_v47 = vadd.f32 %v1518_v26, %v8133_v22  ;;  %v6786_v11 = vmul.f32 %v6686_v13, %v6686_v13  ;;  %v2117_v50 = vmul.f32 %v2085_v44, %v2085_v44  ;;  %v4227_v17 = vld [vmem:[%s5186_s9 + $0xb60] sm:$0xff]  ;;  %v4173_v44 = vld [vmem:[%s5186_s9 + $0xab0] sm:$0xff]  ;;  %v4260_v22 = vld [vmem:[%s5192_s27 + $0xb68] sm:$0xff] }
 0x15f   : > { %v2146_v20 = vadd.f32 %v2145_v36, %v2115_v33  ;;  %v1674_v55 = vadd.f32 %v1673_v45, %v6544_v25  ;;  %v1929_v61 = vsub.f32 %v4166_v58, %v4198_v6  ;;  %v1960_v7 = vmul.f32 %v1928_v62, %v1928_v62  ;;  %v4172_v25 = vld [vmem:[%s5186_s9 + $0xaa8] sm:$0xff]  ;;  %v4259_v34 = vld [vmem:[%s5192_s27 + $0xb60] sm:$0xff]  ;;  %v4281_v45 = vld [vmem:[%s5186_s9 + $0xc10] sm:$0xff] }
 0x160   : > { %v1990_v54 = vadd.f32 %v1989_v19, %v1959_v2  ;;  %v6797_v13 = vmul.f32 %v6696_v27, %v6696_v27  ;;  %v2087_v56 = vsub.f32 %v4226_v28, %v4258_v59  ;;  %v2118_v60 = vmul.f32 %v2086_v9, %v2086_v9  ;;  %v4313_v58 = vld [vmem:[%s5192_s27 + $0xc10] sm:$0xff]  ;;  %v4202_v62 = vld [vmem:[%s5192_s27 + $0xa98] sm:$0xff]  ;;  %v4203_v2 = vld [vmem:[%s5192_s27 + $0xaa0] sm:$0xff] }
 0x161   : > { %v2147_v8 = vadd.f32 %v2146_v20, %v2116_v49  ;;  %v6805_v18 = vmul.f32 %v6698_v3, %v6698_v3  ;;  %v1833_v26 = vadd.f32 %v1832_v10, %v6721_v32  ;;  %v1930_v27 = vsub.f32 %v4167_v51, %v4199_v12  ;;  %v4204_v19 = vld [vmem:[%s5192_s27 + $0xaa8] sm:$0xff]  ;;  %v8134_v49 = vld [vmem:[#allocation25_spill] sm:$0xff] }
 0x162   : > { %v1931_v33 = vsub.f32 %v4168_v52, %v4200_v40  ;;  %v6815_v6 = vsub.f32 %v4169_v37, %v4201_v41  ;;  %v2238_v9 = vsub.f32 %v4279_v43, %v4311_v30  ;;  %v2239_v32 = vsub.f32 %v4280_v48, %v4312_v38  ;;  %v4205_v52 = vld [vmem:[%s5192_s27 + $0xab0] sm:$0xff]  ;;  %v4282_v28 = vld [vmem:[%s5186_s9 + $0xc18] sm:$0xff]  ;;  %v4228_v37 = vld [vmem:[%s5186_s9 + $0xb68] sm:$0xff] }
 0x163   : > { %v2148_v3 = vadd.f32 %v2147_v8, %v2117_v50  ;;  %v1520_v36 = vadd.f32 %v1519_v47, %v8134_v49  ;;  %v1675_v51 = vadd.f32 %v1674_v55, %v6548_v53  ;;  %v1961_v10 = vmul.f32 %v1929_v61, %v1929_v61  ;;  %v4314_v59 = vld [vmem:[%s5192_s27 + $0xc18] sm:$0xff]  ;;  %v4175_v48 = vld [vmem:[%s5186_s9 + $0xac0] sm:$0xff] }
 0x164   : > { %v1991_v12 = vadd.f32 %v1990_v54, %v1960_v7  ;;  %v2088_v40 = vsub.f32 %v4227_v17, %v4259_v34  ;;  %v2119_v41 = vmul.f32 %v2087_v56, %v2087_v56  ;;  %v2240_v20 = vsub.f32 %v4281_v45, %v4313_v58  ;;  %v4174_v43 = vld [vmem:[%s5186_s9 + $0xab8] sm:$0xff]  ;;  %v4283_v7 = vld [vmem:[%s5186_s9 + $0xc20] sm:$0xff]  ;;  %v4316_v34 = vld [vmem:[%s5192_s27 + $0xc28] sm:$0xff] }
 0x165   : > { %v2149_v50 = vadd.f32 %v2148_v3, %v2118_v60  ;;  %v1834_v47 = vadd.f32 %v1833_v26, %v6725_v31  ;;  %v6826_v53 = vsub.f32 %v4170_v1, %v4202_v62  ;;  %v6828_v55 = vsub.f32 %v4171_v5, %v4203_v2  ;;  %v4315_v54 = vld [vmem:[%s5192_s27 + $0xc20] sm:$0xff]  ;;  %v4206_v30 = vld [vmem:[%s5192_s27 + $0xab8] sm:$0xff]  ;;  %v4284_v26 = vld [vmem:[%s5186_s9 + $0xc28] sm:$0xff] }
 0x166   : > { %v6830_v61 = vsub.f32 %v4172_v25, %v4204_v19  ;;  %v4207_v38 = vld [vmem:[%s5192_s27 + $0xac0] sm:$0xff]  ;;  %v6837_v17 = vsub.f32 %v4173_v44, %v4205_v52  ;;  %v2241_v31 = vsub.f32 %v4282_v28, %v4314_v59  ;;  %v2270_v1 = vmul.f32 %v2238_v9, %v2238_v9  ;;  %v4176_v45 = vld [vmem:[%s5186_s9 + $0xac8] sm:$0xff]  ;;  %v4177_v58 = vld [vmem:[%s5186_s9 + $0xad0] sm:$0xff] }
 0x167   : > { %v2271_v56 = vmul.f32 %v2239_v32, %v2239_v32  ;;  %v1676_v5 = vadd.f32 %v1675_v51, %v6552_v46  ;;  %v1962_v60 = vmul.f32 %v1930_v27, %v1930_v27  ;;  %v1992_v25 = vadd.f32 %v1991_v12, %v1961_v10  ;;  %v4229_v44 = vld [vmem:[%s5186_s9 + $0xb70] sm:$0xff]  ;;  %v8135_v46 = vld [vmem:[#allocation26_spill] sm:$0xff]  ;;  %v4178_v49 = vld [vmem:[%s5186_s9 + $0xad8] sm:$0xff] }
 0x168   : > { %v2089_v8 = vsub.f32 %v4228_v37, %v4260_v22  ;;  %v4261_v62 = vld [vmem:[%s5192_s27 + $0xb70] sm:$0xff]  ;;  %v2120_v2 = vmul.f32 %v2088_v40, %v2088_v40  ;;  %v2150_v19 = vadd.f32 %v2149_v50, %v2119_v41  ;;  %v2242_v3 = vsub.f32 %v4283_v7, %v4315_v54  ;;  %v4208_v28 = vld [vmem:[%s5192_s27 + $0xac8] sm:$0xff]  ;;  %v4210_v37 = vld [vmem:[%s5192_s27 + $0xad8] sm:$0xff] }
 0x169   : > { %v2272_v9 = vmul.f32 %v2240_v20, %v2240_v20  ;;  %v1521_v32 = vadd.f32 %v1520_v36, %v8135_v46  ;;  %v1835_v27 = vadd.f32 %v1834_v47, %v6729_v24  ;;  %v6849_v51 = vsub.f32 %v4174_v43, %v4206_v30  ;;  %v4285_v10 = vld [vmem:[%s5186_s9 + $0xc30] sm:$0xff]  ;;  %v4286_v43 = vld [vmem:[%s5186_s9 + $0xc38] sm:$0xff]  ;;  %v4179_v54 = vld [vmem:[%s5186_s9 + $0xae0] sm:$0xff] }
 0x16a   : > { %v6851_v52 = vsub.f32 %v4175_v48, %v4207_v38  ;;  %v4317_v12 = vld [vmem:[%s5192_s27 + $0xc30] sm:$0xff]  ;;  %v1963_v22 = vmul.f32 %v1931_v33, %v1931_v33  ;;  %v2243_v40 = vsub.f32 %v4284_v26, %v4316_v34  ;;  %v2273_v36 = vmul.f32 %v2241_v31, %v2241_v31  ;;  %v4318_v7 = vld [vmem:[%s5192_s27 + $0xc38] sm:$0xff] }
 0x16b   : > { %v4209_v59 = vld [vmem:[%s5192_s27 + $0xad0] sm:$0xff]  ;;  %v2302_v24 = vadd.f32 %v2271_v56, %v2270_v1  ;;  %v1677_v41 = vadd.f32 %v1676_v5, %v6560_v29  ;;  %v1993_v50 = vadd.f32 %v1992_v25, %v1962_v60  ;;  %v2090_v20 = vsub.f32 %v4229_v44, %v4261_v62  ;;  %v4230_v48 = vld [vmem:[%s5186_s9 + $0xb78] sm:$0xff]  ;;  %v4180_v1 = vld [vmem:[%s5186_s9 + $0xae8] sm:$0xff] }
 0x16c   : > { %v2121_v47 = vmul.f32 %v2089_v8, %v2089_v8  ;;  %v4262_v30 = vld [vmem:[%s5192_s27 + $0xb78] sm:$0xff]  ;;  %v2151_v33 = vadd.f32 %v2150_v19, %v2120_v2  ;;  %v2244_v38 = vsub.f32 %v4285_v10, %v4317_v12  ;;  %v2274_v31 = vmul.f32 %v2242_v3, %v2242_v3  ;;  %v4287_v25 = vld [vmem:[%s5186_s9 + $0xc40] sm:$0xff]  ;;  %v4181_v34 = vld [vmem:[%s5186_s9 + $0xaf0] sm:$0xff] }
 0x16d   : > { %v2303_v26 = vadd.f32 %v2302_v24, %v2272_v9  ;;  %v1836_v29 = vadd.f32 %v1835_v27, %v6739_v0  ;;  %v6866_v56 = vsub.f32 %v4176_v45, %v4208_v28  ;;  %v6868_v5 = vsub.f32 %v4177_v58, %v4209_v59  ;;  %v4319_v8 = vld [vmem:[%s5192_s27 + $0xc40] sm:$0xff]  ;;  %v4212_v62 = vld [vmem:[%s5192_s27 + $0xae8] sm:$0xff]  ;;  %v4213_v3 = vld [vmem:[%s5192_s27 + $0xaf0] sm:$0xff] }
 0x16e   : > { %v6870_v60 = vsub.f32 %v4178_v49, %v4210_v37  ;;  %v4211_v44 = vld [vmem:[%s5192_s27 + $0xae0] sm:$0xff]  ;;  %v1964_v2 = vmul.f32 %v6815_v6, %v6815_v6  ;;  %v2245_v0 = vsub.f32 %v4286_v43, %v4318_v7  ;;  %v2275_v19 = vmul.f32 %v2243_v40, %v2243_v40  ;;  %v4288_v49 = vld [vmem:[%s5186_s9 + $0xc48] sm:$0xff] }
 0x16f   : > { %v2304_v45 = vadd.f32 %v2303_v26, %v2273_v36  ;;  %v1678_v58 = vadd.f32 %v1677_v41, %v6566_v63  ;;  %v1994_v9 = vadd.f32 %v1993_v50, %v1963_v22  ;;  %v2091_v46 = vsub.f32 %v4230_v48, %v4262_v30  ;;  %v4320_v10 = vld [vmem:[%s5192_s27 + $0xc48] sm:$0xff]  ;;  %v4231_v12 = vld [vmem:[%s5186_s9 + $0xb80] sm:$0xff]  ;;  %v4182_v41 = vld [vmem:[%s5186_s9 + $0xaf8] sm:$0xff] }
 0x170   : > { %v2122_v27 = vmul.f32 %v2090_v20, %v2090_v20  ;;  %v4263_v28 = vld [vmem:[%s5192_s27 + $0xb80] sm:$0xff]  ;;  %v2152_v59 = vadd.f32 %v2151_v33, %v2121_v47  ;;  %v2246_v37 = vsub.f32 %v4287_v25, %v4319_v8  ;;  %v2276_v24 = vmul.f32 %v2244_v38, %v2244_v38  ;;  %v8136_v43 = vld [vmem:[#allocation27_spill] sm:$0xff]  ;;  %v4214_v50 = vld [vmem:[%s5192_s27 + $0xaf8] sm:$0xff] }
 0x171   : > { %v2305_v6 = vadd.f32 %v2304_v45, %v2274_v31  ;;  %v1522_v40 = vadd.f32 %v1521_v32, %v8136_v43  ;;  %v1837_v63 = vadd.f32 %v1836_v29, %v6745_v35  ;;  %v6887_v36 = vsub.f32 %v4179_v54, %v4211_v44  ;;  %v4289_v33 = vld [vmem:[%s5186_s9 + $0xc50] sm:$0xff]  ;;  %v4264_v44 = vld [vmem:[%s5192_s27 + $0xb88] sm:$0xff] }
 0x172   : > { %v6889_v22 = vsub.f32 %v4180_v1, %v4212_v62  ;;  %v6893_v20 = vsub.f32 %v4181_v34, %v4213_v3  ;;  %v2247_v7 = vsub.f32 %v4288_v49, %v4320_v10  ;;  %v2277_v48 = vmul.f32 %v2245_v0, %v2245_v0  ;;  %v4321_v38 = vld [vmem:[%s5192_s27 + $0xc50] sm:$0xff]  ;;  %v4232_v34 = vld [vmem:[%s5186_s9 + $0xb88] sm:$0xff]  ;;  %v4322_v0 = vld [vmem:[%s5192_s27 + $0xc58] sm:$0xff] }
 0x173   : > { %v2306_v47 = vadd.f32 %v2305_v6, %v2275_v19  ;;  %v1679_v30 = vadd.f32 %v1678_v58, %v6570_v21  ;;  %v1965_v32 = vmul.f32 %v6826_v53, %v6826_v53  ;;  %v1995_v35 = vadd.f32 %v1994_v9, %v1964_v2  ;;  %v4290_v2 = vld [vmem:[%s5186_s9 + $0xc58] sm:$0xff]  ;;  %v4344_v9 = vld [vmem:[%s5186_s9 + $0xd08] sm:$0xff]  ;;  %v4233_v49 = vld [vmem:[%s5186_s9 + $0xb90] sm:$0xff] }
 0x174   : > { %v2092_v54 = vsub.f32 %v4231_v12, %v4263_v28  ;;  %v2123_v31 = vmul.f32 %v2091_v46, %v2091_v46  ;;  %v2153_v26 = vadd.f32 %v2152_v59, %v2122_v27  ;;  %v2278_v29 = vmul.f32 %v2246_v37, %v2246_v37  ;;  %v4375_v46 = vld [vmem:[%s5192_s27 + $0xd00] sm:$0xff]  ;;  %v4376_v27 = vld [vmem:[%s5192_s27 + $0xd08] sm:$0xff]  ;;  %v4265_v37 = vld [vmem:[%s5192_s27 + $0xb90] sm:$0xff] }
 0x175   : > { %v2307_v1 = vadd.f32 %v2306_v47, %v2276_v24  ;;  %v6901_v25 = vadd.f32 %v1522_v40, %v6703_v14  ;;  %v1838_v8 = vadd.f32 %v1837_v63, %v6749_v15  ;;  %v6904_v21 = vsub.f32 %v4182_v41, %v4214_v50  ;;  %v4343_v15 = vld [vmem:[%s5186_s9 + $0xd00] sm:$0xff]  ;;  %v4345_v6 = vld [vmem:[%s5186_s9 + $0xd10] sm:$0xff] }
 0x176   : > { %v1966_v53 = vmul.f32 %v6828_v55, %v6828_v55  ;;  %v1967_v62 = vmul.f32 %v6830_v61, %v6830_v61  ;;  %v2248_v14 = vsub.f32 %v4289_v33, %v4321_v38  ;;  %v2279_v19 = vmul.f32 %v2247_v7, %v2247_v7  ;;  %v4377_v43 = vld [vmem:[%s5192_s27 + $0xd10] sm:$0xff]  ;;  %v4291_v40 = vld [vmem:[%s5186_s9 + $0xc60] sm:$0xff]  ;;  %v8137_v7 = vld [vmem:[#allocation17_spill] sm:$0xff] }
 0x177   : > { %v2308_v45 = vadd.f32 %v2307_v1, %v2277_v48  ;;  %v1680_v58 = vadd.f32 %v1679_v30, %v6577_v16  ;;  %v6918_v3 = vmul.f32 %v6837_v17, %v6837_v17  ;;  %v6922_v55 = vmul.f32 %v6849_v51, %v6849_v51  ;;  %v4323_v63 = vld [vmem:[%s5192_s27 + $0xc60] sm:$0xff]  ;;  %v4266_v1 = vld [vmem:[%s5192_s27 + $0xb98] sm:$0xff] }
 0x178   : > { %v1996_v61 = vadd.f32 %v1995_v35, %v1965_v32  ;;  %v2093_v10 = vsub.f32 %v4232_v34, %v4264_v44  ;;  %v2124_v12 = vmul.f32 %v2092_v54, %v2092_v54  ;;  %v2154_v16 = vadd.f32 %v2153_v26, %v2123_v31  ;;  %v4346_v32 = vld [vmem:[%s5186_s9 + $0xd18] sm:$0xff]  ;;  %v4324_v34 = vld [vmem:[%s5192_s27 + $0xc68] sm:$0xff] }
 0x179   : > { %v2309_v28 = vadd.f32 %v2308_v45, %v2278_v29  ;;  %v1839_v17 = vadd.f32 %v1838_v8, %v6753_v42  ;;  %v6931_v59 = vmul.f32 %v6851_v52, %v6851_v52  ;;  %v6935_v51 = vmul.f32 %v6866_v56, %v6866_v56  ;;  %v4378_v35 = vld [vmem:[%s5192_s27 + $0xd18] sm:$0xff] }
 0x17a   : > { %v2249_v24 = vsub.f32 %v4290_v2, %v4322_v0  ;;  %v2280_v41 = vmul.f32 %v2248_v14, %v2248_v14  ;;  %v2400_v42 = vsub.f32 %v4343_v15, %v4375_v46  ;;  %v2401_v52 = vsub.f32 %v4344_v9, %v4376_v27  ;;  %v4234_v29 = vld [vmem:[%s5186_s9 + $0xb98] sm:$0xff]  ;;  %v4347_v2 = vld [vmem:[%s5186_s9 + $0xd20] sm:$0xff]  ;;  %v4236_v46 = vld [vmem:[%s5186_s9 + $0xba8] sm:$0xff] }
 0x17b   : > { %v2310_v50 = vadd.f32 %v2309_v28, %v2279_v19  ;;  %v1681_v48 = vadd.f32 %v1680_v58, %v8137_v7  ;;  %v6945_v56 = vmul.f32 %v6868_v5, %v6868_v5  ;;  %v6949_v47 = vmul.f32 %v6870_v60, %v6870_v60  ;;  %v4292_v60 = vld [vmem:[%s5186_s9 + $0xc68] sm:$0xff]  ;;  %v4379_v0 = vld [vmem:[%s5192_s27 + $0xd20] sm:$0xff]  ;;  %v4237_v27 = vld [vmem:[%s5186_s9 + $0xbb0] sm:$0xff] }
 0x17c   : > { %v1997_v30 = vadd.f32 %v1996_v61, %v1966_v53  ;;  %v2094_v54 = vsub.f32 %v4233_v49, %v4265_v37  ;;  %v2125_v33 = vmul.f32 %v2093_v10, %v2093_v10  ;;  %v2155_v38 = vadd.f32 %v2154_v16, %v2124_v12  ;;  %v4235_v9 = vld [vmem:[%s5186_s9 + $0xba0] sm:$0xff]  ;;  %v4268_v10 = vld [vmem:[%s5192_s27 + $0xba8] sm:$0xff]  ;;  %v4269_v12 = vld [vmem:[%s5192_s27 + $0xbb0] sm:$0xff] }
 0x17d   : > { %v2402_v31 = vsub.f32 %v4345_v6, %v4377_v43  ;;  %v1840_v26 = vadd.f32 %v1839_v17, %v6762_v23  ;;  %v6956_v5 = vmul.f32 %v6887_v36, %v6887_v36  ;;  %v2250_v8 = vsub.f32 %v4291_v40, %v4323_v63  ;;  %v8138_v36 = vld [vmem:[#allocation18_spill] sm:$0xff]  ;;  %v4238_v37 = vld [vmem:[%s5186_s9 + $0xbb8] sm:$0xff]  ;;  %v4240_v40 = vld [vmem:[%s5186_s9 + $0xbc8] sm:$0xff] }
 0x17e   : > { %v2281_v53 = vmul.f32 %v2249_v24, %v2249_v24  ;;  %v2311_v44 = vadd.f32 %v2310_v50, %v2280_v41  ;;  %v2403_v23 = vsub.f32 %v4346_v32, %v4378_v35  ;;  %v2432_v14 = vmul.f32 %v2400_v42, %v2400_v42  ;;  %v4267_v49 = vld [vmem:[%s5192_s27 + $0xba0] sm:$0xff]  ;;  %v4270_v63 = vld [vmem:[%s5192_s27 + $0xbb8] sm:$0xff]  ;;  %v4348_v42 = vld [vmem:[%s5186_s9 + $0xd28] sm:$0xff] }
 0x17f   : > { %v2433_v19 = vmul.f32 %v2401_v52, %v2401_v52  ;;  %v1682_v45 = vadd.f32 %v1681_v48, %v8138_v36  ;;  %v6967_v15 = vmul.f32 %v6889_v22, %v6889_v22  ;;  %v6971_v58 = vmul.f32 %v6893_v20, %v6893_v20  ;;  %v4239_v43 = vld [vmem:[%s5186_s9 + $0xbc0] sm:$0xff]  ;;  %v4380_v52 = vld [vmem:[%s5192_s27 + $0xd28] sm:$0xff]  ;;  %v4241_v48 = vld [vmem:[%s5186_s9 + $0xbd0] sm:$0xff] }
 0x180   : > { %v1998_v61 = vadd.f32 %v1997_v30, %v1967_v62  ;;  %v2095_v16 = vsub.f32 %v4234_v29, %v4266_v1  ;;  %v2126_v28 = vmul.f32 %v2094_v54, %v2094_v54  ;;  %v2156_v22 = vadd.f32 %v2155_v38, %v2125_v33  ;;  %v4293_v54 = vld [vmem:[%s5186_s9 + $0xc70] sm:$0xff]  ;;  %v8139_v38 = vld [vmem:[#allocation11_spill] sm:$0xff] }
 0x181   : > { %v2434_v17 = vmul.f32 %v2402_v31, %v2402_v31  ;;  %v1841_v20 = vadd.f32 %v1840_v26, %v6769_v57  ;;  %v6982_v62 = vmul.f32 %v6904_v21, %v6904_v21  ;;  %v2251_v24 = vsub.f32 %v4292_v60, %v4324_v34  ;;  %v4325_v33 = vld [vmem:[%s5192_s27 + $0xc70] sm:$0xff]  ;;  %v4271_v26 = vld [vmem:[%s5192_s27 + $0xbc0] sm:$0xff]  ;;  %v4272_v29 = vld [vmem:[%s5192_s27 + $0xbc8] sm:$0xff] }
 0x182   : > { %v2404_v6 = vsub.f32 %v4347_v2, %v4379_v0  ;;  %v2282_v41 = vmul.f32 %v2250_v8, %v2250_v8  ;;  %v2312_v50 = vadd.f32 %v2311_v44, %v2281_v53  ;;  %v2435_v57 = vmul.f32 %v2403_v23, %v2403_v23  ;;  %v4273_v1 = vld [vmem:[%s5192_s27 + $0xbd0] sm:$0xff]  ;;  %v4242_v34 = vld [vmem:[%s5186_s9 + $0xbd8] sm:$0xff]  ;;  %v4243_v44 = vld [vmem:[%s5186_s9 + $0xbe0] sm:$0xff] }
 0x183   : > { %v2464_v7 = vadd.f32 %v2433_v19, %v2432_v14  ;;  %v1999_v21 = vadd.f32 %v1998_v61, %v6918_v3  ;;  %v2096_v30 = vsub.f32 %v4235_v9, %v4267_v49  ;;  %v2097_v32 = vsub.f32 %v4236_v46, %v4268_v10  ;;  %v4274_v2 = vld [vmem:[%s5192_s27 + $0xbd8] sm:$0xff]  ;;  %v4244_v19 = vld [vmem:[%s5186_s9 + $0xbe8] sm:$0xff]  ;;  %v4245_v36 = vld [vmem:[%s5186_s9 + $0xbf0] sm:$0xff] }
 0x184   : > { %v2098_v35 = vsub.f32 %v4237_v27, %v4269_v12  ;;  %v1683_v31 = vadd.f32 %v1682_v45, %v8139_v38  ;;  %v2127_v60 = vmul.f32 %v2095_v16, %v2095_v16  ;;  %v2157_v8 = vadd.f32 %v2156_v22, %v2126_v28  ;;  %v4275_v45 = vld [vmem:[%s5192_s27 + $0xbe0] sm:$0xff]  ;;  %v4349_v27 = vld [vmem:[%s5186_s9 + $0xd30] sm:$0xff]  ;;  %v4246_v12 = vld [vmem:[%s5186_s9 + $0xbf8] sm:$0xff] }
 0x185   : > { %v2465_v3 = vadd.f32 %v2464_v7, %v2434_v17  ;;  %v1842_v53 = vadd.f32 %v1841_v20, %v6773_v4  ;;  %v2099_v0 = vsub.f32 %v4238_v37, %v4270_v63  ;;  %v2405_v23 = vsub.f32 %v4348_v42, %v4380_v52  ;;  %v4381_v4 = vld [vmem:[%s5192_s27 + $0xd30] sm:$0xff]  ;;  %v4294_v17 = vld [vmem:[%s5186_s9 + $0xc78] sm:$0xff]  ;;  %v4276_v63 = vld [vmem:[%s5192_s27 + $0xbe8] sm:$0xff] }
 0x186   : > { %v2436_v14 = vmul.f32 %v2404_v6, %v2404_v6  ;;  %v2252_v61 = vsub.f32 %v4293_v54, %v4325_v33  ;;  %v2283_v9 = vmul.f32 %v2251_v24, %v2251_v24  ;;  %v2313_v46 = vadd.f32 %v2312_v50, %v2282_v41  ;;  %v4326_v20 = vld [vmem:[%s5192_s27 + $0xc78] sm:$0xff]  ;;  %v8140_v37 = vld [vmem:[#allocation12_spill] sm:$0xff] }
 0x187   : > { %v2466_v49 = vadd.f32 %v2465_v3, %v2435_v57  ;;  %v2000_v10 = vadd.f32 %v1999_v21, %v6922_v55  ;;  %v2100_v16 = vsub.f32 %v4239_v43, %v4271_v26  ;;  %v2101_v28 = vsub.f32 %v4240_v40, %v4272_v29  ;;  %v4277_v42 = vld [vmem:[%s5192_s27 + $0xbf0] sm:$0xff]  ;;  %v4278_v52 = vld [vmem:[%s5192_s27 + $0xbf8] sm:$0xff] }
 0x188   : > { %v2102_v22 = vsub.f32 %v4241_v48, %v4273_v1  ;;  %v1684_v6 = vadd.f32 %v1683_v31, %v8140_v37  ;;  %v2103_v24 = vsub.f32 %v4242_v34, %v4274_v2  ;;  %v2128_v41 = vmul.f32 %v2096_v30, %v2096_v30  ;;  %v4350_v33 = vld [vmem:[%s5186_s9 + $0xd38] sm:$0xff]  ;;  %v4295_v1 = vld [vmem:[%s5186_s9 + $0xc80] sm:$0xff] }
 0x189   : > { %v2158_v50 = vadd.f32 %v2157_v8, %v2127_v60  ;;  %v2104_v57 = vsub.f32 %v4243_v44, %v4275_v45  ;;  %v2406_v55 = vsub.f32 %v4349_v27, %v4381_v4  ;;  %v2437_v7 = vmul.f32 %v2405_v23, %v2405_v23  ;;  %v4382_v38 = vld [vmem:[%s5192_s27 + $0xd38] sm:$0xff]  ;;  %v4327_v60 = vld [vmem:[%s5192_s27 + $0xc80] sm:$0xff]  ;;  %v4296_v44 = vld [vmem:[%s5186_s9 + $0xc88] sm:$0xff] }
 0x18a   : > { %v2467_v43 = vadd.f32 %v2466_v49, %v2436_v14  ;;  %v1843_v40 = vadd.f32 %v1842_v53, %v6777_v39  ;;  %v2253_v21 = vsub.f32 %v4294_v17, %v4326_v20  ;;  %v2284_v48 = vmul.f32 %v2252_v61, %v2252_v61  ;;  %v4299_v27 = vld [vmem:[%s5186_s9 + $0xca0] sm:$0xff]  ;;  %v4300_v4 = vld [vmem:[%s5186_s9 + $0xca8] sm:$0xff]  ;;  %v4301_v49 = vld [vmem:[%s5186_s9 + $0xcb0] sm:$0xff] }
 0x18b   : > { %v2314_v54 = vadd.f32 %v2313_v46, %v2283_v9  ;;  %v2001_v31 = vadd.f32 %v2000_v10, %v6931_v59  ;;  %v2105_v26 = vsub.f32 %v4244_v19, %v4276_v63  ;;  %v2106_v30 = vsub.f32 %v4245_v36, %v4277_v42  ;;  %v4297_v19 = vld [vmem:[%s5186_s9 + $0xc90] sm:$0xff]  ;;  %v4298_v36 = vld [vmem:[%s5186_s9 + $0xc98] sm:$0xff]  ;;  %v4328_v10 = vld [vmem:[%s5192_s27 + $0xc88] sm:$0xff] }
 0x18c   : > { %v2107_v29 = vsub.f32 %v4246_v12, %v4278_v52  ;;  %v7022_v8 = vadd.f32 %v1684_v6, %v6901_v25  ;;  %v2129_v39 = vmul.f32 %v2097_v32, %v2097_v32  ;;  %v2130_v3 = vmul.f32 %v2098_v35, %v2098_v35  ;;  %v4351_v35 = vld [vmem:[%s5186_s9 + $0xd40] sm:$0xff]  ;;  %v4329_v20 = vld [vmem:[%s5192_s27 + $0xc90] sm:$0xff]  ;;  %v4332_v42 = vld [vmem:[%s5192_s27 + $0xca8] sm:$0xff] }
 0x18d   : > { %v2159_v53 = vadd.f32 %v2158_v50, %v2128_v41  ;;  %v7024_v34 = vmul.f32 %v2099_v0, %v2099_v0  ;;  %v2407_v59 = vsub.f32 %v4350_v33, %v4382_v38  ;;  %v2438_v2 = vmul.f32 %v2406_v55, %v2406_v55  ;;  %v4383_v0 = vld [vmem:[%s5192_s27 + $0xd40] sm:$0xff]  ;;  %v4333_v52 = vld [vmem:[%s5192_s27 + $0xcb0] sm:$0xff]  ;;  %v4304_v55 = vld [vmem:[%s5186_s9 + $0xcc8] sm:$0xff] }
 0x18e   : > { %v2468_v23 = vadd.f32 %v2467_v43, %v2437_v7  ;;  %v1844_v14 = vadd.f32 %v1843_v40, %v6786_v11  ;;  %v2254_v25 = vsub.f32 %v4295_v1, %v4327_v60  ;;  %v2285_v45 = vmul.f32 %v2253_v21, %v2253_v21  ;;  %v4303_v6 = vld [vmem:[%s5186_s9 + $0xcc0] sm:$0xff]  ;;  %v4305_v7 = vld [vmem:[%s5186_s9 + $0xcd0] sm:$0xff]  ;;  %v4306_v43 = vld [vmem:[%s5186_s9 + $0xcd8] sm:$0xff] }
 0x18f   : > { %v2315_v32 = vadd.f32 %v2314_v54, %v2284_v48  ;;  %v2002_v61 = vadd.f32 %v2001_v31, %v6935_v51  ;;  %v7033_v9 = vmul.f32 %v2100_v16, %v2100_v16  ;;  %v7035_v46 = vmul.f32 %v2101_v28, %v2101_v28  ;;  %v4302_v28 = vld [vmem:[%s5186_s9 + $0xcb8] sm:$0xff]  ;;  %v4331_v63 = vld [vmem:[%s5192_s27 + $0xca0] sm:$0xff]  ;;  %v4352_v33 = vld [vmem:[%s5186_s9 + $0xd48] sm:$0xff] }
 0x190   : > { %v7037_v11 = vmul.f32 %v2102_v22, %v2102_v22  ;;  %v7043_v12 = vmul.f32 %v2103_v24, %v2103_v24  ;;  %v7045_v17 = vmul.f32 %v2104_v57, %v2104_v57  ;;  %v7047_v51 = vmul.f32 %v2105_v26, %v2105_v26  ;;  %v4330_v22 = vld [vmem:[%s5192_s27 + $0xc98] sm:$0xff]  ;;  %v4384_v38 = vld [vmem:[%s5192_s27 + $0xd48] sm:$0xff]  ;;  %v4309_v1 = vld [vmem:[%s5186_s9 + $0xcf0] sm:$0xff] }
 0x191   : > { %v2160_v16 = vadd.f32 %v2159_v53, %v2129_v39  ;;  %v7052_v37 = vmul.f32 %v2106_v30, %v2106_v30  ;;  %v2408_v24 = vsub.f32 %v4351_v35, %v4383_v0  ;;  %v2439_v41 = vmul.f32 %v2407_v59, %v2407_v59  ;;  %v4334_v40 = vld [vmem:[%s5192_s27 + $0xcb8] sm:$0xff]  ;;  %v4308_v30 = vld [vmem:[%s5186_s9 + $0xce8] sm:$0xff]  ;;  %v4335_v60 = vld [vmem:[%s5192_s27 + $0xcc0] sm:$0xff] }
 0x192   : > { %v2469_v50 = vadd.f32 %v2468_v23, %v2438_v2  ;;  %v1845_v57 = vadd.f32 %v1844_v14, %v6797_v13  ;;  %v2255_v21 = vsub.f32 %v4296_v44, %v4328_v10  ;;  %v2286_v48 = vmul.f32 %v2254_v25, %v2254_v25  ;;  %v4307_v13 = vld [vmem:[%s5186_s9 + $0xce0] sm:$0xff]  ;;  %v4310_v59 = vld [vmem:[%s5186_s9 + $0xcf8] sm:$0xff]  ;;  %v4336_v2 = vld [vmem:[%s5192_s27 + $0xcc8] sm:$0xff] }
 0x193   : > { %v2316_v54 = vadd.f32 %v2315_v32, %v2285_v45  ;;  %v2003_v31 = vadd.f32 %v2002_v61, %v6945_v56  ;;  %v7066_v26 = vmul.f32 %v2107_v29, %v2107_v29  ;;  %v2256_v39 = vsub.f32 %v4297_v19, %v4329_v20  ;;  %v4337_v23 = vld [vmem:[%s5192_s27 + $0xcd0] sm:$0xff]  ;;  %v4338_v14 = vld [vmem:[%s5192_s27 + $0xcd8] sm:$0xff]  ;;  %v4339_v45 = vld [vmem:[%s5192_s27 + $0xce0] sm:$0xff] }
 0x194   : > { %v2257_v53 = vsub.f32 %v4298_v36, %v4330_v22  ;;  %v2161_v44 = vadd.f32 %v2160_v16, %v2130_v3  ;;  %v2258_v25 = vsub.f32 %v4299_v27, %v4331_v63  ;;  %v2259_v56 = vsub.f32 %v4300_v4, %v4332_v42  ;;  %v4340_v32 = vld [vmem:[%s5192_s27 + $0xce8] sm:$0xff]  ;;  %v4341_v35 = vld [vmem:[%s5192_s27 + $0xcf0] sm:$0xff]  ;;  %v4342_v3 = vld [vmem:[%s5192_s27 + $0xcf8] sm:$0xff] }
 0x195   : > { %8141 = vst [vmem:[#allocation13_spill] sm:$0xff] %v7066_v26  ;;  %v2260_v29 = vsub.f32 %v4301_v49, %v4333_v52  ;;  %v2261_v0 = vsub.f32 %v4302_v28, %v4334_v40  ;;  %v2409_v61 = vsub.f32 %v4352_v33, %v4384_v38  ;;  %v2440_v10 = vmul.f32 %v2408_v24, %v2408_v24  ;;  %v4353_v22 = vld [vmem:[%s5186_s9 + $0xd50] sm:$0xff]  ;;  %v4440_v33 = vld [vmem:[%s5192_s27 + $0xe08] sm:$0xff] }
 0x196   : > { %v2470_v26 = vadd.f32 %v2469_v50, %v2439_v41  ;;  %v1846_v19 = vadd.f32 %v1845_v57, %v6805_v18  ;;  %v2262_v36 = vsub.f32 %v4303_v6, %v4335_v60  ;;  %v2287_v16 = vmul.f32 %v2255_v21, %v2255_v21  ;;  %v4385_v27 = vld [vmem:[%s5192_s27 + $0xd50] sm:$0xff]  ;;  %v4354_v6 = vld [vmem:[%s5186_s9 + $0xd58] sm:$0xff]  ;;  %v4355_v60 = vld [vmem:[%s5186_s9 + $0xd60] sm:$0xff] }
 0x197   : > { %v2317_v20 = vadd.f32 %v2316_v54, %v2286_v48  ;;  %v2004_v4 = vadd.f32 %v2003_v31, %v6949_v47  ;;  %v2263_v49 = vsub.f32 %v4304_v55, %v4336_v2  ;;  %v2264_v63 = vsub.f32 %v4305_v7, %v4337_v23  ;;  %v4386_v50 = vld [vmem:[%s5192_s27 + $0xd58] sm:$0xff]  ;;  %v4407_v48 = vld [vmem:[%s5186_s9 + $0xe00] sm:$0xff] }
 0x198   : > { %v2265_v42 = vsub.f32 %v4306_v43, %v4338_v14  ;;  %v2162_v28 = vadd.f32 %v2161_v44, %v7024_v34  ;;  %v2266_v52 = vsub.f32 %v4307_v13, %v4339_v45  ;;  %v2267_v18 = vsub.f32 %v4308_v30, %v4340_v32  ;;  %v4408_v43 = vld [vmem:[%s5186_s9 + $0xe08] sm:$0xff]  ;;  %v4439_v54 = vld [vmem:[%s5192_s27 + $0xe00] sm:$0xff]  ;;  %v4358_v44 = vld [vmem:[%s5186_s9 + $0xd78] sm:$0xff] }
 0x199   : > { %v2268_v24 = vsub.f32 %v4309_v1, %v4341_v35  ;;  %v2269_v41 = vsub.f32 %v4310_v59, %v4342_v3  ;;  %v2410_v57 = vsub.f32 %v4353_v22, %v4385_v27  ;;  %v2441_v40 = vmul.f32 %v2409_v61, %v2409_v61  ;;  %v4387_v59 = vld [vmem:[%s5192_s27 + $0xd60] sm:$0xff]  ;;  %v4360_v35 = vld [vmem:[%s5186_s9 + $0xd88] sm:$0xff]  ;;  %v4409_v61 = vld [vmem:[%s5186_s9 + $0xe10] sm:$0xff] }
 0x19a   : > { %v2471_v21 = vadd.f32 %v2470_v26, %v2440_v10  ;;  %v7089_v47 = vadd.f32 %v1846_v19, %v7022_v8  ;;  %v2288_v55 = vmul.f32 %v2256_v39, %v2256_v39  ;;  %v2289_v34 = vmul.f32 %v2257_v53, %v2257_v53  ;;  %v4356_v53 = vld [vmem:[%s5186_s9 + $0xd68] sm:$0xff]  ;;  %v4359_v32 = vld [vmem:[%s5186_s9 + $0xd80] sm:$0xff]  ;;  %v4441_v10 = vld [vmem:[%s5192_s27 + $0xe10] sm:$0xff] }
 0x19b   : > { %v2318_v7 = vadd.f32 %v2317_v20, %v2287_v16  ;;  %v2005_v38 = vadd.f32 %v2004_v4, %v6956_v5  ;;  %v7095_v31 = vmul.f32 %v2258_v25, %v2258_v25  ;;  %v7097_v26 = vmul.f32 %v2259_v56, %v2259_v56  ;;  %v4357_v5 = vld [vmem:[%s5186_s9 + $0xd70] sm:$0xff]  ;;  %v4362_v20 = vld [vmem:[%s5186_s9 + $0xd98] sm:$0xff]  ;;  %v4363_v22 = vld [vmem:[%s5186_s9 + $0xda0] sm:$0xff] }
 0x19c   : > { %v7099_v13 = vmul.f32 %v2260_v29, %v2260_v29  ;;  %v2163_v8 = vadd.f32 %v2162_v28, %v7033_v9  ;;  %v7102_v30 = vmul.f32 %v2261_v0, %v2261_v0  ;;  %v7104_v1 = vmul.f32 %v2262_v36, %v2262_v36  ;;  %v4361_v0 = vld [vmem:[%s5186_s9 + $0xd90] sm:$0xff]  ;;  %v4388_v27 = vld [vmem:[%s5192_s27 + $0xd68] sm:$0xff] }
 0x19d   : > { %v2411_v39 = vsub.f32 %v4354_v6, %v4386_v50  ;;  %v2442_v2 = vmul.f32 %v2410_v57, %v2410_v57  ;;  %v2472_v23 = vadd.f32 %v2471_v21, %v2441_v40  ;;  %v2562_v14 = vsub.f32 %v4407_v48, %v4439_v54  ;;  %v4389_v4 = vld [vmem:[%s5192_s27 + $0xd70] sm:$0xff]  ;;  %v4392_v28 = vld [vmem:[%s5192_s27 + $0xd88] sm:$0xff]  ;;  %v4366_v57 = vld [vmem:[%s5186_s9 + $0xdb8] sm:$0xff] }
 0x19e   : > { %v2563_v9 = vsub.f32 %v4408_v43, %v4440_v33  ;;  %v7111_v25 = vmul.f32 %v2263_v49, %v2263_v49  ;;  %v7113_v56 = vmul.f32 %v2264_v63, %v2264_v63  ;;  %v7115_v29 = vmul.f32 %v2265_v42, %v2265_v42  ;;  %v4390_v49 = vld [vmem:[%s5192_s27 + $0xd78] sm:$0xff]  ;;  %v4364_v6 = vld [vmem:[%s5186_s9 + $0xda8] sm:$0xff]  ;;  %v4365_v50 = vld [vmem:[%s5186_s9 + $0xdb0] sm:$0xff] }
 0x19f   : > { %v2319_v45 = vadd.f32 %v2318_v7, %v2288_v55  ;;  %v2006_v19 = vadd.f32 %v2005_v38, %v6967_v15  ;;  %v7123_v3 = vmul.f32 %v2266_v52, %v2266_v52  ;;  %v7125_v36 = vmul.f32 %v2267_v18, %v2267_v18  ;;  %v4391_v15 = vld [vmem:[%s5192_s27 + $0xd80] sm:$0xff]  ;;  %v4393_v52 = vld [vmem:[%s5192_s27 + $0xd90] sm:$0xff]  ;;  %v4394_v40 = vld [vmem:[%s5192_s27 + $0xd98] sm:$0xff] }
 0x1a0   : > { %8142 = vst [vmem:[#allocation14_spill] sm:$0xff] %v7111_v25  ;;  %8143 = vst [vmem:[#allocation19_spill] sm:$0xff] %v7113_v56  ;;  %v7127_v16 = vmul.f32 %v2268_v24, %v2268_v24  ;;  %v2164_v63 = vadd.f32 %v2163_v8, %v7035_v46  ;;  %v7135_v42 = vmul.f32 %v2269_v41, %v2269_v41  ;;  %v4395_v21 = vld [vmem:[%s5192_s27 + $0xda0] sm:$0xff]  ;;  %v4368_v54 = vld [vmem:[%s5186_s9 + $0xdc8] sm:$0xff] }
 0x1a1   : > { %8144 = vst [vmem:[#allocation15_spill] sm:$0xff] %v7115_v29  ;;  %8145 = vst [vmem:[#allocation20_spill] sm:$0xff] %v7123_v3  ;;  %v2412_v18 = vsub.f32 %v4355_v60, %v4387_v59  ;;  %v2443_v24 = vmul.f32 %v2411_v39, %v2411_v39  ;;  %v2473_v46 = vadd.f32 %v2472_v23, %v2442_v2  ;;  %v4367_v43 = vld [vmem:[%s5186_s9 + $0xdc0] sm:$0xff]  ;;  %v4369_v33 = vld [vmem:[%s5186_s9 + $0xdd0] sm:$0xff] }
 0x1a2   : > { %8146 = vst [vmem:[#allocation21_spill] sm:$0xff] %v7125_v36  ;;  %8147 = vst [vmem:[#allocation22_spill] sm:$0xff] %v7127_v16  ;;  %v2564_v41 = vsub.f32 %v4409_v61, %v4441_v10  ;;  %v2594_v48 = vmul.f32 %v2562_v14, %v2562_v14  ;;  %v2595_v55 = vmul.f32 %v2563_v9, %v2563_v9  ;;  %v4410_v39 = vld [vmem:[%s5186_s9 + $0xe18] sm:$0xff]  ;;  %v4371_v14 = vld [vmem:[%s5186_s9 + $0xde0] sm:$0xff] }
 0x1a3   : > { %8148 = vst [vmem:[#allocation16_spill] sm:$0xff] %v7135_v42  ;;  %v2320_v7 = vadd.f32 %v2319_v45, %v2289_v34  ;;  %v2413_v38 = vsub.f32 %v4356_v53, %v4388_v27  ;;  %v2414_v8 = vsub.f32 %v4357_v5, %v4389_v4  ;;  %v2415_v60 = vsub.f32 %v4358_v44, %v4390_v49  ;;  %v4442_v59 = vld [vmem:[%s5192_s27 + $0xe18] sm:$0xff]  ;;  %v4396_v9 = vld [vmem:[%s5192_s27 + $0xda8] sm:$0xff]  ;;  %v4397_v34 = vld [vmem:[%s5192_s27 + $0xdb0] sm:$0xff] }
 0x1a4   : > { %v2007_v2 = vadd.f32 %v2006_v19, %v6971_v58  ;;  %v4370_v23 = vld [vmem:[%s5186_s9 + $0xdd8] sm:$0xff]  ;;  %v2416_v61 = vsub.f32 %v4359_v32, %v4391_v15  ;;  %v2417_v10 = vsub.f32 %v4360_v35, %v4392_v28  ;;  %v2418_v53 = vsub.f32 %v4361_v0, %v4393_v52  ;;  %v4399_v44 = vld [vmem:[%s5192_s27 + $0xdc0] sm:$0xff]  ;;  %v4400_v27 = vld [vmem:[%s5192_s27 + $0xdc8] sm:$0xff] }
 0x1a5   : > { %v4398_v45 = vld [vmem:[%s5192_s27 + $0xdb8] sm:$0xff]  ;;  %v2165_v5 = vadd.f32 %v2164_v63, %v7037_v11  ;;  %v4401_v4 = vld [vmem:[%s5192_s27 + $0xdd0] sm:$0xff]  ;;  %v2419_v49 = vsub.f32 %v4362_v20, %v4394_v40  ;;  %v2420_v58 = vsub.f32 %v4363_v22, %v4395_v21  ;;  %v2444_v19 = vmul.f32 %v2412_v18, %v2412_v18  ;;  %v4372_v42 = vld [vmem:[%s5186_s9 + $0xde8] sm:$0xff] }
 0x1a6   : > { %v4373_v16 = vld [vmem:[%s5186_s9 + $0xdf0] sm:$0xff]  ;;  %v4402_v36 = vld [vmem:[%s5192_s27 + $0xdd8] sm:$0xff]  ;;  %v4403_v32 = vld [vmem:[%s5192_s27 + $0xde0] sm:$0xff]  ;;  %v2474_v35 = vadd.f32 %v2473_v46, %v2443_v24  ;;  %v2565_v0 = vsub.f32 %v4410_v39, %v4442_v59  ;;  %v2596_v15 = vmul.f32 %v2564_v41, %v2564_v41  ;;  %v2626_v11 = vadd.f32 %v2595_v55, %v2594_v48 }
 0x1a7   : > { %v2321_v63 = vadd.f32 %v2320_v7, %v7095_v31  ;;  %v4374_v28 = vld [vmem:[%s5186_s9 + $0xdf8] sm:$0xff]  ;;  %v2421_v52 = vsub.f32 %v4364_v6, %v4396_v9  ;;  %v2422_v20 = vsub.f32 %v4365_v50, %v4397_v34  ;;  %v2423_v40 = vsub.f32 %v4366_v57, %v4398_v45  ;;  %v4411_v22 = vld [vmem:[%s5186_s9 + $0xe20] sm:$0xff]  ;;  %v4404_v3 = vld [vmem:[%s5192_s27 + $0xde8] sm:$0xff] }
 0x1a8   : > { %v4443_v21 = vld [vmem:[%s5192_s27 + $0xe20] sm:$0xff]  ;;  %v2008_v18 = vadd.f32 %v2007_v2, %v6982_v62  ;;  %v4405_v29 = vld [vmem:[%s5192_s27 + $0xdf0] sm:$0xff]  ;;  %v4406_v56 = vld [vmem:[%s5192_s27 + $0xdf8] sm:$0xff]  ;;  %v2424_v25 = vsub.f32 %v4367_v43, %v4399_v44  ;;  %v2425_v24 = vsub.f32 %v4368_v54, %v4400_v27  ;;  %v2426_v46 = vsub.f32 %v4369_v33, %v4401_v4 }
 0x1a9   : > { %v2166_v41 = vadd.f32 %v2165_v5, %v7043_v12  ;;  %v2427_v48 = vsub.f32 %v4370_v23, %v4402_v36  ;;  %v2428_v31 = vsub.f32 %v4371_v14, %v4403_v32  ;;  %v2445_v55 = vmul.f32 %v2413_v38, %v2413_v38  ;;  %v4412_v43 = vld [vmem:[%s5186_s9 + $0xe28] sm:$0xff]  ;;  %v4415_v45 = vld [vmem:[%s5186_s9 + $0xe40] sm:$0xff]  ;;  %v4445_v5 = vld [vmem:[%s5192_s27 + $0xe30] sm:$0xff] }
 0x1aa   : > { %v2475_v6 = vadd.f32 %v2474_v35, %v2444_v19  ;;  %v2566_v50 = vsub.f32 %v4411_v22, %v4443_v21  ;;  %v2597_v57 = vmul.f32 %v2565_v0, %v2565_v0  ;;  %v2627_v7 = vadd.f32 %v2626_v11, %v2596_v15  ;;  %v4444_v9 = vld [vmem:[%s5192_s27 + $0xe28] sm:$0xff]  ;;  %v4421_v19 = vld [vmem:[%s5186_s9 + $0xe70] sm:$0xff]  ;;  %v4446_v32 = vld [vmem:[%s5192_s27 + $0xe38] sm:$0xff] }
 0x1ab   : > { %v2322_v62 = vadd.f32 %v2321_v63, %v7097_v26  ;;  %v2429_v39 = vsub.f32 %v4372_v42, %v4404_v3  ;;  %v2430_v59 = vsub.f32 %v4373_v16, %v4405_v29  ;;  %v2431_v2 = vsub.f32 %v4374_v28, %v4406_v56  ;;  %v4413_v3 = vld [vmem:[%s5186_s9 + $0xe30] sm:$0xff]  ;;  %v4414_v16 = vld [vmem:[%s5186_s9 + $0xe38] sm:$0xff]  ;;  %v4447_v35 = vld [vmem:[%s5192_s27 + $0xe40] sm:$0xff] }
 0x1ac   : > { %v7177_v54 = vadd.f32 %v2008_v18, %v7089_v47  ;;  %v2446_v12 = vmul.f32 %v2414_v8, %v2414_v8  ;;  %v7179_v36 = vmul.f32 %v2415_v60, %v2415_v60  ;;  %v7181_v33 = vmul.f32 %v2416_v61, %v2416_v61  ;;  %v4416_v61 = vld [vmem:[%s5186_s9 + $0xe48] sm:$0xff]  ;;  %v4422_v63 = vld [vmem:[%s5186_s9 + $0xe78] sm:$0xff]  ;;  %v4423_v22 = vld [vmem:[%s5186_s9 + $0xe80] sm:$0xff] }
 0x1ad   : > { %v2167_v38 = vadd.f32 %v2166_v41, %v7045_v17  ;;  %v7184_v26 = vmul.f32 %v2417_v10, %v2417_v10  ;;  %v7186_v29 = vmul.f32 %v2418_v53, %v2418_v53  ;;  %v7188_v56 = vmul.f32 %v2419_v49, %v2419_v49  ;;  %v4417_v10 = vld [vmem:[%s5186_s9 + $0xe50] sm:$0xff]  ;;  %v4418_v53 = vld [vmem:[%s5186_s9 + $0xe58] sm:$0xff]  ;;  %v4419_v49 = vld [vmem:[%s5186_s9 + $0xe60] sm:$0xff] }
 0x1ae   : > { %v2476_v47 = vadd.f32 %v2475_v6, %v2445_v55  ;;  %v2567_v42 = vsub.f32 %v4412_v43, %v4444_v9  ;;  %v2598_v8 = vmul.f32 %v2566_v50, %v2566_v50  ;;  %v2628_v60 = vadd.f32 %v2627_v7, %v2597_v57  ;;  %v4448_v28 = vld [vmem:[%s5192_s27 + $0xe48] sm:$0xff]  ;;  %v4451_v18 = vld [vmem:[%s5192_s27 + $0xe60] sm:$0xff]  ;;  %v4426_v57 = vld [vmem:[%s5186_s9 + $0xe98] sm:$0xff] }
 0x1af   : > { %8149 = vst [vmem:[#allocation23_spill] sm:$0xff] %v7186_v29  ;;  %8150 = vst [vmem:[#allocation24_spill] sm:$0xff] %v7188_v56  ;;  %v2323_v17 = vadd.f32 %v2322_v62, %v7099_v13  ;;  %v7193_v23 = vmul.f32 %v2420_v58, %v2420_v58  ;;  %v7195_v14 = vmul.f32 %v2421_v52, %v2421_v52  ;;  %v4420_v58 = vld [vmem:[%s5186_s9 + $0xe68] sm:$0xff]  ;;  %v4449_v52 = vld [vmem:[%s5192_s27 + $0xe50] sm:$0xff] }
 0x1b0   : > { %v7197_v34 = vmul.f32 %v2422_v20, %v2422_v20  ;;  %v7204_v44 = vmul.f32 %v2423_v40, %v2423_v40  ;;  %v7206_v13 = vmul.f32 %v2424_v25, %v2424_v25  ;;  %v7208_v27 = vmul.f32 %v2425_v24, %v2425_v24  ;;  %v4450_v20 = vld [vmem:[%s5192_s27 + $0xe58] sm:$0xff]  ;;  %v4424_v21 = vld [vmem:[%s5186_s9 + $0xe88] sm:$0xff]  ;;  %v4427_v7 = vld [vmem:[%s5186_s9 + $0xea0] sm:$0xff] }
 0x1b1   : > { %8151 = vst [vmem:[#allocation25_spill] sm:$0xff] %v7193_v23  ;;  %8152 = vst [vmem:[#allocation26_spill] sm:$0xff] %v7195_v14  ;;  %v7210_v4 = vmul.f32 %v2426_v46, %v2426_v46  ;;  %v2168_v0 = vadd.f32 %v2167_v38, %v7047_v51  ;;  %v7218_v15 = vmul.f32 %v2427_v48, %v2427_v48  ;;  %v4425_v51 = vld [vmem:[%s5186_s9 + $0xe90] sm:$0xff]  ;;  %v4452_v24 = vld [vmem:[%s5192_s27 + $0xe68] sm:$0xff] }
 0x1b2   : > { %8153 = vst [vmem:[#allocation27_spill] sm:$0xff] %v7197_v34  ;;  %8154 = vst [vmem:[#allocation17_spill] sm:$0xff] %v7204_v44  ;;  %v7220_v25 = vmul.f32 %v2428_v31, %v2428_v31  ;;  %v7222_v11 = vmul.f32 %v2429_v39, %v2429_v39  ;;  %v2477_v40 = vadd.f32 %v2476_v47, %v2446_v12  ;;  %v4453_v46 = vld [vmem:[%s5192_s27 + $0xe70] sm:$0xff]  ;;  %v4428_v62 = vld [vmem:[%s5186_s9 + $0xea8] sm:$0xff] }
 0x1b3   : > { %8155 = vst [vmem:[#allocation18_spill] sm:$0xff] %v7206_v13  ;;  %8156 = vst [vmem:[#allocation11_spill] sm:$0xff] %v7208_v27  ;;  %v2568_v41 = vsub.f32 %v4413_v3, %v4445_v5  ;;  %v2599_v48 = vmul.f32 %v2567_v42, %v2567_v42  ;;  %v2629_v31 = vadd.f32 %v2628_v60, %v2598_v8  ;;  %v4429_v39 = vld [vmem:[%s5186_s9 + $0xeb0] sm:$0xff]  ;;  %v4454_v43 = vld [vmem:[%s5192_s27 + $0xe78] sm:$0xff] }
 0x1b4   : > { %8157 = vst [vmem:[#allocation12_spill] sm:$0xff] %v7210_v4  ;;  %8158 = vst [vmem:[#allocation28_spill] sm:$0xff] %v7218_v15  ;;  %v2324_v55 = vadd.f32 %v2323_v17, %v7102_v30  ;;  %v7235_v6 = vmul.f32 %v2430_v59, %v2430_v59  ;;  %v7237_v50 = vmul.f32 %v2431_v2, %v2431_v2  ;;  %v4455_v9 = vld [vmem:[%s5192_s27 + $0xe80] sm:$0xff]  ;;  %v4456_v12 = vld [vmem:[%s5192_s27 + $0xe88] sm:$0xff] }
 0x1b5   : > { %8159 = vst [vmem:[#allocation29_spill] sm:$0xff] %v7220_v25  ;;  %8160 = vst [vmem:[#allocation30_spill] sm:$0xff] %v7222_v11  ;;  %v2569_v38 = vsub.f32 %v4414_v16, %v4446_v32  ;;  %v4430_v47 = vld [vmem:[%s5186_s9 + $0xeb8] sm:$0xff]  ;;  %v4431_v3 = vld [vmem:[%s5186_s9 + $0xec0] sm:$0xff]  ;;  %v2570_v2 = vsub.f32 %v4415_v45, %v4447_v35  ;;  %v2571_v8 = vsub.f32 %v4416_v61, %v4448_v28 }
 0x1b6   : > { %8161 = vst [vmem:[#allocation31_spill] sm:$0xff] %v7235_v6  ;;  %8162 = vst [vmem:[#allocation32_spill] sm:$0xff] %v7237_v50  ;;  %v4457_v42 = vld [vmem:[%s5192_s27 + $0xe90] sm:$0xff]  ;;  %v4458_v30 = vld [vmem:[%s5192_s27 + $0xe98] sm:$0xff]  ;;  %v7251_v60 = vsub.f32 %v4417_v10, %v4449_v52  ;;  %v7253_v17 = vsub.f32 %v4418_v53, %v4450_v20  ;;  %v2169_v5 = vadd.f32 %v2168_v0, %v7052_v37 }
 0x1b7   : > { %v4459_v59 = vld [vmem:[%s5192_s27 + $0xea0] sm:$0xff]  ;;  %v4460_v16 = vld [vmem:[%s5192_s27 + $0xea8] sm:$0xff]  ;;  %v4461_v32 = vld [vmem:[%s5192_s27 + $0xeb0] sm:$0xff]  ;;  %v7259_v6 = vsub.f32 %v4419_v49, %v4451_v18  ;;  %v7261_v11 = vsub.f32 %v4420_v58, %v4452_v24  ;;  %v7263_v45 = vsub.f32 %v4421_v19, %v4453_v46  ;;  %v2478_v61 = vadd.f32 %v2477_v40, %v7179_v36 }
 0x1b8   : > { %v4462_v50 = vld [vmem:[%s5192_s27 + $0xeb8] sm:$0xff]  ;;  %v4432_v10 = vld [vmem:[%s5186_s9 + $0xec8] sm:$0xff]  ;;  %v4433_v53 = vld [vmem:[%s5186_s9 + $0xed0] sm:$0xff]  ;;  %v2577_v28 = vsub.f32 %v4422_v63, %v4454_v43  ;;  %v2600_v49 = vmul.f32 %v2568_v41, %v2568_v41  ;;  %v2630_v58 = vadd.f32 %v2629_v31, %v2599_v48  ;;  %v2325_v19 = vadd.f32 %v2324_v55, %v7104_v1 }
 0x1b9   : > { %8163 = vst [vmem:[#allocation33_spill] sm:$0xff] %v7263_v45  ;;  %v4434_v37 = vld [vmem:[%s5186_s9 + $0xed8] sm:$0xff]  ;;  %v4463_v35 = vld [vmem:[%s5192_s27 + $0xec0] sm:$0xff]  ;;  %v4464_v0 = vld [vmem:[%s5192_s27 + $0xec8] sm:$0xff]  ;;  %v2578_v24 = vsub.f32 %v4423_v22, %v4455_v9  ;;  %v2579_v46 = vsub.f32 %v4424_v21, %v4456_v12  ;;  %v2580_v25 = vsub.f32 %v4425_v51, %v4457_v42  ;;  %v2581_v31 = vsub.f32 %v4426_v57, %v4458_v30 }
 0x1ba   : > { %v4471_v52 = vld [vmem:[%s5186_s9 + $0xf00] sm:$0xff]  ;;  %v4436_v18 = vld [vmem:[%s5186_s9 + $0xee8] sm:$0xff]  ;;  %v4437_v36 = vld [vmem:[%s5186_s9 + $0xef0] sm:$0xff]  ;;  %v2582_v1 = vsub.f32 %v4427_v7, %v4459_v59  ;;  %v2583_v55 = vsub.f32 %v4428_v62, %v4460_v16  ;;  %v2584_v27 = vsub.f32 %v4429_v39, %v4461_v32  ;;  %v2585_v9 = vsub.f32 %v4430_v47, %v4462_v50 }
 0x1bb   : > { %v4435_v20 = vld [vmem:[%s5186_s9 + $0xee0] sm:$0xff]  ;;  %v4438_v40 = vld [vmem:[%s5186_s9 + $0xef8] sm:$0xff]  ;;  %v4472_v15 = vld [vmem:[%s5186_s9 + $0xf08] sm:$0xff]  ;;  %v2586_v21 = vsub.f32 %v4431_v3, %v4463_v35  ;;  %v2601_v51 = vmul.f32 %v2569_v38, %v2569_v38  ;;  %v2479_v12 = vadd.f32 %v2478_v61, %v7181_v33  ;;  %v2631_v42 = vadd.f32 %v2630_v58, %v2600_v49 }
 0x1bc   : > { %v4503_v4 = vld [vmem:[%s5192_s27 + $0xf00] sm:$0xff]  ;;  %v4504_v63 = vld [vmem:[%s5192_s27 + $0xf08] sm:$0xff]  ;;  %v4465_v43 = vld [vmem:[%s5192_s27 + $0xed0] sm:$0xff]  ;;  %v2587_v62 = vsub.f32 %v4432_v10, %v4464_v0  ;;  %v2603_v47 = vmul.f32 %v2571_v8, %v2571_v8  ;;  %v7329_v8 = vmul.f32 %v2577_v28, %v2577_v28  ;;  %v7340_v35 = vmul.f32 %v2581_v31, %v2581_v31 }
 0x1bd   : > { %v4466_v41 = vld [vmem:[%s5192_s27 + $0xed8] sm:$0xff]  ;;  %v4467_v48 = vld [vmem:[%s5192_s27 + $0xee0] sm:$0xff]  ;;  %v4468_v34 = vld [vmem:[%s5192_s27 + $0xee8] sm:$0xff]  ;;  %v2724_v29 = vsub.f32 %v4471_v52, %v4503_v4  ;;  %v2725_v45 = vsub.f32 %v4472_v15, %v4504_v63  ;;  %v2588_v39 = vsub.f32 %v4433_v53, %v4465_v43  ;;  %v2602_v15 = vmul.f32 %v2570_v2, %v2570_v2 }
 0x1be   : > { %v8164_v13 = vld [vmem:[#allocation13_spill] sm:$0xff]  ;;  %v4469_v14 = vld [vmem:[%s5192_s27 + $0xef0] sm:$0xff]  ;;  %v8165_v57 = vld [vmem:[#allocation14_spill] sm:$0xff]  ;;  %v7293_v30 = vsub.f32 %v4435_v20, %v4467_v48  ;;  %v7295_v50 = vsub.f32 %v4436_v18, %v4468_v34  ;;  %v2480_v59 = vadd.f32 %v2479_v12, %v7184_v26  ;;  %v7318_v26 = vmul.f32 %v7259_v6, %v7259_v6 }
 0x1bf   : > { %v2170_v44 = vadd.f32 %v2169_v5, %v8164_v13  ;;  %v4470_v22 = vld [vmem:[%s5192_s27 + $0xef8] sm:$0xff]  ;;  %v4473_v23 = vld [vmem:[%s5186_s9 + $0xf10] sm:$0xff]  ;;  %v2326_v7 = vadd.f32 %v2325_v19, %v8165_v57  ;;  %v7291_v13 = vsub.f32 %v4434_v37, %v4466_v41  ;;  %v7297_v38 = vsub.f32 %v4437_v36, %v4469_v14  ;;  %v8166_v61 = vld [vmem:[#allocation19_spill] sm:$0xff] }
 0x1c0   : > { %v4505_v56 = vld [vmem:[%s5192_s27 + $0xf10] sm:$0xff]  ;;  %v7299_v33 = vsub.f32 %v4438_v40, %v4470_v22  ;;  %v2632_v5 = vadd.f32 %v2631_v42, %v2601_v51  ;;  %v4474_v16 = vld [vmem:[%s5186_s9 + $0xf18] sm:$0xff]  ;;  %v2756_v32 = vmul.f32 %v2724_v29, %v2724_v29  ;;  %v2757_v14 = vmul.f32 %v2725_v45, %v2725_v45  ;;  %v4567_v45 = vld [vmem:[%s5192_s27 + $0x1000] sm:$0xff] }
 0x1c1   : > { %v7302_v4 = vadd.f32 %v2170_v44, %v7177_v54  ;;  %v2726_v3 = vsub.f32 %v4473_v23, %v4505_v56  ;;  %v4506_v34 = vld [vmem:[%s5192_s27 + $0xf18] sm:$0xff]  ;;  %v2327_v10 = vadd.f32 %v2326_v7, %v8166_v61  ;;  %v7310_v54 = vmul.f32 %v7251_v60, %v7251_v60  ;;  %v4535_v23 = vld [vmem:[%s5186_s9 + $0x1000] sm:$0xff]  ;;  %v4568_v6 = vld [vmem:[%s5192_s27 + $0x1008] sm:$0xff] }
 0x1c2   : > { %v7314_v56 = vmul.f32 %v7253_v17, %v7253_v17  ;;  %v7323_v29 = vmul.f32 %v7261_v11, %v7261_v11  ;;  %v8167_v44 = vld [vmem:[#allocation33_spill] sm:$0xff]  ;;  %v7331_v60 = vmul.f32 %v2578_v24, %v2578_v24  ;;  %v4536_v17 = vld [vmem:[%s5186_s9 + $0x1008] sm:$0xff]  ;;  %v7336_v53 = vmul.f32 %v2579_v46, %v2579_v46  ;;  %v4475_v11 = vld [vmem:[%s5186_s9 + $0xf20] sm:$0xff] }
 0x1c3   : > { %v7327_v2 = vmul.f32 %v8167_v44, %v8167_v44  ;;  %v7338_v37 = vmul.f32 %v2580_v25, %v2580_v25  ;;  %v2727_v0 = vsub.f32 %v4474_v16, %v4506_v34  ;;  %v8168_v49 = vld [vmem:[#allocation23_spill] sm:$0xff]  ;;  %v2633_v52 = vadd.f32 %v2632_v5, %v2602_v15  ;;  %v4507_v28 = vld [vmem:[%s5192_s27 + $0xf20] sm:$0xff]  ;;  %v4537_v18 = vld [vmem:[%s5186_s9 + $0x1010] sm:$0xff] }
 0x1c4   : > { %v2481_v58 = vadd.f32 %v2480_v59, %v8168_v49  ;;  %v2758_v19 = vmul.f32 %v2726_v3, %v2726_v3  ;;  %v2788_v20 = vadd.f32 %v2757_v14, %v2756_v32  ;;  %v4569_v36 = vld [vmem:[%s5192_s27 + $0x1010] sm:$0xff]  ;;  %v8169_v40 = vld [vmem:[#allocation15_spill] sm:$0xff]  ;;  %v7348_v25 = vmul.f32 %v2582_v1, %v2582_v1  ;;  %v4538_v57 = vld [vmem:[%s5186_s9 + $0x1018] sm:$0xff] }
 0x1c5   : > { %v2328_v24 = vadd.f32 %v2327_v10, %v8169_v40  ;;  %v2886_v46 = vsub.f32 %v4535_v23, %v4567_v45  ;;  %v2887_v63 = vsub.f32 %v4536_v17, %v4568_v6  ;;  %v7350_v43 = vmul.f32 %v2583_v55, %v2583_v55  ;;  %v4476_v22 = vld [vmem:[%s5186_s9 + $0xf28] sm:$0xff]  ;;  %v4477_v1 = vld [vmem:[%s5186_s9 + $0xf30] sm:$0xff]  ;;  %v4570_v55 = vld [vmem:[%s5192_s27 + $0x1018] sm:$0xff] }
 0x1c6   : > { %8170 = vst [vmem:[#allocation13_spill] sm:$0xff] %v7348_v25  ;;  %v7352_v41 = vmul.f32 %v2584_v27, %v2584_v27  ;;  %v7354_v48 = vmul.f32 %v2585_v9, %v2585_v9  ;;  %v7356_v31 = vmul.f32 %v2586_v21, %v2586_v21  ;;  %v7359_v51 = vmul.f32 %v2587_v62, %v2587_v62  ;;  %v8177_v15 = vld [vmem:[#allocation24_spill] sm:$0xff]  ;;  %v4478_v9 = vld [vmem:[%s5186_s9 + $0xf38] sm:$0xff]  ;;  %v4508_v21 = vld [vmem:[%s5192_s27 + $0xf28] sm:$0xff] }
 0x1c7   : > { %8171 = vst [vmem:[#allocation14_spill] sm:$0xff] %v7350_v43  ;;  %v7361_v12 = vmul.f32 %v2588_v39, %v2588_v39  ;;  %v2728_v42 = vsub.f32 %v4475_v11, %v4507_v28  ;;  %v2888_v7 = vsub.f32 %v4537_v18, %v4569_v36  ;;  %v2482_v27 = vadd.f32 %v2481_v58, %v8177_v15  ;;  %v4509_v62 = vld [vmem:[%s5192_s27 + $0xf30] sm:$0xff]  ;;  %v4479_v32 = vld [vmem:[%s5186_s9 + $0xf40] sm:$0xff]  ;;  %v4482_v17 = vld [vmem:[%s5186_s9 + $0xf58] sm:$0xff] }
 0x1c8   : > { %8172 = vst [vmem:[#allocation19_spill] sm:$0xff] %v7352_v41  ;;  %8173 = vst [vmem:[#allocation33_spill] sm:$0xff] %v7354_v48  ;;  %v2634_v3 = vadd.f32 %v2633_v52, %v2603_v47  ;;  %v2759_v59 = vmul.f32 %v2727_v0, %v2727_v0  ;;  %v2789_v39 = vadd.f32 %v2788_v20, %v2758_v19  ;;  %v8178_v5 = vld [vmem:[#allocation20_spill] sm:$0xff]  ;;  %v4480_v47 = vld [vmem:[%s5186_s9 + $0xf48] sm:$0xff] }
 0x1c9   : > { %8174 = vst [vmem:[#allocation23_spill] sm:$0xff] %v7356_v31  ;;  %8175 = vst [vmem:[#allocation15_spill] sm:$0xff] %v7359_v51  ;;  %v2329_v16 = vadd.f32 %v2328_v24, %v8178_v5  ;;  %v7373_v34 = vmul.f32 %v7291_v13, %v7291_v13  ;;  %v4481_v14 = vld [vmem:[%s5186_s9 + $0xf50] sm:$0xff]  ;;  %v2918_v61 = vmul.f32 %v2886_v46, %v2886_v46  ;;  %v4483_v45 = vld [vmem:[%s5186_s9 + $0xf60] sm:$0xff] }
 0x1ca   : > { %8176 = vst [vmem:[#allocation34_spill] sm:$0xff] %v7361_v12  ;;  %v2919_v10 = vmul.f32 %v2887_v63, %v2887_v63  ;;  %v7380_v23 = vmul.f32 %v7293_v30, %v7293_v30  ;;  %v7384_v44 = vmul.f32 %v7295_v50, %v7295_v50  ;;  %v7388_v13 = vmul.f32 %v7297_v38, %v7297_v38  ;;  %v4484_v6 = vld [vmem:[%s5186_s9 + $0xf68] sm:$0xff]  ;;  %v4510_v11 = vld [vmem:[%s5192_s27 + $0xf38] sm:$0xff]  ;;  %v4511_v0 = vld [vmem:[%s5192_s27 + $0xf40] sm:$0xff] }
 0x1cb   : > { %8179 = vst [vmem:[#allocation24_spill] sm:$0xff] %v7373_v34  ;;  %v4512_v30 = vld [vmem:[%s5192_s27 + $0xf48] sm:$0xff]  ;;  %v2889_v49 = vsub.f32 %v4538_v57, %v4570_v55  ;;  %v7398_v50 = vmul.f32 %v7299_v33, %v7299_v33  ;;  %v4513_v58 = vld [vmem:[%s5192_s27 + $0xf50] sm:$0xff]  ;;  %v2729_v38 = vsub.f32 %v4476_v22, %v4508_v21  ;;  %v7401_v52 = vsub.f32 %v4477_v1, %v4509_v62  ;;  %v4539_v28 = vld [vmem:[%s5186_s9 + $0x1020] sm:$0xff] }
 0x1cc   : > { %8180 = vst [vmem:[#allocation20_spill] sm:$0xff] %v7380_v23  ;;  %8181 = vst [vmem:[#allocation35_spill] sm:$0xff] %v7384_v44  ;;  %v4571_v19 = vld [vmem:[%s5192_s27 + $0x1020] sm:$0xff]  ;;  %v2920_v20 = vmul.f32 %v2888_v7, %v2888_v7  ;;  %v8184_v18 = vld [vmem:[#allocation25_spill] sm:$0xff]  ;;  %v2635_v40 = vadd.f32 %v2634_v3, %v7310_v54  ;;  %v2760_v1 = vmul.f32 %v2728_v42, %v2728_v42 }
 0x1cd   : > { %8182 = vst [vmem:[#allocation36_spill] sm:$0xff] %v7388_v13  ;;  %8183 = vst [vmem:[#allocation37_spill] sm:$0xff] %v7398_v50  ;;  %v2483_v36 = vadd.f32 %v2482_v27, %v8184_v18  ;;  %v4485_v24 = vld [vmem:[%s5186_s9 + $0xf70] sm:$0xff]  ;;  %v4486_v33 = vld [vmem:[%s5186_s9 + $0xf78] sm:$0xff]  ;;  %v2790_v57 = vadd.f32 %v2789_v39, %v2759_v59  ;;  %v7416_v54 = vsub.f32 %v4478_v9, %v4510_v11 }
 0x1ce   : > { %v4514_v46 = vld [vmem:[%s5192_s27 + $0xf58] sm:$0xff]  ;;  %v4515_v63 = vld [vmem:[%s5192_s27 + $0xf60] sm:$0xff]  ;;  %v4516_v22 = vld [vmem:[%s5192_s27 + $0xf68] sm:$0xff]  ;;  %v7418_v3 = vsub.f32 %v4479_v32, %v4511_v0  ;;  %v2950_v62 = vadd.f32 %v2919_v10, %v2918_v61  ;;  %v7427_v39 = vsub.f32 %v4480_v47, %v4512_v30  ;;  %v7429_v9 = vsub.f32 %v4481_v14, %v4513_v58 }
 0x1cf   : > { %v8185_v55 = vld [vmem:[#allocation21_spill] sm:$0xff]  ;;  %v4487_v15 = vld [vmem:[%s5186_s9 + $0xf80] sm:$0xff]  ;;  %v4488_v27 = vld [vmem:[%s5186_s9 + $0xf88] sm:$0xff]  ;;  %v2921_v32 = vmul.f32 %v2889_v49, %v2889_v49  ;;  %v7432_v10 = vsub.f32 %v4482_v17, %v4514_v46  ;;  %v7434_v11 = vsub.f32 %v4483_v45, %v4515_v63  ;;  %v7436_v0 = vsub.f32 %v4484_v6, %v4516_v22 }
 0x1d0   : > { %v2330_v7 = vadd.f32 %v2329_v16, %v8185_v55  ;;  %v4517_v21 = vld [vmem:[%s5192_s27 + $0xf70] sm:$0xff]  ;;  %v4490_v18 = vld [vmem:[%s5186_s9 + $0xf98] sm:$0xff]  ;;  %v4491_v50 = vld [vmem:[%s5186_s9 + $0xfa0] sm:$0xff]  ;;  %v2890_v16 = vsub.f32 %v4539_v28, %v4571_v19  ;;  %v2951_v47 = vadd.f32 %v2950_v62, %v2920_v20  ;;  %v2636_v14 = vadd.f32 %v2635_v40, %v7314_v56 }
 0x1d1   : > { %v4489_v5 = vld [vmem:[%s5186_s9 + $0xf90] sm:$0xff]  ;;  %v4492_v13 = vld [vmem:[%s5186_s9 + $0xfa8] sm:$0xff]  ;;  %v4518_v44 = vld [vmem:[%s5192_s27 + $0xf78] sm:$0xff]  ;;  %v2761_v28 = vmul.f32 %v2729_v38, %v2729_v38  ;;  %v2791_v19 = vadd.f32 %v2790_v57, %v2760_v1  ;;  %v7451_v56 = vsub.f32 %v4485_v24, %v4517_v21 }
 0x1d2   : > { %v4519_v42 = vld [vmem:[%s5192_s27 + $0xf80] sm:$0xff]  ;;  %v4520_v59 = vld [vmem:[%s5192_s27 + $0xf88] sm:$0xff]  ;;  %v4521_v61 = vld [vmem:[%s5192_s27 + $0xf90] sm:$0xff]  ;;  %v7453_v40 = vsub.f32 %v4486_v33, %v4518_v44  ;;  %v2922_v21 = vmul.f32 %v2890_v16, %v2890_v16  ;;  %v2952_v44 = vadd.f32 %v2951_v47, %v2921_v32 }
 0x1d3   : > { %v4540_v55 = vld [vmem:[%s5186_s9 + $0x1028] sm:$0xff]  ;;  %v8186_v30 = vld [vmem:[#allocation26_spill] sm:$0xff]  ;;  %v4493_v49 = vld [vmem:[%s5186_s9 + $0xfb0] sm:$0xff]  ;;  %v7455_v62 = vsub.f32 %v4487_v15, %v4519_v42  ;;  %v7467_v15 = vsub.f32 %v4489_v5, %v4521_v61  ;;  %v2762_v5 = vmul.f32 %v7401_v52, %v7401_v52 }
 0x1d4   : > { %v4572_v23 = vld [vmem:[%s5192_s27 + $0x1028] sm:$0xff]  ;;  %v2484_v34 = vadd.f32 %v2483_v36, %v8186_v30  ;;  %v4494_v17 = vld [vmem:[%s5186_s9 + $0xfb8] sm:$0xff]  ;;  %v4523_v45 = vld [vmem:[%s5192_s27 + $0xfa0] sm:$0xff]  ;;  %v2953_v52 = vadd.f32 %v2952_v44, %v2922_v21 }
 0x1d5   : > { %v4522_v58 = vld [vmem:[%s5192_s27 + $0xf98] sm:$0xff]  ;;  %v4524_v6 = vld [vmem:[%s5192_s27 + $0xfa8] sm:$0xff]  ;;  %v8187_v46 = vld [vmem:[#allocation22_spill] sm:$0xff]  ;;  %v2891_v24 = vsub.f32 %v4540_v55, %v4572_v23  ;;  %v2637_v23 = vadd.f32 %v2636_v14, %v7318_v26 }
 0x1d6   : > { %v2331_v20 = vadd.f32 %v2330_v7, %v8187_v46  ;;  %v4495_v63 = vld [vmem:[%s5186_s9 + $0xfc0] sm:$0xff]  ;;  %v4496_v36 = vld [vmem:[%s5186_s9 + $0xfc8] sm:$0xff]  ;;  %v4525_v22 = vld [vmem:[%s5192_s27 + $0xfb0] sm:$0xff]  ;;  %v7464_v7 = vsub.f32 %v4488_v27, %v4520_v59  ;;  %v7469_v42 = vsub.f32 %v4490_v18, %v4522_v58  ;;  %v7471_v46 = vsub.f32 %v4491_v50, %v4523_v45 }
 0x1d7   : > { %v4497_v30 = vld [vmem:[%s5186_s9 + $0xfd0] sm:$0xff]  ;;  %v4498_v12 = vld [vmem:[%s5186_s9 + $0xfd8] sm:$0xff]  ;;  %v4499_v51 = vld [vmem:[%s5186_s9 + $0xfe0] sm:$0xff]  ;;  %v7473_v48 = vsub.f32 %v4492_v13, %v4524_v6  ;;  %v2792_v18 = vadd.f32 %v2791_v19, %v2761_v28  ;;  %v7486_v47 = vsub.f32 %v4493_v49, %v4525_v22  ;;  %v2923_v25 = vmul.f32 %v2891_v24, %v2891_v24 }
 0x1d8   : > { %v4500_v31 = vld [vmem:[%s5186_s9 + $0xfe8] sm:$0xff]  ;;  %v4526_v38 = vld [vmem:[%s5192_s27 + $0xfb8] sm:$0xff]  ;;  %v4527_v1 = vld [vmem:[%s5192_s27 + $0xfc0] sm:$0xff] }
 0x1d9   : > { %v4528_v57 = vld [vmem:[%s5192_s27 + $0xfc8] sm:$0xff]  ;;  %v4529_v33 = vld [vmem:[%s5192_s27 + $0xfd0] sm:$0xff]  ;;  %v4530_v16 = vld [vmem:[%s5192_s27 + $0xfd8] sm:$0xff]  ;;  %v7488_v58 = vsub.f32 %v4494_v17, %v4526_v38  ;;  %v7490_v45 = vsub.f32 %v4495_v63, %v4527_v1  ;;  %v2764_v38 = vmul.f32 %v7418_v3, %v7418_v3  ;;  %v2954_v24 = vadd.f32 %v2953_v52, %v2923_v25 }
 0x1da   : > { %v4541_v41 = vld [vmem:[%s5186_s9 + $0x1030] sm:$0xff]  ;;  %v8188_v27 = vld [vmem:[#allocation27_spill] sm:$0xff]  ;;  %v4531_v32 = vld [vmem:[%s5192_s27 + $0xfe0] sm:$0xff]  ;;  %v7495_v6 = vsub.f32 %v4496_v36, %v4528_v57  ;;  %v7497_v28 = vsub.f32 %v4497_v30, %v4529_v33  ;;  %v7499_v19 = vsub.f32 %v4498_v12, %v4530_v16  ;;  %v2793_v30 = vadd.f32 %v2792_v18, %v2762_v5 }
 0x1db   : > { %v4573_v43 = vld [vmem:[%s5192_s27 + $0x1030] sm:$0xff]  ;;  %v2485_v59 = vadd.f32 %v2484_v34, %v8188_v27  ;;  %v4532_v55 = vld [vmem:[%s5192_s27 + $0xfe8] sm:$0xff]  ;;  %v4502_v34 = vld [vmem:[%s5186_s9 + $0xff8] sm:$0xff]  ;;  %v7528_v33 = vmul.f32 %v7429_v9, %v7429_v9  ;;  %v7536_v3 = vmul.f32 %v7434_v11, %v7434_v11  ;;  %v7558_v18 = vmul.f32 %v7455_v62, %v7455_v62 }
 0x1dc   : > { %v8189_v50 = vld [vmem:[#allocation16_spill] sm:$0xff]  ;;  %v4534_v14 = vld [vmem:[%s5192_s27 + $0xff8] sm:$0xff]  ;;  %v2892_v27 = vsub.f32 %v4541_v41, %v4573_v43  ;;  %v7503_v49 = vsub.f32 %v4500_v31, %v4532_v55  ;;  %v2638_v43 = vadd.f32 %v2637_v23, %v7323_v29  ;;  %v2763_v41 = vmul.f32 %v7416_v54, %v7416_v54  ;;  %v4599_v1 = vld [vmem:[%s5186_s9 + $0x1100] sm:$0xff] }
 0x1dd   : > { %v2332_v61 = vadd.f32 %v2331_v20, %v8189_v50  ;;  %v4501_v13 = vld [vmem:[%s5186_s9 + $0xff0] sm:$0xff]  ;;  %v7501_v20 = vsub.f32 %v4499_v51, %v4531_v32  ;;  %v4542_v17 = vld [vmem:[%s5186_s9 + $0x1038] sm:$0xff]  ;;  %v7516_v31 = vsub.f32 %v4502_v34, %v4534_v14  ;;  %v2765_v29 = vmul.f32 %v7427_v39, %v7427_v39  ;;  %v4631_v21 = vld [vmem:[%s5192_s27 + $0x1100] sm:$0xff] }
 0x1de   : > { %v4533_v26 = vld [vmem:[%s5192_s27 + $0xff0] sm:$0xff]  ;;  %v4574_v63 = vld [vmem:[%s5192_s27 + $0x1038] sm:$0xff]  ;;  %v2924_v54 = vmul.f32 %v2892_v27, %v2892_v27  ;;  %v4632_v44 = vld [vmem:[%s5192_s27 + $0x1108] sm:$0xff]  ;;  %v7540_v39 = vmul.f32 %v7436_v0, %v7436_v0  ;;  %v2639_v9 = vadd.f32 %v2638_v43, %v7327_v2  ;;  %v2794_v55 = vadd.f32 %v2793_v30, %v2763_v41 }
 0x1df   : > { %v8190_v22 = vld [vmem:[#allocation17_spill] sm:$0xff]  ;;  %v7512_v12 = vadd.f32 %v2332_v61, %v7302_v4  ;;  %v7514_v51 = vsub.f32 %v4501_v13, %v4533_v26  ;;  %v2893_v57 = vsub.f32 %v4542_v17, %v4574_v63  ;;  %v4600_v4 = vld [vmem:[%s5186_s9 + $0x1108] sm:$0xff]  ;;  %v4543_v25 = vld [vmem:[%s5186_s9 + $0x1040] sm:$0xff]  ;;  %v7554_v0 = vmul.f32 %v7453_v40, %v7453_v40 }
 0x1e0   : > { %v2486_v36 = vadd.f32 %v2485_v59, %v8190_v22  ;;  %v7532_v59 = vmul.f32 %v7432_v10, %v7432_v10  ;;  %v4575_v23 = vld [vmem:[%s5192_s27 + $0x1040] sm:$0xff]  ;;  %v7548_v10 = vmul.f32 %v7451_v56, %v7451_v56  ;;  %v4601_v11 = vld [vmem:[%s5186_s9 + $0x1110] sm:$0xff]  ;;  %v3048_v50 = vsub.f32 %v4599_v1, %v4631_v21  ;;  %v4602_v26 = vld [vmem:[%s5186_s9 + $0x1118] sm:$0xff] }
 0x1e1   : > { %v8191_v16 = vld [vmem:[#allocation18_spill] sm:$0xff]  ;;  %v4633_v5 = vld [vmem:[%s5192_s27 + $0x1110] sm:$0xff]  ;;  %v3049_v61 = vsub.f32 %v4600_v4, %v4632_v44  ;;  %v7562_v2 = vmul.f32 %v7464_v7, %v7464_v7  ;;  %v2894_v56 = vsub.f32 %v4543_v25, %v4575_v23  ;;  %v2925_v13 = vmul.f32 %v2893_v57, %v2893_v57  ;;  %v4634_v14 = vld [vmem:[%s5192_s27 + $0x1118] sm:$0xff] }
 0x1e2   : > { %v2487_v32 = vadd.f32 %v2486_v36, %v8191_v16  ;;  %v2955_v34 = vadd.f32 %v2954_v24, %v2924_v54  ;;  %v7568_v40 = vmul.f32 %v7467_v15, %v7467_v15  ;;  %v7572_v62 = vmul.f32 %v7469_v42, %v7469_v42  ;;  %v4544_v7 = vld [vmem:[%s5186_s9 + $0x1048] sm:$0xff]  ;;  %v4603_v43 = vld [vmem:[%s5186_s9 + $0x1120] sm:$0xff]  ;;  %v4545_v44 = vld [vmem:[%s5186_s9 + $0x1050] sm:$0xff] }
 0x1e3   : > { %v7576_v27 = vmul.f32 %v7471_v46, %v7471_v46  ;;  %v4576_v52 = vld [vmem:[%s5192_s27 + $0x1048] sm:$0xff]  ;;  %v3050_v17 = vsub.f32 %v4601_v11, %v4633_v5  ;;  %v2640_v36 = vadd.f32 %v2639_v9, %v7329_v8  ;;  %v7584_v15 = vmul.f32 %v7473_v48, %v7473_v48  ;;  %v4635_v41 = vld [vmem:[%s5192_s27 + $0x1120] sm:$0xff]  ;;  %v8193_v16 = vld [vmem:[#allocation12_spill] sm:$0xff] }
 0x1e4   : > { %v8192_v63 = vld [vmem:[#allocation11_spill] sm:$0xff]  ;;  %v2795_v42 = vadd.f32 %v2794_v55, %v2764_v38  ;;  %v7590_v46 = vmul.f32 %v7486_v47, %v7486_v47  ;;  %v3051_v30 = vsub.f32 %v4602_v26, %v4634_v14  ;;  %v3080_v1 = vmul.f32 %v3048_v50, %v3048_v50  ;;  %v4605_v11 = vld [vmem:[%s5186_s9 + $0x1130] sm:$0xff]  ;;  %v4546_v50 = vld [vmem:[%s5186_s9 + $0x1058] sm:$0xff] }
 0x1e5   : > { %v2488_v22 = vadd.f32 %v2487_v32, %v8192_v63  ;;  %v3081_v57 = vmul.f32 %v3049_v61, %v3049_v61  ;;  %v7594_v54 = vmul.f32 %v7488_v58, %v7488_v58  ;;  %v2895_v8 = vsub.f32 %v4544_v7, %v4576_v52  ;;  %v4604_v38 = vld [vmem:[%s5186_s9 + $0x1128] sm:$0xff]  ;;  %v4577_v58 = vld [vmem:[%s5192_s27 + $0x1050] sm:$0xff]  ;;  %v4547_v61 = vld [vmem:[%s5186_s9 + $0x1060] sm:$0xff] }
 0x1e6   : > { %v2926_v48 = vmul.f32 %v2894_v56, %v2894_v56  ;;  %v2956_v24 = vadd.f32 %v2955_v34, %v2925_v13  ;;  %v4636_v4 = vld [vmem:[%s5192_s27 + $0x1128] sm:$0xff]  ;;  %v7600_v47 = vmul.f32 %v7490_v45, %v7490_v45  ;;  %v7604_v21 = vmul.f32 %v7495_v6, %v7495_v6  ;;  %v4637_v6 = vld [vmem:[%s5192_s27 + $0x1130] sm:$0xff]  ;;  %v4606_v7 = vld [vmem:[%s5186_s9 + $0x1138] sm:$0xff] }
 0x1e7   : > { %v3052_v25 = vsub.f32 %v4603_v43, %v4635_v41  ;;  %v3082_v23 = vmul.f32 %v3050_v17, %v3050_v17  ;;  %v2489_v32 = vadd.f32 %v2488_v22, %v8193_v16  ;;  %v2641_v9 = vadd.f32 %v2640_v36, %v7331_v60  ;;  %v4548_v34 = vld [vmem:[%s5186_s9 + $0x1068] sm:$0xff]  ;;  %v4549_v17 = vld [vmem:[%s5186_s9 + $0x1070] sm:$0xff]  ;;  %v4578_v63 = vld [vmem:[%s5192_s27 + $0x1058] sm:$0xff] }
 0x1e8   : > { %v7612_v55 = vmul.f32 %v7497_v28, %v7497_v28  ;;  %v2796_v45 = vadd.f32 %v2795_v42, %v2765_v29  ;;  %v7618_v5 = vmul.f32 %v7499_v19, %v7499_v19  ;;  %v3053_v56 = vsub.f32 %v4604_v38, %v4636_v4  ;;  %v4638_v19 = vld [vmem:[%s5192_s27 + $0x1138] sm:$0xff]  ;;  %v8198_v43 = vld [vmem:[#allocation28_spill] sm:$0xff]  ;;  %v4551_v4 = vld [vmem:[%s5186_s9 + $0x1080] sm:$0xff] }
 0x1e9   : > { %v3083_v60 = vmul.f32 %v3051_v30, %v3051_v30  ;;  %v3112_v13 = vadd.f32 %v3081_v57, %v3080_v1  ;;  %v7624_v28 = vmul.f32 %v7501_v20, %v7501_v20  ;;  %v2896_v29 = vsub.f32 %v4545_v44, %v4577_v58  ;;  %v4579_v20 = vld [vmem:[%s5192_s27 + $0x1060] sm:$0xff]  ;;  %v4550_v57 = vld [vmem:[%s5186_s9 + $0x1078] sm:$0xff]  ;;  %v4581_v44 = vld [vmem:[%s5192_s27 + $0x1070] sm:$0xff] }
 0x1ea   : > { %8194 = vst [vmem:[#allocation25_spill] sm:$0xff] %v7612_v55  ;;  %8195 = vst [vmem:[#allocation21_spill] sm:$0xff] %v7618_v5  ;;  %v2927_v26 = vmul.f32 %v2895_v8, %v2895_v8  ;;  %v2957_v14 = vadd.f32 %v2956_v24, %v2926_v48  ;;  %v7631_v52 = vmul.f32 %v7503_v49, %v7503_v49  ;;  %v4580_v8 = vld [vmem:[%s5192_s27 + $0x1068] sm:$0xff]  ;;  %v4607_v48 = vld [vmem:[%s5186_s9 + $0x1140] sm:$0xff] }
 0x1eb   : > { %8196 = vst [vmem:[#allocation26_spill] sm:$0xff] %v7624_v28  ;;  %v3054_v22 = vsub.f32 %v4605_v11, %v4637_v6  ;;  %v3084_v36 = vmul.f32 %v3052_v25, %v3052_v25  ;;  %v3113_v42 = vadd.f32 %v3112_v13, %v3082_v23  ;;  %v2490_v41 = vadd.f32 %v2489_v32, %v8198_v43  ;;  %v4639_v24 = vld [vmem:[%s5192_s27 + $0x1140] sm:$0xff]  ;;  %v4582_v23 = vld [vmem:[%s5192_s27 + $0x1078] sm:$0xff]  ;;  %v4608_v11 = vld [vmem:[%s5186_s9 + $0x1148] sm:$0xff] }
 0x1ec   : > { %8197 = vst [vmem:[#allocation22_spill] sm:$0xff] %v7631_v52  ;;  %v2642_v30 = vadd.f32 %v2641_v9, %v7336_v53  ;;  %v7640_v1 = vmul.f32 %v7514_v51, %v7514_v51  ;;  %v2797_v49 = vadd.f32 %v2796_v45, %v7528_v33  ;;  %v7649_v38 = vmul.f32 %v7516_v31, %v7516_v31  ;;  %v4552_v53 = vld [vmem:[%s5186_s9 + $0x1088] sm:$0xff]  ;;  %v4553_v33 = vld [vmem:[%s5186_s9 + $0x1090] sm:$0xff]  ;;  %v4554_v6 = vld [vmem:[%s5186_s9 + $0x1098] sm:$0xff] }
 0x1ed   : > { %v3055_v51 = vsub.f32 %v4606_v7, %v4638_v19  ;;  %v3085_v58 = vmul.f32 %v3053_v56, %v3053_v56  ;;  %v3114_v25 = vadd.f32 %v3113_v42, %v3083_v60  ;;  %v2897_v16 = vsub.f32 %v4546_v50, %v4578_v63  ;;  %v4640_v31 = vld [vmem:[%s5192_s27 + $0x1148] sm:$0xff]  ;;  %v4583_v13 = vld [vmem:[%s5192_s27 + $0x1080] sm:$0xff]  ;;  %v8201_v63 = vld [vmem:[#allocation29_spill] sm:$0xff] }
 0x1ee   : > { %8199 = vst [vmem:[#allocation27_spill] sm:$0xff] %v7640_v1  ;;  %8200 = vst [vmem:[#allocation16_spill] sm:$0xff] %v7649_v38  ;;  %v2898_v32 = vsub.f32 %v4547_v61, %v4579_v20  ;;  %v2928_v9 = vmul.f32 %v2896_v29, %v2896_v29  ;;  %v2958_v45 = vadd.f32 %v2957_v14, %v2927_v26  ;;  %v4584_v7 = vld [vmem:[%s5192_s27 + $0x1088] sm:$0xff]  ;;  %v4555_v14 = vld [vmem:[%s5186_s9 + $0x10a0] sm:$0xff] }
 0x1ef   : > { %v7661_v56 = vsub.f32 %v4548_v34, %v4580_v8  ;;  %v3056_v60 = vsub.f32 %v4607_v48, %v4639_v24  ;;  %v3086_v19 = vmul.f32 %v3054_v22, %v3054_v22  ;;  %v3115_v50 = vadd.f32 %v3114_v25, %v3084_v36  ;;  %v4585_v20 = vld [vmem:[%s5192_s27 + $0x1090] sm:$0xff]  ;;  %v4556_v8 = vld [vmem:[%s5186_s9 + $0x10a8] sm:$0xff]  ;;  %v4586_v36 = vld [vmem:[%s5192_s27 + $0x1098] sm:$0xff] }
 0x1f0   : > { %v2491_v61 = vadd.f32 %v2490_v41, %v8201_v63  ;;  %v2643_v29 = vadd.f32 %v2642_v30, %v7338_v37  ;;  %v2798_v26 = vadd.f32 %v2797_v49, %v7532_v59  ;;  %v7668_v42 = vsub.f32 %v4549_v17, %v4581_v44  ;;  %v4609_v43 = vld [vmem:[%s5186_s9 + $0x1150] sm:$0xff]  ;;  %v4558_v59 = vld [vmem:[%s5186_s9 + $0x10b8] sm:$0xff]  ;;  %v4587_v49 = vld [vmem:[%s5192_s27 + $0x10a0] sm:$0xff] }
 0x1f1   : > { %v4641_v34 = vld [vmem:[%s5192_s27 + $0x1150] sm:$0xff]  ;;  %v7675_v41 = vsub.f32 %v4550_v57, %v4582_v23  ;;  %v3057_v48 = vsub.f32 %v4608_v11, %v4640_v31  ;;  %v3087_v37 = vmul.f32 %v3055_v51, %v3055_v51  ;;  %v3116_v30 = vadd.f32 %v3115_v50, %v3085_v58  ;;  %v4610_v63 = vld [vmem:[%s5186_s9 + $0x1158] sm:$0xff]  ;;  %v4559_v57 = vld [vmem:[%s5186_s9 + $0x10c0] sm:$0xff] }
 0x1f2   : > { %v4557_v22 = vld [vmem:[%s5186_s9 + $0x10b0] sm:$0xff]  ;;  %v7679_v24 = vsub.f32 %v4551_v4, %v4583_v13  ;;  %v7681_v17 = vsub.f32 %v4552_v53, %v4584_v7  ;;  %v2929_v44 = vmul.f32 %v2897_v16, %v2897_v16  ;;  %v2959_v25 = vadd.f32 %v2958_v45, %v2928_v9  ;;  %v4642_v38 = vld [vmem:[%s5192_s27 + $0x1158] sm:$0xff]  ;;  %v4588_v23 = vld [vmem:[%s5192_s27 + $0x10a8] sm:$0xff] }
 0x1f3   : > { %v4589_v51 = vld [vmem:[%s5192_s27 + $0x10b0] sm:$0xff]  ;;  %v7688_v58 = vsub.f32 %v4553_v33, %v4585_v20  ;;  %v3058_v11 = vsub.f32 %v4609_v43, %v4641_v34  ;;  %v3088_v4 = vmul.f32 %v3056_v60, %v3056_v60  ;;  %v3117_v31 = vadd.f32 %v3116_v30, %v3086_v19  ;;  %v8202_v53 = vld [vmem:[#allocation30_spill] sm:$0xff]  ;;  %v4590_v45 = vld [vmem:[%s5192_s27 + $0x10b8] sm:$0xff] }
 0x1f4   : > { %v2492_v13 = vadd.f32 %v2491_v61, %v8202_v53  ;;  %v2644_v16 = vadd.f32 %v2643_v29, %v7340_v35  ;;  %v2799_v9 = vadd.f32 %v2798_v26, %v7536_v3  ;;  %v7694_v7 = vsub.f32 %v4554_v6, %v4586_v36  ;;  %v4611_v50 = vld [vmem:[%s5186_s9 + $0x1160] sm:$0xff]  ;;  %v4560_v33 = vld [vmem:[%s5186_s9 + $0x10c8] sm:$0xff]  ;;  %v4561_v60 = vld [vmem:[%s5186_s9 + $0x10d0] sm:$0xff] }
 0x1f5   : > { %v4643_v1 = vld [vmem:[%s5192_s27 + $0x1160] sm:$0xff]  ;;  %v7701_v20 = vsub.f32 %v4555_v14, %v4587_v49  ;;  %v3059_v35 = vsub.f32 %v4610_v63, %v4642_v38  ;;  %v3089_v61 = vmul.f32 %v3057_v48, %v3057_v48  ;;  %v3118_v3 = vadd.f32 %v3117_v31, %v3087_v37  ;;  %v4664_v36 = vld [vmem:[%s5186_s9 + $0x1208] sm:$0xff]  ;;  %v4562_v14 = vld [vmem:[%s5186_s9 + $0x10d8] sm:$0xff] }
 0x1f6   : > { %v4591_v19 = vld [vmem:[%s5192_s27 + $0x10c0] sm:$0xff]  ;;  %v7704_v26 = vsub.f32 %v4556_v8, %v4588_v23  ;;  %v7706_v6 = vsub.f32 %v4557_v22, %v4589_v51  ;;  %v2930_v43 = vmul.f32 %v2898_v32, %v2898_v32  ;;  %v2960_v34 = vadd.f32 %v2959_v25, %v2929_v44  ;;  %v4696_v53 = vld [vmem:[%s5192_s27 + $0x1208] sm:$0xff]  ;;  %v4593_v38 = vld [vmem:[%s5192_s27 + $0x10d0] sm:$0xff] }
 0x1f7   : > { %v4663_v29 = vld [vmem:[%s5186_s9 + $0x1200] sm:$0xff]  ;;  %v4592_v49 = vld [vmem:[%s5192_s27 + $0x10c8] sm:$0xff]  ;;  %v7714_v48 = vsub.f32 %v4558_v59, %v4590_v45  ;;  %v3060_v37 = vsub.f32 %v4611_v50, %v4643_v1  ;;  %v3090_v22 = vmul.f32 %v3058_v11, %v3058_v11  ;;  %v3119_v63 = vadd.f32 %v3118_v3, %v3088_v4  ;;  %v8204_v25 = vld [vmem:[#allocation13_spill] sm:$0xff] }
 0x1f8   : > { %v4695_v30 = vld [vmem:[%s5192_s27 + $0x1200] sm:$0xff]  ;;  %v4612_v8 = vld [vmem:[%s5186_s9 + $0x1168] sm:$0xff]  ;;  %v2645_v23 = vadd.f32 %v2644_v16, %v8204_v25  ;;  %v2800_v51 = vadd.f32 %v2799_v9, %v7540_v39  ;;  %v7720_v31 = vsub.f32 %v4559_v57, %v4591_v19  ;;  %v4665_v28 = vld [vmem:[%s5186_s9 + $0x1210] sm:$0xff]  ;;  %v3091_v4 = vmul.f32 %v3059_v35, %v3059_v35 }
 0x1f9   : > { %v8203_v32 = vld [vmem:[#allocation31_spill] sm:$0xff]  ;;  %v4697_v59 = vld [vmem:[%s5192_s27 + $0x1210] sm:$0xff]  ;;  %v4563_v45 = vld [vmem:[%s5186_s9 + $0x10e0] sm:$0xff]  ;;  %v3210_v50 = vsub.f32 %v4663_v29, %v4695_v30  ;;  %v3211_v16 = vsub.f32 %v4664_v36, %v4696_v53  ;;  %v7728_v3 = vsub.f32 %v4560_v33, %v4592_v49  ;;  %v7730_v39 = vsub.f32 %v4561_v60, %v4593_v38 }
 0x1fa   : > { %v2493_v44 = vadd.f32 %v2492_v13, %v8203_v32  ;;  %v4644_v52 = vld [vmem:[%s5192_s27 + $0x1168] sm:$0xff]  ;;  %v4594_v1 = vld [vmem:[%s5192_s27 + $0x10d8] sm:$0xff]  ;;  %v4595_v11 = vld [vmem:[%s5192_s27 + $0x10e0] sm:$0xff]  ;;  %v3120_v13 = vadd.f32 %v3119_v63, %v3089_v61  ;;  %v2931_v57 = vmul.f32 %v7661_v56, %v7661_v56  ;;  %v2961_v9 = vadd.f32 %v2960_v34, %v2930_v43 }
 0x1fb   : > { %8205 = vst [vmem:[#allocation17_spill] sm:$0xff] %v7730_v39  ;;  %v4666_v19 = vld [vmem:[%s5186_s9 + $0x1218] sm:$0xff]  ;;  %v4564_v25 = vld [vmem:[%s5186_s9 + $0x10e8] sm:$0xff]  ;;  %v4565_v35 = vld [vmem:[%s5186_s9 + $0x10f0] sm:$0xff]  ;;  %v3061_v33 = vsub.f32 %v4612_v8, %v4644_v52  ;;  %v3092_v36 = vmul.f32 %v3060_v37, %v3060_v37  ;;  %v3212_v60 = vsub.f32 %v4665_v28, %v4697_v59  ;;  %v2801_v56 = vadd.f32 %v2800_v51, %v7548_v10 }
 0x1fc   : > { %v4698_v32 = vld [vmem:[%s5192_s27 + $0x1218] sm:$0xff]  ;;  %v4613_v61 = vld [vmem:[%s5186_s9 + $0x1170] sm:$0xff]  ;;  %v3121_v30 = vadd.f32 %v3120_v13, %v3090_v22  ;;  %v8206_v53 = vld [vmem:[#allocation14_spill] sm:$0xff]  ;;  %v7743_v34 = vsub.f32 %v4562_v14, %v4594_v1  ;;  %v7745_v38 = vsub.f32 %v4563_v45, %v4595_v11  ;;  %v3242_v22 = vmul.f32 %v3210_v50, %v3210_v50 }
 0x1fd   : > { %v4645_v29 = vld [vmem:[%s5192_s27 + $0x1170] sm:$0xff]  ;;  %v2646_v49 = vadd.f32 %v2645_v23, %v8206_v53  ;;  %v4566_v43 = vld [vmem:[%s5186_s9 + $0x10f8] sm:$0xff]  ;;  %v4667_v63 = vld [vmem:[%s5186_s9 + $0x1220] sm:$0xff]  ;;  %v3213_v28 = vsub.f32 %v4666_v19, %v4698_v32  ;;  %v3243_v23 = vmul.f32 %v3211_v16, %v3211_v16  ;;  %v2932_v14 = vmul.f32 %v7668_v42, %v7668_v42 }
 0x1fe   : > { %8207 = vst [vmem:[#allocation18_spill] sm:$0xff] %v7743_v34  ;;  %8208 = vst [vmem:[#allocation11_spill] sm:$0xff] %v7745_v38  ;;  %v4699_v5 = vld [vmem:[%s5192_s27 + $0x1220] sm:$0xff]  ;;  %v4596_v55 = vld [vmem:[%s5192_s27 + $0x10e8] sm:$0xff]  ;;  %v3122_v37 = vadd.f32 %v3121_v30, %v3091_v4  ;;  %v2962_v51 = vadd.f32 %v2961_v9, %v2931_v57  ;;  %v3062_v45 = vsub.f32 %v4613_v61, %v4645_v29 }
 0x1ff   : > { %v4597_v52 = vld [vmem:[%s5192_s27 + $0x10f0] sm:$0xff]  ;;  %v4598_v8 = vld [vmem:[%s5192_s27 + $0x10f8] sm:$0xff]  ;;  %v4668_v1 = vld [vmem:[%s5186_s9 + $0x1228] sm:$0xff]  ;;  %v3093_v38 = vmul.f32 %v3061_v33, %v3061_v33  ;;  %v3214_v39 = vsub.f32 %v4667_v63, %v4699_v5  ;;  %v3244_v4 = vmul.f32 %v3212_v60, %v3212_v60  ;;  %v2802_v50 = vadd.f32 %v2801_v56, %v7554_v0 }
 0x200   : > { %v8209_v59 = vld [vmem:[#allocation32_spill] sm:$0xff]  ;;  %v4700_v11 = vld [vmem:[%s5192_s27 + $0x1228] sm:$0xff]  ;;  %v4614_v13 = vld [vmem:[%s5186_s9 + $0x1178] sm:$0xff]  ;;  %v3123_v34 = vadd.f32 %v3122_v37, %v3092_v36  ;;  %v7762_v42 = vsub.f32 %v4565_v35, %v4597_v52  ;;  %v7764_v16 = vsub.f32 %v4566_v43, %v4598_v8  ;;  %v3245_v29 = vmul.f32 %v3213_v28, %v3213_v28 }
 0x201   : > { %v2494_v10 = vadd.f32 %v2493_v44, %v8209_v59  ;;  %v4646_v53 = vld [vmem:[%s5192_s27 + $0x1178] sm:$0xff]  ;;  %v7760_v44 = vsub.f32 %v4564_v25, %v4596_v55  ;;  %v4669_v57 = vld [vmem:[%s5186_s9 + $0x1230] sm:$0xff]  ;;  %v8210_v19 = vld [vmem:[#allocation19_spill] sm:$0xff]  ;;  %v3215_v61 = vsub.f32 %v4668_v1, %v4700_v11  ;;  %v3274_v5 = vadd.f32 %v3243_v23, %v3242_v22 }
 0x202   : > { %v4701_v9 = vld [vmem:[%s5192_s27 + $0x1230] sm:$0xff]  ;;  %v2647_v32 = vadd.f32 %v2646_v49, %v8210_v19  ;;  %v2933_v33 = vmul.f32 %v7675_v41, %v7675_v41  ;;  %v2963_v0 = vadd.f32 %v2962_v51, %v2932_v14  ;;  %v3063_v55 = vsub.f32 %v4614_v13, %v4646_v53  ;;  %v4670_v36 = vld [vmem:[%s5186_s9 + $0x1238] sm:$0xff]  ;;  %v4615_v30 = vld [vmem:[%s5186_s9 + $0x1180] sm:$0xff] }
 0x203   : > { %v3094_v25 = vmul.f32 %v3062_v45, %v3062_v45  ;;  %v4702_v35 = vld [vmem:[%s5192_s27 + $0x1238] sm:$0xff]  ;;  %v4647_v60 = vld [vmem:[%s5192_s27 + $0x1180] sm:$0xff]  ;;  %v3124_v56 = vadd.f32 %v3123_v34, %v3093_v38  ;;  %v3216_v43 = vsub.f32 %v4669_v57, %v4701_v9  ;;  %v3246_v63 = vmul.f32 %v3214_v39, %v3214_v39  ;;  %v4704_v51 = vld [vmem:[%s5192_s27 + $0x1248] sm:$0xff] }
 0x204   : > { %v3275_v49 = vadd.f32 %v3274_v5, %v3244_v4  ;;  %v7776_v52 = vadd.f32 %v2494_v10, %v7512_v12  ;;  %v2803_v41 = vadd.f32 %v2802_v50, %v7558_v18  ;;  %v2934_v8 = vmul.f32 %v7679_v24, %v7679_v24  ;;  %v4671_v28 = vld [vmem:[%s5186_s9 + $0x1240] sm:$0xff]  ;;  %v8211_v38 = vld [vmem:[#allocation33_spill] sm:$0xff]  ;;  %v4672_v24 = vld [vmem:[%s5186_s9 + $0x1248] sm:$0xff] }
 0x205   : > { %v2935_v37 = vmul.f32 %v7681_v17, %v7681_v17  ;;  %v4703_v34 = vld [vmem:[%s5192_s27 + $0x1240] sm:$0xff]  ;;  %v2648_v39 = vadd.f32 %v2647_v32, %v8211_v38  ;;  %v3217_v22 = vsub.f32 %v4670_v36, %v4702_v35  ;;  %v3247_v23 = vmul.f32 %v3215_v61, %v3215_v61  ;;  %v4616_v17 = vld [vmem:[%s5186_s9 + $0x1188] sm:$0xff]  ;;  %v4673_v9 = vld [vmem:[%s5186_s9 + $0x1250] sm:$0xff] }
 0x206   : > { %v3276_v59 = vadd.f32 %v3275_v49, %v3245_v29  ;;  %v7788_v12 = vmul.f32 %v7688_v58, %v7688_v58  ;;  %v2964_v18 = vadd.f32 %v2963_v0, %v2933_v33  ;;  %v3064_v10 = vsub.f32 %v4615_v30, %v4647_v60  ;;  %v4648_v45 = vld [vmem:[%s5192_s27 + $0x1188] sm:$0xff]  ;;  %v4705_v19 = vld [vmem:[%s5192_s27 + $0x1250] sm:$0xff]  ;;  %v4618_v0 = vld [vmem:[%s5186_s9 + $0x1198] sm:$0xff] }
 0x207   : > { %v3095_v14 = vmul.f32 %v3063_v55, %v3063_v55  ;;  %v3125_v1 = vadd.f32 %v3124_v56, %v3094_v25  ;;  %v3218_v11 = vsub.f32 %v4671_v28, %v4703_v34  ;;  %v3248_v13 = vmul.f32 %v3216_v43, %v3216_v43  ;;  %v4674_v25 = vld [vmem:[%s5186_s9 + $0x1258] sm:$0xff]  ;;  %v4619_v35 = vld [vmem:[%s5186_s9 + $0x11a0] sm:$0xff]  ;;  %v4620_v30 = vld [vmem:[%s5186_s9 + $0x11a8] sm:$0xff] }
 0x208   : > { %v3277_v53 = vadd.f32 %v3276_v59, %v3246_v63  ;;  %v2804_v4 = vadd.f32 %v2803_v41, %v7562_v2  ;;  %v7797_v58 = vmul.f32 %v7694_v7, %v7694_v7  ;;  %v7801_v50 = vmul.f32 %v7701_v20, %v7701_v20  ;;  %v8212_v2 = vld [vmem:[#allocation23_spill] sm:$0xff]  ;;  %v4617_v7 = vld [vmem:[%s5186_s9 + $0x1190] sm:$0xff]  ;;  %v4706_v36 = vld [vmem:[%s5192_s27 + $0x1258] sm:$0xff] }
 0x209   : > { %v7805_v57 = vmul.f32 %v7704_v26, %v7704_v26  ;;  %v2649_v32 = vadd.f32 %v2648_v39, %v8212_v2  ;;  %v3219_v61 = vsub.f32 %v4672_v24, %v4704_v51  ;;  %v3249_v29 = vmul.f32 %v3217_v22, %v3217_v22  ;;  %v4649_v60 = vld [vmem:[%s5192_s27 + $0x1190] sm:$0xff]  ;;  %v4650_v56 = vld [vmem:[%s5192_s27 + $0x1198] sm:$0xff]  ;;  %v4651_v43 = vld [vmem:[%s5192_s27 + $0x11a0] sm:$0xff] }
 0x20a   : > { %v3278_v5 = vadd.f32 %v3277_v53, %v3247_v23  ;;  %v7813_v20 = vmul.f32 %v7706_v6, %v7706_v6  ;;  %v2965_v33 = vadd.f32 %v2964_v18, %v2934_v8  ;;  %v3065_v26 = vsub.f32 %v4616_v17, %v4648_v45  ;;  %v4652_v39 = vld [vmem:[%s5192_s27 + $0x11a8] sm:$0xff]  ;;  %v4675_v22 = vld [vmem:[%s5186_s9 + $0x1260] sm:$0xff]  ;;  %v4709_v2 = vld [vmem:[%s5192_s27 + $0x1270] sm:$0xff] }
 0x20b   : > { %v3096_v55 = vmul.f32 %v3064_v10, %v3064_v10  ;;  %v3126_v63 = vadd.f32 %v3125_v1, %v3095_v14  ;;  %v3220_v6 = vsub.f32 %v4673_v9, %v4705_v19  ;;  %v3250_v49 = vmul.f32 %v3218_v11, %v3218_v11  ;;  %v4707_v23 = vld [vmem:[%s5192_s27 + $0x1260] sm:$0xff]  ;;  %v8213_v59 = vld [vmem:[#allocation15_spill] sm:$0xff]  ;;  %v4677_v19 = vld [vmem:[%s5186_s9 + $0x1270] sm:$0xff] }
 0x20c   : > { %v3279_v41 = vadd.f32 %v3278_v5, %v3248_v13  ;;  %v2805_v8 = vadd.f32 %v2804_v4, %v7568_v40  ;;  %v7826_v28 = vmul.f32 %v7714_v48, %v7714_v48  ;;  %v7830_v34 = vmul.f32 %v7720_v31, %v7720_v31  ;;  %v4621_v48 = vld [vmem:[%s5186_s9 + $0x11b0] sm:$0xff]  ;;  %v4676_v18 = vld [vmem:[%s5186_s9 + $0x1268] sm:$0xff]  ;;  %v4759_v13 = vld [vmem:[%s5192_s27 + $0x1300] sm:$0xff] }
 0x20d   : > { %v7834_v38 = vmul.f32 %v7728_v3, %v7728_v3  ;;  %v7840_v40 = vadd.f32 %v2649_v32, %v8213_v59  ;;  %v4708_v31 = vld [vmem:[%s5192_s27 + $0x1268] sm:$0xff]  ;;  %v3221_v10 = vsub.f32 %v4674_v25, %v4706_v36  ;;  %v3251_v14 = vmul.f32 %v3219_v61, %v3219_v61  ;;  %v4727_v3 = vld [vmem:[%s5186_s9 + $0x1300] sm:$0xff]  ;;  %v4653_v4 = vld [vmem:[%s5192_s27 + $0x11b0] sm:$0xff] }
 0x20e   : > { %v3280_v24 = vadd.f32 %v3279_v41, %v3249_v29  ;;  %v2966_v51 = vadd.f32 %v2965_v33, %v2935_v37  ;;  %v3066_v17 = vsub.f32 %v4617_v7, %v4649_v60  ;;  %v3067_v45 = vsub.f32 %v4618_v0, %v4650_v56  ;;  %v4728_v11 = vld [vmem:[%s5186_s9 + $0x1308] sm:$0xff]  ;;  %v4622_v7 = vld [vmem:[%s5186_s9 + $0x11b8] sm:$0xff]  ;;  %v4761_v25 = vld [vmem:[%s5192_s27 + $0x1310] sm:$0xff] }
 0x20f   : > { %v3097_v1 = vmul.f32 %v3065_v26, %v3065_v26  ;;  %v4760_v53 = vld [vmem:[%s5192_s27 + $0x1308] sm:$0xff]  ;;  %v3127_v9 = vadd.f32 %v3126_v63, %v3096_v55  ;;  %v3222_v32 = vsub.f32 %v4675_v22, %v4707_v23  ;;  %v3252_v61 = vmul.f32 %v3220_v6, %v3220_v6  ;;  %v4729_v26 = vld [vmem:[%s5186_s9 + $0x1310] sm:$0xff]  ;;  %v4654_v36 = vld [vmem:[%s5192_s27 + $0x11b8] sm:$0xff] }
 0x210   : > { %v3281_v29 = vadd.f32 %v3280_v24, %v3250_v49  ;;  %v2806_v37 = vadd.f32 %v2805_v8, %v7572_v62  ;;  %v3068_v5 = vsub.f32 %v4619_v35, %v4651_v43  ;;  %v7854_v33 = vsub.f32 %v4620_v30, %v4652_v39  ;;  %v4678_v55 = vld [vmem:[%s5186_s9 + $0x1278] sm:$0xff]  ;;  %v4679_v22 = vld [vmem:[%s5186_s9 + $0x1280] sm:$0xff] }
 0x211   : > { %v3223_v0 = vsub.f32 %v4676_v18, %v4708_v31  ;;  %v4710_v60 = vld [vmem:[%s5192_s27 + $0x1278] sm:$0xff]  ;;  %v3253_v56 = vmul.f32 %v3221_v10, %v3221_v10  ;;  %v3372_v6 = vsub.f32 %v4727_v3, %v4759_v13  ;;  %v3373_v49 = vsub.f32 %v4728_v11, %v4760_v53  ;;  %v4711_v23 = vld [vmem:[%s5192_s27 + $0x1280] sm:$0xff] }
 0x212   : > { %v3282_v63 = vadd.f32 %v3281_v29, %v3251_v14  ;;  %v2967_v62 = vadd.f32 %v2966_v51, %v7788_v12  ;;  %v7862_v35 = vsub.f32 %v4621_v48, %v4653_v4  ;;  %v3098_v30 = vmul.f32 %v3066_v17, %v3066_v17  ;;  %v4730_v41 = vld [vmem:[%s5186_s9 + $0x1318] sm:$0xff]  ;;  %v4731_v24 = vld [vmem:[%s5186_s9 + $0x1320] sm:$0xff]  ;;  %v4680_v51 = vld [vmem:[%s5186_s9 + $0x1288] sm:$0xff] }
 0x213   : > { %v3224_v43 = vsub.f32 %v4677_v19, %v4709_v2  ;;  %v4762_v8 = vld [vmem:[%s5192_s27 + $0x1318] sm:$0xff]  ;;  %v3128_v39 = vadd.f32 %v3127_v9, %v3097_v1  ;;  %v3254_v59 = vmul.f32 %v3222_v32, %v3222_v32  ;;  %v3374_v31 = vsub.f32 %v4729_v26, %v4761_v25  ;;  %v4763_v3 = vld [vmem:[%s5192_s27 + $0x1320] sm:$0xff]  ;;  %v4712_v17 = vld [vmem:[%s5192_s27 + $0x1288] sm:$0xff] }
 0x214   : > { %v3283_v18 = vadd.f32 %v3282_v63, %v3252_v61  ;;  %v2807_v10 = vadd.f32 %v2806_v37, %v7576_v27  ;;  %v7869_v12 = vsub.f32 %v4622_v7, %v4654_v36  ;;  %v3225_v48 = vsub.f32 %v4678_v55, %v4710_v60  ;;  %v4681_v9 = vld [vmem:[%s5186_s9 + $0x1290] sm:$0xff]  ;;  %v4732_v32 = vld [vmem:[%s5186_s9 + $0x1328] sm:$0xff]  ;;  %v4714_v63 = vld [vmem:[%s5192_s27 + $0x1298] sm:$0xff] }
 0x215   : > { %v3255_v14 = vmul.f32 %v3223_v0, %v3223_v0  ;;  %v3375_v11 = vsub.f32 %v4730_v41, %v4762_v8  ;;  %v3404_v13 = vmul.f32 %v3372_v6, %v3372_v6  ;;  %v3405_v53 = vmul.f32 %v3373_v49, %v3373_v49  ;;  %v4764_v61 = vld [vmem:[%s5192_s27 + $0x1328] sm:$0xff]  ;;  %v4713_v37 = vld [vmem:[%s5192_s27 + $0x1290] sm:$0xff]  ;;  %v4683_v41 = vld [vmem:[%s5186_s9 + $0x12a0] sm:$0xff] }
 0x216   : > { %v3284_v1 = vadd.f32 %v3283_v18, %v3253_v56  ;;  %v2968_v4 = vadd.f32 %v2967_v62, %v7797_v58  ;;  %v3099_v27 = vmul.f32 %v3067_v45, %v3067_v45  ;;  %v3226_v19 = vsub.f32 %v4679_v22, %v4711_v23  ;;  %v4733_v0 = vld [vmem:[%s5186_s9 + $0x1330] sm:$0xff]  ;;  %v4682_v56 = vld [vmem:[%s5186_s9 + $0x1298] sm:$0xff] }
 0x217   : > { %v3256_v2 = vmul.f32 %v3224_v43, %v3224_v43  ;;  %v3129_v29 = vadd.f32 %v3128_v39, %v3098_v30  ;;  %v4765_v26 = vld [vmem:[%s5192_s27 + $0x1330] sm:$0xff]  ;;  %v3376_v25 = vsub.f32 %v4731_v24, %v4763_v3  ;;  %v3406_v36 = vmul.f32 %v3374_v31, %v3374_v31  ;;  %v4735_v31 = vld [vmem:[%s5186_s9 + $0x1340] sm:$0xff] }
 0x218   : > { %v3285_v7 = vadd.f32 %v3284_v1, %v3254_v59  ;;  %v2808_v58 = vadd.f32 %v2807_v10, %v7584_v15  ;;  %v3100_v45 = vmul.f32 %v3068_v5, %v3068_v5  ;;  %v3227_v55 = vsub.f32 %v4680_v51, %v4712_v17  ;;  %v4734_v15 = vld [vmem:[%s5186_s9 + $0x1338] sm:$0xff]  ;;  %v4715_v59 = vld [vmem:[%s5192_s27 + $0x12a0] sm:$0xff]  ;;  %v4684_v17 = vld [vmem:[%s5186_s9 + $0x12a8] sm:$0xff] }
 0x219   : > { %v3257_v60 = vmul.f32 %v3225_v48, %v3225_v48  ;;  %v3377_v49 = vsub.f32 %v4732_v32, %v4764_v61  ;;  %v3407_v62 = vmul.f32 %v3375_v11, %v3375_v11  ;;  %v3436_v30 = vadd.f32 %v3405_v53, %v3404_v13  ;;  %v4766_v5 = vld [vmem:[%s5192_s27 + $0x1338] sm:$0xff]  ;;  %v4767_v10 = vld [vmem:[%s5192_s27 + $0x1340] sm:$0xff]  ;;  %v4716_v1 = vld [vmem:[%s5192_s27 + $0x12a8] sm:$0xff] }
 0x21a   : > { %v3286_v6 = vadd.f32 %v3285_v7, %v3255_v14  ;;  %v2969_v43 = vadd.f32 %v2968_v4, %v7801_v50  ;;  %v3228_v8 = vsub.f32 %v4681_v9, %v4713_v37  ;;  %v3258_v39 = vmul.f32 %v3226_v19, %v3226_v19  ;;  %v4685_v9 = vld [vmem:[%s5186_s9 + $0x12b0] sm:$0xff] }
 0x21b   : > { %v3378_v22 = vsub.f32 %v4733_v0, %v4765_v26  ;;  %v3130_v23 = vadd.f32 %v3129_v29, %v3099_v27  ;;  %v3408_v48 = vmul.f32 %v3376_v25, %v3376_v25  ;;  %v3437_v14 = vadd.f32 %v3436_v30, %v3406_v36  ;;  %v4717_v29 = vld [vmem:[%s5192_s27 + $0x12b0] sm:$0xff]  ;;  %v4686_v30 = vld [vmem:[%s5186_s9 + $0x12b8] sm:$0xff] }
 0x21c   : > { %v3287_v18 = vadd.f32 %v3286_v6, %v3256_v2  ;;  %v2809_v50 = vadd.f32 %v2808_v58, %v7590_v46  ;;  %v3101_v24 = vmul.f32 %v7854_v33, %v7854_v33  ;;  %v3229_v3 = vsub.f32 %v4682_v56, %v4714_v63  ;;  %v4736_v2 = vld [vmem:[%s5186_s9 + $0x1348] sm:$0xff]  ;;  %v4737_v7 = vld [vmem:[%s5186_s9 + $0x1350] sm:$0xff] }
 0x21d   : > { %v3259_v51 = vmul.f32 %v3227_v55, %v3227_v55  ;;  %v3379_v13 = vsub.f32 %v4734_v15, %v4766_v5  ;;  %v3409_v53 = vmul.f32 %v3377_v49, %v3377_v49  ;;  %v3438_v4 = vadd.f32 %v3437_v14, %v3407_v62  ;;  %v4768_v33 = vld [vmem:[%s5192_s27 + $0x1348] sm:$0xff]  ;;  %v4769_v0 = vld [vmem:[%s5192_s27 + $0x1350] sm:$0xff]  ;;  %v4718_v15 = vld [vmem:[%s5192_s27 + $0x12b8] sm:$0xff] }
 0x21e   : > { %v3288_v11 = vadd.f32 %v3287_v18, %v3257_v60  ;;  %v2970_v27 = vadd.f32 %v2969_v43, %v7805_v57  ;;  %v3230_v19 = vsub.f32 %v4683_v41, %v4715_v59  ;;  %v3260_v46 = vmul.f32 %v3228_v8, %v3228_v8  ;;  %v4623_v60 = vld [vmem:[%s5186_s9 + $0x11c0] sm:$0xff]  ;;  %v4738_v41 = vld [vmem:[%s5186_s9 + $0x1358] sm:$0xff]  ;;  %v4624_v14 = vld [vmem:[%s5186_s9 + $0x11c8] sm:$0xff] }
 0x21f   : > { %v3380_v32 = vsub.f32 %v4735_v31, %v4767_v10  ;;  %v3131_v61 = vadd.f32 %v3130_v23, %v3100_v45  ;;  %v3410_v26 = vmul.f32 %v3378_v22, %v3378_v22  ;;  %v3439_v25 = vadd.f32 %v3438_v4, %v3408_v48  ;;  %v4655_v45 = vld [vmem:[%s5192_s27 + $0x11c0] sm:$0xff]  ;;  %v4772_v4 = vld [vmem:[%s5192_s27 + $0x1368] sm:$0xff] }
 0x220   : > { %v3289_v37 = vadd.f32 %v3288_v11, %v3258_v39  ;;  %v2810_v57 = vadd.f32 %v2809_v50, %v7594_v54  ;;  %v3102_v36 = vmul.f32 %v7862_v35, %v7862_v35  ;;  %v3231_v58 = vsub.f32 %v4684_v17, %v4716_v1  ;;  %v4770_v35 = vld [vmem:[%s5192_s27 + $0x1358] sm:$0xff]  ;;  %v4739_v22 = vld [vmem:[%s5186_s9 + $0x1360] sm:$0xff]  ;;  %v4656_v50 = vld [vmem:[%s5192_s27 + $0x11c8] sm:$0xff] }
 0x221   : > { %v3261_v55 = vmul.f32 %v3229_v3, %v3229_v3  ;;  %v3381_v63 = vsub.f32 %v4736_v2, %v4768_v33  ;;  %v3411_v6 = vmul.f32 %v3379_v13, %v3379_v13  ;;  %v3440_v49 = vadd.f32 %v3439_v25, %v3409_v53  ;;  %v4771_v23 = vld [vmem:[%s5192_s27 + $0x1360] sm:$0xff]  ;;  %v4740_v53 = vld [vmem:[%s5186_s9 + $0x1368] sm:$0xff]  ;;  %v4773_v2 = vld [vmem:[%s5192_s27 + $0x1370] sm:$0xff] }
 0x222   : > { %v3290_v56 = vadd.f32 %v3289_v37, %v3259_v51  ;;  %v2971_v62 = vadd.f32 %v2970_v27, %v7813_v20  ;;  %v3232_v43 = vsub.f32 %v4685_v9, %v4717_v29  ;;  %v3262_v54 = vmul.f32 %v3230_v19, %v3230_v19  ;;  %v4687_v11 = vld [vmem:[%s5186_s9 + $0x12c0] sm:$0xff] }
 0x223   : > { %v3382_v8 = vsub.f32 %v4737_v7, %v4769_v0  ;;  %v3132_v39 = vadd.f32 %v3131_v61, %v3101_v24  ;;  %v3412_v59 = vmul.f32 %v3380_v32, %v3380_v32  ;;  %v3441_v18 = vadd.f32 %v3440_v49, %v3410_v26  ;;  %v4719_v9 = vld [vmem:[%s5192_s27 + $0x12c0] sm:$0xff]  ;;  %v4625_v0 = vld [vmem:[%s5186_s9 + $0x11d0] sm:$0xff]  ;;  %v4720_v49 = vld [vmem:[%s5192_s27 + $0x12c8] sm:$0xff] }
 0x224   : > { %v3291_v5 = vadd.f32 %v3290_v56, %v3260_v46  ;;  %v2811_v20 = vadd.f32 %v2810_v57, %v7600_v47  ;;  %v3072_v31 = vsub.f32 %v4623_v60, %v4655_v45  ;;  %v3103_v10 = vmul.f32 %v7869_v12, %v7869_v12  ;;  %v4741_v46 = vld [vmem:[%s5186_s9 + $0x1370] sm:$0xff]  ;;  %v8214_v61 = vld [vmem:[#allocation34_spill] sm:$0xff]  ;;  %v4688_v60 = vld [vmem:[%s5186_s9 + $0x12c8] sm:$0xff] }
 0x225   : > { %v3263_v48 = vmul.f32 %v3231_v58, %v3231_v58  ;;  %v3383_v3 = vsub.f32 %v4738_v41, %v4770_v35  ;;  %v3413_v51 = vmul.f32 %v3381_v63, %v3381_v63  ;;  %v3442_v17 = vadd.f32 %v3441_v18, %v3411_v6  ;;  %v4657_v26 = vld [vmem:[%s5192_s27 + $0x11d0] sm:$0xff]  ;;  %v4658_v18 = vld [vmem:[%s5192_s27 + $0x11d8] sm:$0xff] }
 0x226   : > { %v3292_v24 = vadd.f32 %v3291_v5, %v3261_v55  ;;  %v2972_v1 = vadd.f32 %v2971_v62, %v7826_v28  ;;  %v3233_v13 = vsub.f32 %v4686_v30, %v4718_v15  ;;  %v3264_v47 = vmul.f32 %v3232_v43, %v3232_v43  ;;  %v4743_v30 = vld [vmem:[%s5186_s9 + $0x1380] sm:$0xff]  ;;  %v8215_v35 = vld [vmem:[#allocation24_spill] sm:$0xff] }
 0x227   : > { %v3384_v12 = vsub.f32 %v4739_v22, %v4771_v23  ;;  %v3133_v27 = vadd.f32 %v3132_v39, %v3102_v36  ;;  %v3414_v33 = vmul.f32 %v3382_v8, %v3382_v8  ;;  %v3443_v32 = vadd.f32 %v3442_v17, %v3412_v59  ;;  %v4775_v43 = vld [vmem:[%s5192_s27 + $0x1380] sm:$0xff]  ;;  %v8216_v8 = vld [vmem:[#allocation17_spill] sm:$0xff] }
 0x228   : > { %v3293_v19 = vadd.f32 %v3292_v24, %v3262_v54  ;;  %v2651_v28 = vadd.f32 %v7840_v40, %v8214_v61  ;;  %v2812_v29 = vadd.f32 %v2811_v20, %v7604_v21  ;;  %v3073_v37 = vsub.f32 %v4624_v14, %v4656_v50  ;;  %v4742_v40 = vld [vmem:[%s5186_s9 + $0x1378] sm:$0xff]  ;;  %v4689_v14 = vld [vmem:[%s5186_s9 + $0x12d0] sm:$0xff]  ;;  %v4627_v61 = vld [vmem:[%s5186_s9 + $0x11e0] sm:$0xff] }
 0x229   : > { %v3104_v7 = vmul.f32 %v3072_v31, %v3072_v31  ;;  %v3385_v57 = vsub.f32 %v4740_v53, %v4772_v4  ;;  %v3415_v36 = vmul.f32 %v3383_v3, %v3383_v3  ;;  %v3444_v58 = vadd.f32 %v3443_v32, %v3413_v51  ;;  %v4774_v21 = vld [vmem:[%s5192_s27 + $0x1378] sm:$0xff]  ;;  %v4744_v3 = vld [vmem:[%s5186_s9 + $0x1388] sm:$0xff]  ;;  %v4777_v53 = vld [vmem:[%s5192_s27 + $0x1390] sm:$0xff] }
 0x22a   : > { %v3294_v25 = vadd.f32 %v3293_v19, %v3263_v48  ;;  %v2973_v55 = vadd.f32 %v2972_v1, %v7830_v34  ;;  %v3234_v45 = vsub.f32 %v4687_v11, %v4719_v9  ;;  %v3265_v56 = vmul.f32 %v3233_v13, %v3233_v13  ;;  %v8217_v22 = vld [vmem:[#allocation25_spill] sm:$0xff]  ;;  %v4776_v51 = vld [vmem:[%s5192_s27 + $0x1388] sm:$0xff]  ;;  %v4721_v11 = vld [vmem:[%s5192_s27 + $0x12d0] sm:$0xff] }
 0x22b   : > { %v3386_v63 = vsub.f32 %v4741_v46, %v4773_v2  ;;  %v3134_v6 = vadd.f32 %v3133_v27, %v3103_v10  ;;  %v3416_v54 = vmul.f32 %v3384_v12, %v3384_v12  ;;  %v3445_v41 = vadd.f32 %v3444_v58, %v3414_v33  ;;  %v4626_v59 = vld [vmem:[%s5186_s9 + $0x11d8] sm:$0xff]  ;;  %v8218_v27 = vld [vmem:[#allocation20_spill] sm:$0xff]  ;;  %v8219_v9 = vld [vmem:[#allocation18_spill] sm:$0xff] }
 0x22c   : > { %v3295_v62 = vadd.f32 %v3294_v25, %v3264_v47  ;;  %v2652_v34 = vadd.f32 %v2651_v28, %v8215_v35  ;;  %v2944_v39 = vmul.f32 %v8216_v8, %v8216_v8  ;;  %v3074_v15 = vsub.f32 %v4625_v0, %v4657_v26  ;;  %v4745_v47 = vld [vmem:[%s5186_s9 + $0x1390] sm:$0xff]  ;;  %v8220_v33 = vld [vmem:[#allocation21_spill] sm:$0xff]  ;;  %v4659_v28 = vld [vmem:[%s5192_s27 + $0x11e0] sm:$0xff] }
 0x22d   : > { %v3105_v5 = vmul.f32 %v3073_v37, %v3073_v37  ;;  %v2813_v23 = vadd.f32 %v2812_v29, %v8217_v22  ;;  %v3387_v20 = vsub.f32 %v4742_v40, %v4774_v21  ;;  %v3417_v31 = vmul.f32 %v3385_v57, %v3385_v57  ;;  %v4690_v26 = vld [vmem:[%s5186_s9 + $0x12d8] sm:$0xff]  ;;  %v4747_v40 = vld [vmem:[%s5186_s9 + $0x13a0] sm:$0xff]  ;;  %v4628_v8 = vld [vmem:[%s5186_s9 + $0x11e8] sm:$0xff] }
 0x22e   : > { %v3446_v10 = vadd.f32 %v3445_v41, %v3415_v36  ;;  %v2974_v48 = vadd.f32 %v2973_v55, %v7834_v38  ;;  %v3235_v50 = vsub.f32 %v4688_v60, %v4720_v49  ;;  %v3266_v24 = vmul.f32 %v3234_v45, %v3234_v45  ;;  %v4746_v36 = vld [vmem:[%s5186_s9 + $0x1398] sm:$0xff]  ;;  %v4779_v21 = vld [vmem:[%s5192_s27 + $0x13a0] sm:$0xff]  ;;  %v8221_v49 = vld [vmem:[#allocation35_spill] sm:$0xff] }
 0x22f   : > { %v3388_v17 = vsub.f32 %v4743_v30, %v4775_v43  ;;  %v3135_v1 = vadd.f32 %v3134_v6, %v3104_v7  ;;  %v3296_v13 = vadd.f32 %v3295_v62, %v3265_v56  ;;  %v3418_v4 = vmul.f32 %v3386_v63, %v3386_v63  ;;  %v4778_v58 = vld [vmem:[%s5192_s27 + $0x1398] sm:$0xff]  ;;  %v8222_v30 = vld [vmem:[#allocation11_spill] sm:$0xff]  ;;  %v8223_v35 = vld [vmem:[#allocation26_spill] sm:$0xff] }
 0x230   : > { %v3447_v12 = vadd.f32 %v3446_v10, %v3416_v54  ;;  %v2653_v38 = vadd.f32 %v2652_v34, %v8218_v27  ;;  %v2945_v19 = vmul.f32 %v8219_v9, %v8219_v9  ;;  %v3075_v46 = vsub.f32 %v4626_v59, %v4658_v18  ;;  %v4722_v45 = vld [vmem:[%s5192_s27 + $0x12d8] sm:$0xff]  ;;  %v4691_v59 = vld [vmem:[%s5186_s9 + $0x12e0] sm:$0xff]  ;;  %v4780_v10 = vld [vmem:[%s5192_s27 + $0x13a8] sm:$0xff] }
 0x231   : > { %v3106_v2 = vmul.f32 %v3074_v15, %v3074_v15  ;;  %v2814_v32 = vadd.f32 %v2813_v23, %v8220_v33  ;;  %v3389_v29 = vsub.f32 %v4744_v3, %v4776_v51  ;;  %v3419_v37 = vmul.f32 %v3387_v20, %v3387_v20  ;;  %v4749_v3 = vld [vmem:[%s5186_s9 + $0x13b0] sm:$0xff] }
 0x232   : > { %v3448_v7 = vadd.f32 %v3447_v12, %v3417_v31  ;;  %v2975_v0 = vadd.f32 %v2974_v48, %v2944_v39  ;;  %v3236_v25 = vsub.f32 %v4689_v14, %v4721_v11  ;;  %v3267_v57 = vmul.f32 %v3235_v50, %v3235_v50  ;;  %v4660_v39 = vld [vmem:[%s5192_s27 + $0x11e8] sm:$0xff]  ;;  %v4723_v50 = vld [vmem:[%s5192_s27 + $0x12e0] sm:$0xff]  ;;  %v4781_v51 = vld [vmem:[%s5192_s27 + $0x13b0] sm:$0xff] }
 0x233   : > { %v3390_v55 = vsub.f32 %v4745_v47, %v4777_v53  ;;  %v3136_v60 = vadd.f32 %v3135_v1, %v3105_v5  ;;  %v3297_v56 = vadd.f32 %v3296_v13, %v3266_v24  ;;  %v3420_v63 = vmul.f32 %v3388_v17, %v3388_v17  ;;  %v4748_v31 = vld [vmem:[%s5186_s9 + $0x13a8] sm:$0xff]  ;;  %v8224_v11 = vld [vmem:[#allocation36_spill] sm:$0xff]  ;;  %v8225_v12 = vld [vmem:[#allocation22_spill] sm:$0xff] }
 0x234   : > { %v3449_v6 = vadd.f32 %v3448_v7, %v3418_v4  ;;  %v2654_v62 = vadd.f32 %v2653_v38, %v8221_v49  ;;  %v2946_v43 = vmul.f32 %v8222_v30, %v8222_v30  ;;  %v3076_v54 = vsub.f32 %v4627_v61, %v4659_v28  ;;  %v4629_v38 = vld [vmem:[%s5186_s9 + $0x11f0] sm:$0xff]  ;;  %v4662_v49 = vld [vmem:[%s5192_s27 + $0x11f8] sm:$0xff] }
 0x235   : > { %v3107_v41 = vmul.f32 %v3075_v46, %v3075_v46  ;;  %v2815_v34 = vadd.f32 %v2814_v32, %v8223_v35  ;;  %v3391_v15 = vsub.f32 %v4746_v36, %v4778_v58  ;;  %v3421_v5 = vmul.f32 %v3389_v29, %v3389_v29  ;;  %v4661_v9 = vld [vmem:[%s5192_s27 + $0x11f0] sm:$0xff]  ;;  %v4692_v32 = vld [vmem:[%s5186_s9 + $0x12e8] sm:$0xff]  ;;  %v4750_v29 = vld [vmem:[%s5186_s9 + $0x13b8] sm:$0xff] }
 0x236   : > { %v3450_v22 = vadd.f32 %v3449_v6, %v3419_v37  ;;  %v2976_v23 = vadd.f32 %v2975_v0, %v2945_v19  ;;  %v3237_v18 = vsub.f32 %v4690_v26, %v4722_v45  ;;  %v3268_v20 = vmul.f32 %v3236_v25, %v3236_v25  ;;  %v4724_v0 = vld [vmem:[%s5192_s27 + $0x12e8] sm:$0xff]  ;;  %v4751_v25 = vld [vmem:[%s5186_s9 + $0x13c0] sm:$0xff]  ;;  %v4630_v6 = vld [vmem:[%s5186_s9 + $0x11f8] sm:$0xff] }
 0x237   : > { %v3392_v48 = vsub.f32 %v4747_v40, %v4779_v21  ;;  %v3137_v14 = vadd.f32 %v3136_v60, %v3106_v2  ;;  %v3298_v24 = vadd.f32 %v3297_v56, %v3267_v57  ;;  %v3422_v17 = vmul.f32 %v3390_v55, %v3390_v55  ;;  %v4783_v57 = vld [vmem:[%s5192_s27 + $0x13c0] sm:$0xff]  ;;  %v8226_v55 = vld [vmem:[#allocation37_spill] sm:$0xff]  ;;  %v8227_v21 = vld [vmem:[#allocation27_spill] sm:$0xff] }
 0x238   : > { %v3451_v1 = vadd.f32 %v3450_v22, %v3420_v63  ;;  %v2655_v13 = vadd.f32 %v2654_v62, %v8224_v11  ;;  %v2947_v47 = vmul.f32 %v7760_v44, %v7760_v44  ;;  %v3077_v53 = vsub.f32 %v4628_v8, %v4660_v39  ;;  %v4782_v44 = vld [vmem:[%s5192_s27 + $0x13b8] sm:$0xff]  ;;  %v4752_v8 = vld [vmem:[%s5186_s9 + $0x13c8] sm:$0xff] }
 0x239   : > { %v3108_v4 = vmul.f32 %v3076_v54, %v3076_v54  ;;  %v2816_v27 = vadd.f32 %v2815_v34, %v8225_v12  ;;  %v3393_v19 = vsub.f32 %v4748_v31, %v4780_v10  ;;  %v3423_v46 = vmul.f32 %v3391_v15, %v3391_v15  ;;  %v4784_v39 = vld [vmem:[%s5192_s27 + $0x13c8] sm:$0xff]  ;;  %v4786_v12 = vld [vmem:[%s5192_s27 + $0x13d8] sm:$0xff] }
 0x23a   : > { %v3452_v2 = vadd.f32 %v3451_v1, %v3421_v5  ;;  %v2977_v33 = vadd.f32 %v2976_v23, %v2946_v43  ;;  %v3238_v61 = vsub.f32 %v4691_v59, %v4723_v50  ;;  %v3269_v28 = vmul.f32 %v3237_v18, %v3237_v18  ;;  %v4725_v5 = vld [vmem:[%s5192_s27 + $0x12f0] sm:$0xff] }
 0x23b   : > { %v3394_v37 = vsub.f32 %v4749_v3, %v4781_v51  ;;  %v3138_v7 = vadd.f32 %v3137_v14, %v3107_v41  ;;  %v3299_v26 = vadd.f32 %v3298_v24, %v3268_v20  ;;  %v3424_v36 = vmul.f32 %v3392_v48, %v3392_v48  ;;  %v4693_v41 = vld [vmem:[%s5186_s9 + $0x12f0] sm:$0xff]  ;;  %v4694_v3 = vld [vmem:[%s5186_s9 + $0x12f8] sm:$0xff] }
 0x23c   : > { %v3453_v58 = vadd.f32 %v3452_v2, %v3422_v17  ;;  %v2656_v60 = vadd.f32 %v2655_v13, %v8226_v55  ;;  %v2948_v45 = vmul.f32 %v7762_v42, %v7762_v42  ;;  %v3078_v56 = vsub.f32 %v4629_v38, %v4661_v9  ;;  %v4753_v23 = vld [vmem:[%s5186_s9 + $0x13d0] sm:$0xff]  ;;  %v4726_v13 = vld [vmem:[%s5192_s27 + $0x12f8] sm:$0xff]  ;;  %v4755_v38 = vld [vmem:[%s5186_s9 + $0x13e0] sm:$0xff] }
 0x23d   : > { %v3109_v40 = vmul.f32 %v3077_v53, %v3077_v53  ;;  %v2817_v63 = vadd.f32 %v2816_v27, %v8227_v21  ;;  %v3395_v62 = vsub.f32 %v4750_v29, %v4782_v44  ;;  %v3425_v30 = vmul.f32 %v3393_v19, %v3393_v19  ;;  %v4785_v59 = vld [vmem:[%s5192_s27 + $0x13d0] sm:$0xff]  ;;  %v4787_v9 = vld [vmem:[%s5192_s27 + $0x13e0] sm:$0xff] }
 0x23e   : > { %v3454_v43 = vadd.f32 %v3453_v58, %v3423_v46  ;;  %v2978_v54 = vadd.f32 %v2977_v33, %v2947_v47  ;;  %v3239_v35 = vsub.f32 %v4692_v32, %v4724_v0  ;;  %v3270_v34 = vmul.f32 %v3238_v61, %v3238_v61  ;;  %v8228_v50 = vld [vmem:[#allocation16_spill] sm:$0xff]  ;;  %v4788_v0 = vld [vmem:[%s5192_s27 + $0x13e8] sm:$0xff] }
 0x23f   : > { %v3396_v42 = vsub.f32 %v4751_v25, %v4783_v57  ;;  %v3139_v15 = vadd.f32 %v3138_v7, %v3108_v4  ;;  %v3300_v22 = vadd.f32 %v3299_v26, %v3269_v28  ;;  %v3426_v18 = vmul.f32 %v3394_v37, %v3394_v37  ;;  %v4754_v4 = vld [vmem:[%s5186_s9 + $0x13d8] sm:$0xff]  ;;  %v4756_v7 = vld [vmem:[%s5186_s9 + $0x13e8] sm:$0xff]  ;;  %v4789_v58 = vld [vmem:[%s5192_s27 + $0x13f0] sm:$0xff] }
 0x240   : > { %v3455_v20 = vadd.f32 %v3454_v43, %v3424_v36  ;;  %v2657_v31 = vadd.f32 %v2656_v60, %v7776_v52  ;;  %v2949_v10 = vmul.f32 %v7764_v16, %v7764_v16  ;;  %v3079_v48 = vsub.f32 %v4630_v6, %v4662_v49  ;;  %v4757_v36 = vld [vmem:[%s5186_s9 + $0x13f0] sm:$0xff]  ;;  %v4758_v6 = vld [vmem:[%s5186_s9 + $0x13f8] sm:$0xff] }
 0x241   : > { %v3110_v14 = vmul.f32 %v3078_v56, %v3078_v56  ;;  %v2818_v24 = vadd.f32 %v2817_v63, %v8228_v50  ;;  %v3397_v51 = vsub.f32 %v4752_v8, %v4784_v39  ;;  %v3427_v17 = vmul.f32 %v3395_v62, %v3395_v62  ;;  %v4790_v49 = vld [vmem:[%s5192_s27 + $0x13f8] sm:$0xff] }
 0x242   : > { %v3456_v1 = vadd.f32 %v3455_v20, %v3425_v30  ;;  %v2979_v11 = vadd.f32 %v2978_v54, %v2948_v45  ;;  %v3240_v47 = vsub.f32 %v4693_v41, %v4725_v5  ;;  %v3271_v53 = vmul.f32 %v3239_v35, %v3239_v35 }
 0x243   : > { %v3398_v52 = vsub.f32 %v4753_v23, %v4785_v59  ;;  %v3140_v16 = vadd.f32 %v3139_v15, %v3109_v40  ;;  %v3301_v27 = vadd.f32 %v3300_v22, %v3270_v34  ;;  %v3428_v19 = vmul.f32 %v3396_v42, %v3396_v42 }
 0x244   : > { %v3457_v46 = vadd.f32 %v3456_v1, %v3426_v18  ;;  %v3111_v2 = vmul.f32 %v3079_v48, %v3079_v48  ;;  %v3241_v33 = vsub.f32 %v4694_v3, %v4726_v13  ;;  %v3399_v32 = vsub.f32 %v4754_v4, %v4786_v12 }
 0x245   : > { %v3429_v61 = vmul.f32 %v3397_v51, %v3397_v51  ;;  %v2819_v29 = vadd.f32 %v2818_v24, %v2657_v31  ;;  %v2980_v44 = vadd.f32 %v2979_v11, %v2949_v10  ;;  %v3272_v37 = vmul.f32 %v3240_v47, %v3240_v47  ;;  %v3468_v31 = vld [vmem:[#allocation7] sm:$0xff] }
 0x246   : > { %v3458_v28 = vadd.f32 %v3457_v46, %v3427_v17  ;;  %v3400_v26 = vsub.f32 %v4755_v38, %v4787_v9  ;;  %v3141_v25 = vadd.f32 %v3140_v16, %v3110_v14  ;;  %v3302_v57 = vadd.f32 %v3301_v27, %v3271_v53 }
 0x247   : > { %v3430_v55 = vmul.f32 %v3398_v52, %v3398_v52  ;;  %v3401_v45 = vsub.f32 %v4756_v7, %v4788_v0  ;;  %v3431_v56 = vmul.f32 %v3399_v32, %v3399_v32  ;;  %v2981_v21 = vadd.f32 %v2980_v44, %v2819_v29 }
 0x248   : > { %v3459_v60 = vadd.f32 %v3458_v28, %v3428_v19  ;;  %v3273_v63 = vmul.f32 %v3241_v33, %v3241_v33  ;;  %v3402_v62 = vsub.f32 %v4757_v36, %v4789_v58  ;;  %v3142_v30 = vadd.f32 %v3141_v25, %v3111_v2 }
 0x249   : > { %v3303_v43 = vadd.f32 %v3302_v57, %v3272_v37  ;;  %v3432_v54 = vmul.f32 %v3400_v26, %v3400_v26  ;;  %v3403_v35 = vsub.f32 %v4758_v6, %v4790_v49  ;;  %v3433_v34 = vmul.f32 %v3401_v45, %v3401_v45 }
 0x24a   : > { %v3460_v40 = vadd.f32 %v3459_v60, %v3429_v61  ;;  %v3143_v39 = vadd.f32 %v3142_v30, %v2981_v21  ;;  %v3434_v15 = vmul.f32 %v3402_v62, %v3402_v62 }
 0x24b   : > { %v3304_v42 = vadd.f32 %v3303_v43, %v3273_v63  ;;  %v3435_v22 = vmul.f32 %v3403_v35, %v3403_v35 }
 0x24c   : > { %v3461_v41 = vadd.f32 %v3460_v40, %v3430_v55 }
 0x24d   : > { %v3305_v59 = vadd.f32 %v3304_v42, %v3143_v39 }
 0x24e   : > { %v3462_v8 = vadd.f32 %v3461_v41, %v3431_v56 }
 0x250   : > { %v3463_v5 = vadd.f32 %v3462_v8, %v3432_v54 }
 0x252   : > { %v3464_v23 = vadd.f32 %v3463_v5, %v3433_v34 }
 0x254   : > { %v3465_v18 = vadd.f32 %v3464_v23, %v3434_v15 }
 0x256   : > { %v3466_v20 = vadd.f32 %v3465_v18, %v3435_v22 }
 0x258   : > { %v3467_v10 = vadd.f32 %v3466_v20, %v3305_v59 }
 0x25a   : > { %v3469_v48 = vadd.f32 %v3468_v31, %v3467_v10 }
 0x25c   : > { %3470 = vst [vmem:[#allocation7] sm:$0xff] %v3469_v48 }
 0x25d   : > { %4943 = shalt.err (!%p4940_p5)
}
 0x25e   : > { %s4944_s15 = scalar_lea.hbm %s8065_s2, 128 }
 0x25f   : > { %p4945_p6 = scmp.ne.s32.totalorder %s8065_s2, %s4944_s15  ;;  %p4950_p0 = scmp.lt.u32.totalorder %s4944_s15, %s8065_s2 }
 0x261   : > { %p4946_p10 = pnand %p4945_p6, %p8019_p11 }
 0x263   : > { %p4947_p12 = pneg %p4946_p10 }
 0x265   : > { %p4952_p7 = pnand %p4950_p0, %p4947_p12 }
 0x267   : > { %4955 = shalt.err (!%p4952_p7)
}
 0x268   : > { %4805 = dma.vmem_to_hbm [thread:$0]  (%p8019_p11), %s3481_s19, 128, %s8065_s2, [#allocation4]  }
 0x269   : > { %4989 = dma.done.wait (%p8019_p11), [#allocation4], 128  }
 0x26a   : > { %4991 = vsyncadd (%p8019_p11), [#allocation4], 4294967168 }
 0x26b PF: > { %s19_s14 = sadd.s32 1, %s5014_s14   ;;  %s8230_s9 = smov %s4998_s10 }
 0x26c   : > { %p16_p9 = scmp.ge.s32.totalorder %s19_s14, 4   ;;  %s8231_s10 = smov %s5002_s11 }
 0x26d   : > { %s8232_s11 = smov %s5084_s20  ;;  %s8233_s12 = smov %s5010_s13 }
 0x26e   : > { %s8234_s13 = smov %s8236_s16  ;;  %18 = sbr.rel (!%p16_p9) target bundleno = 7 (0x7), region = 121 }
 0x275   :  { %3493 = vsyncpa [#allocation3], 1 }
 0x276   :  { %3495 = vsyncpa [#allocation3 + $0x1], 1 }
 0x277   :  { %3496 = vsyncpa [#allocation6], 1 }
 0x278   :  { %3498 = vsyncpa [#allocation6 + $0x1], 1 }
 0x279   :  { %3499 = vsyncpa [#allocation4], 1 }
 0x27a   :  { %3501 = vsyncpa [#allocation4 + $0x1], 1 }

</bundles_post_ra>
